<compile_context>
chip_gen: v6e
topology: v6e:2x2x1
jax: 0.10.0
libtpu: 0.0.40
codegen_flags: <defaults>
</compile_context>

<pallas_src>
import jax
import jax.numpy as jnp
from jax.experimental import pallas as pl
from jax.experimental.pallas import tpu as pltpu  # noqa: F401  (TPU backend)


def model_forward(x, w, b):
    N, C, H, Wd = x.shape
    Cout = w.shape[0]
    HW = H * Wd
    assert N == 1, "module is defined for batch 1 (x1 = randn(1, 32, 8, 8))"
    assert H == Wd, "per-channel spatial matmul requires H == W"

    # Constant-fold the elementwise chain (- -0.3, +0.1, +0.01, -100.1) into bias.
    const = 0.3 + 0.1 + 0.01 - 100.1  # = -99.69
    b_eff = b.astype(jnp.float32) + jnp.float32(const)  # (Cout,)

    # Fold the effective bias into the conv matmul: append b_eff as an extra
    # column of W and a row of ones to X.  Zero-pad the contraction dim to a
    # sublane multiple so the padded region is well defined.
    K = C + 1
    Kp = ((K + 7) // 8) * 8  # 40
    w_aug = jnp.zeros((Cout, Kp), jnp.float32)
    w_aug = w_aug.at[:, :C].set(w.astype(jnp.float32))
    w_aug = w_aug.at[:, C].set(b_eff)
    x_aug = jnp.zeros((Kp, HW), jnp.float32)
    x_aug = x_aug.at[:C, :].set(x.reshape(C, HW).astype(jnp.float32))
    x_aug = x_aug.at[C, :].set(1.0)

    def fused_kernel(w_ref, x_ref, o_ref):
        # Stage 1: 1x1 conv + folded bias/constants as a single MXU matmul.
        v5 = jnp.dot(w_ref[...], x_ref[...],
                     preferred_element_type=jnp.float32)  # (Cout, H*W)

        # TODO(synk): torch.mm requires 2-D inputs, so torch.mm(v5, v5) on a
        # 4-D tensor raises in PyTorch; implemented as the per-(N, C) spatial
        # (H, W) @ (H, W) matmul, batched over channels.
        #
        # Stage 2: per-channel squaring in the native (C, H*W) lane layout:
        #   out[c, i*W+k] = sum_j v5[c, i*W+j] * v5[c, j*W+k]
        # Static 8-lane slices + single-lane broadcasts + VPU mul-adds only;
        # no reshape/relayout and no MXU involvement.
        cols = [v5[:, j * Wd:(j + 1) * Wd] for j in range(H)]  # cols[j][c,k] = v5[c, j*W+k]
        for i in range(H):
            row_i = cols[i]                       # row_i[c, j] = v5[c, i*W+j]
            acc = row_i[:, 0:1] * cols[0]
            for j in range(1, H):
                acc = acc + row_i[:, j:j + 1] * cols[j]
            o_ref[:, i * Wd:(i + 1) * Wd] = acc   # direct (Cout, W) sub-slice store

    cost = pl.CostEstimate(
        flops=2 * Cout * Kp * HW + 2 * Cout * H * Wd * Wd,   # ~196K
        transcendentals=0,
        bytes_accessed=(Cout * Kp + Kp * HW + Cout * HW) * 4,  # ~24 KB
    )

    out2d = pl.pallas_call(
        fused_kernel,
        out_shape=jax.ShapeDtypeStruct((Cout, HW), jnp.float32),
        in_specs=[
            pl.BlockSpec((Cout, Kp), lambda: (0, 0)),
            pl.BlockSpec((Kp, HW), lambda: (0, 0)),
        ],
        out_specs=pl.BlockSpec((Cout, HW), lambda: (0, 0)),
        cost_estimate=cost,
    )(w_aug, x_aug)

    return out2d.reshape(N, Cout, H, Wd)


if __name__ == "__main__":
    key = jax.random.PRNGKey(0)
    k_x, k_w, k_b = jax.random.split(key, 3)

    N, C, H, W = 1, 32, 8, 8  # shapes implied by the module
    x = jax.random.normal(k_x, (N, C, H, W), dtype=jnp.float32)

    # Deterministic Conv2d(32, 32, 1) parameter init (PyTorch-style uniform).
    fan_in = C * 1 * 1
    bound = 1.0 / (fan_in ** 0.5)
    w = jax.random.uniform(k_w, (C, C), dtype=jnp.float32, minval=-bound, maxval=bound)
    b = jax.random.uniform(k_b, (C,), dtype=jnp.float32, minval=-bound, maxval=bound)

    out = model_forward(x, w, b)
    jax.block_until_ready(out)

    # Sanity check against a pure-JAX reference that mirrors the original
    # (unfolded) elementwise chain and the per-channel spatial matmul.
    v1 = jnp.einsum("oc,nchw->nohw", w, x) + b[None, :, None, None]
    v5 = ((v1 - (-0.3)) + 0.1 + 0.01) - 100.1
    ref = jnp.einsum("ncij,ncjk->ncik", v5, v5)
    assert jnp.allclose(out, ref, atol=1e-3, rtol=1e-3), "mismatch vs reference"

    print("KERNEL_OK")
</pallas_src>

<mosaic_0001>
module attributes {stable_mosaic.version = 11 : i64} {
  func.func @fused_kernel(%arg0: memref<32x40xf32, #tpu.memory_space<vmem>>, %arg1: memref<40x64xf32, #tpu.memory_space<vmem>>, %arg2: memref<32x64xf32, #tpu.memory_space<vmem>>) attributes {dimension_semantics = [], scalar_prefetch = 0 : i64, scratch_operands = 0 : i64, tpu.core_type = #tpu.core_type<tc>} {
    %c0 = arith.constant 0 : index
    %c0_0 = arith.constant 0 : index
    %0 = vector.load %arg0[%c0, %c0_0] : memref<32x40xf32, #tpu.memory_space<vmem>>, vector<32x40xf32>
    %c0_1 = arith.constant 0 : index
    %c0_2 = arith.constant 0 : index
    %1 = vector.load %arg1[%c0_1, %c0_2] : memref<40x64xf32, #tpu.memory_space<vmem>>, vector<40x64xf32>
    %cst = arith.constant dense<0.000000e+00> : vector<32x64xf32>
    %2 = tpu.matmul %0, %1, %cst {dimension_numbers = #tpu.dot_dimension_numbers<[1], [0], [0], [1], [0, 0, 1, 1], [], []>} : vector<32x40xf32>, vector<40x64xf32>, vector<32x64xf32> -> vector<32x64xf32>
    %3 = vector.extract_strided_slice %2 {offsets = [0, 0], sizes = [32, 8], strides = [1, 1]} : vector<32x64xf32> to vector<32x8xf32>
    %4 = vector.extract_strided_slice %2 {offsets = [0, 8], sizes = [32, 8], strides = [1, 1]} : vector<32x64xf32> to vector<32x8xf32>
    %5 = vector.extract_strided_slice %2 {offsets = [0, 16], sizes = [32, 8], strides = [1, 1]} : vector<32x64xf32> to vector<32x8xf32>
    %6 = vector.extract_strided_slice %2 {offsets = [0, 24], sizes = [32, 8], strides = [1, 1]} : vector<32x64xf32> to vector<32x8xf32>
    %7 = vector.extract_strided_slice %2 {offsets = [0, 32], sizes = [32, 8], strides = [1, 1]} : vector<32x64xf32> to vector<32x8xf32>
    %8 = vector.extract_strided_slice %2 {offsets = [0, 40], sizes = [32, 8], strides = [1, 1]} : vector<32x64xf32> to vector<32x8xf32>
    %9 = vector.extract_strided_slice %2 {offsets = [0, 48], sizes = [32, 8], strides = [1, 1]} : vector<32x64xf32> to vector<32x8xf32>
    %10 = vector.extract_strided_slice %2 {offsets = [0, 56], sizes = [32, 8], strides = [1, 1]} : vector<32x64xf32> to vector<32x8xf32>
    %11 = vector.extract_strided_slice %3 {offsets = [0, 0], sizes = [32, 1], strides = [1, 1]} : vector<32x8xf32> to vector<32x1xf32>
    %12 = vector.broadcast %11 : vector<32x1xf32> to vector<32x8xf32>
    %13 = arith.mulf %12, %3 : vector<32x8xf32>
    %14 = vector.extract_strided_slice %3 {offsets = [0, 1], sizes = [32, 1], strides = [1, 1]} : vector<32x8xf32> to vector<32x1xf32>
    %15 = vector.broadcast %14 : vector<32x1xf32> to vector<32x8xf32>
    %16 = arith.mulf %15, %4 : vector<32x8xf32>
    %17 = arith.addf %13, %16 : vector<32x8xf32>
    %18 = vector.extract_strided_slice %3 {offsets = [0, 2], sizes = [32, 1], strides = [1, 1]} : vector<32x8xf32> to vector<32x1xf32>
    %19 = vector.broadcast %18 : vector<32x1xf32> to vector<32x8xf32>
    %20 = arith.mulf %19, %5 : vector<32x8xf32>
    %21 = arith.addf %17, %20 : vector<32x8xf32>
    %22 = vector.extract_strided_slice %3 {offsets = [0, 3], sizes = [32, 1], strides = [1, 1]} : vector<32x8xf32> to vector<32x1xf32>
    %23 = vector.broadcast %22 : vector<32x1xf32> to vector<32x8xf32>
    %24 = arith.mulf %23, %6 : vector<32x8xf32>
    %25 = arith.addf %21, %24 : vector<32x8xf32>
    %26 = vector.extract_strided_slice %3 {offsets = [0, 4], sizes = [32, 1], strides = [1, 1]} : vector<32x8xf32> to vector<32x1xf32>
    %27 = vector.broadcast %26 : vector<32x1xf32> to vector<32x8xf32>
    %28 = arith.mulf %27, %7 : vector<32x8xf32>
    %29 = arith.addf %25, %28 : vector<32x8xf32>
    %30 = vector.extract_strided_slice %3 {offsets = [0, 5], sizes = [32, 1], strides = [1, 1]} : vector<32x8xf32> to vector<32x1xf32>
    %31 = vector.broadcast %30 : vector<32x1xf32> to vector<32x8xf32>
    %32 = arith.mulf %31, %8 : vector<32x8xf32>
    %33 = arith.addf %29, %32 : vector<32x8xf32>
    %34 = vector.extract_strided_slice %3 {offsets = [0, 6], sizes = [32, 1], strides = [1, 1]} : vector<32x8xf32> to vector<32x1xf32>
    %35 = vector.broadcast %34 : vector<32x1xf32> to vector<32x8xf32>
    %36 = arith.mulf %35, %9 : vector<32x8xf32>
    %37 = arith.addf %33, %36 : vector<32x8xf32>
    %38 = vector.extract_strided_slice %3 {offsets = [0, 7], sizes = [32, 1], strides = [1, 1]} : vector<32x8xf32> to vector<32x1xf32>
    %39 = vector.broadcast %38 : vector<32x1xf32> to vector<32x8xf32>
    %40 = arith.mulf %39, %10 : vector<32x8xf32>
    %41 = arith.addf %37, %40 : vector<32x8xf32>
    %c0_3 = arith.constant 0 : index
    %c0_4 = arith.constant 0 : index
    %42 = vector.load %arg2[%c0_3, %c0_4] : memref<32x64xf32, #tpu.memory_space<vmem>>, vector<32x8xf32>
    tpu.vector_store %arg2[%c0_3, %c0_4], %41 {strides = array<i32>} : memref<32x64xf32, #tpu.memory_space<vmem>>, vector<32x8xf32>,
    %43 = vector.extract_strided_slice %4 {offsets = [0, 0], sizes = [32, 1], strides = [1, 1]} : vector<32x8xf32> to vector<32x1xf32>
    %44 = vector.broadcast %43 : vector<32x1xf32> to vector<32x8xf32>
    %45 = arith.mulf %44, %3 : vector<32x8xf32>
    %46 = vector.extract_strided_slice %4 {offsets = [0, 1], sizes = [32, 1], strides = [1, 1]} : vector<32x8xf32> to vector<32x1xf32>
    %47 = vector.broadcast %46 : vector<32x1xf32> to vector<32x8xf32>
    %48 = arith.mulf %47, %4 : vector<32x8xf32>
    %49 = arith.addf %45, %48 : vector<32x8xf32>
    %50 = vector.extract_strided_slice %4 {offsets = [0, 2], sizes = [32, 1], strides = [1, 1]} : vector<32x8xf32> to vector<32x1xf32>
    %51 = vector.broadcast %50 : vector<32x1xf32> to vector<32x8xf32>
    %52 = arith.mulf %51, %5 : vector<32x8xf32>
    %53 = arith.addf %49, %52 : vector<32x8xf32>
    %54 = vector.extract_strided_slice %4 {offsets = [0, 3], sizes = [32, 1], strides = [1, 1]} : vector<32x8xf32> to vector<32x1xf32>
    %55 = vector.broadcast %54 : vector<32x1xf32> to vector<32x8xf32>
    %56 = arith.mulf %55, %6 : vector<32x8xf32>
    %57 = arith.addf %53, %56 : vector<32x8xf32>
    %58 = vector.extract_strided_slice %4 {offsets = [0, 4], sizes = [32, 1], strides = [1, 1]} : vector<32x8xf32> to vector<32x1xf32>
    %59 = vector.broadcast %58 : vector<32x1xf32> to vector<32x8xf32>
    %60 = arith.mulf %59, %7 : vector<32x8xf32>
    %61 = arith.addf %57, %60 : vector<32x8xf32>
    %62 = vector.extract_strided_slice %4 {offsets = [0, 5], sizes = [32, 1], strides = [1, 1]} : vector<32x8xf32> to vector<32x1xf32>
    %63 = vector.broadcast %62 : vector<32x1xf32> to vector<32x8xf32>
    %64 = arith.mulf %63, %8 : vector<32x8xf32>
    %65 = arith.addf %61, %64 : vector<32x8xf32>
    %66 = vector.extract_strided_slice %4 {offsets = [0, 6], sizes = [32, 1], strides = [1, 1]} : vector<32x8xf32> to vector<32x1xf32>
    %67 = vector.broadcast %66 : vector<32x1xf32> to vector<32x8xf32>
    %68 = arith.mulf %67, %9 : vector<32x8xf32>
    %69 = arith.addf %65, %68 : vector<32x8xf32>
    %70 = vector.extract_strided_slice %4 {offsets = [0, 7], sizes = [32, 1], strides = [1, 1]} : vector<32x8xf32> to vector<32x1xf32>
    %71 = vector.broadcast %70 : vector<32x1xf32> to vector<32x8xf32>
    %72 = arith.mulf %71, %10 : vector<32x8xf32>
    %73 = arith.addf %69, %72 : vector<32x8xf32>
    %c0_5 = arith.constant 0 : index
    %c8 = arith.constant 8 : index
    %74 = vector.load %arg2[%c0_5, %c8] : memref<32x64xf32, #tpu.memory_space<vmem>>, vector<32x8xf32>
    tpu.vector_store %arg2[%c0_5, %c8], %73 {strides = array<i32>} : memref<32x64xf32, #tpu.memory_space<vmem>>, vector<32x8xf32>,
    %75 = vector.extract_strided_slice %5 {offsets = [0, 0], sizes = [32, 1], strides = [1, 1]} : vector<32x8xf32> to vector<32x1xf32>
    %76 = vector.broadcast %75 : vector<32x1xf32> to vector<32x8xf32>
    %77 = arith.mulf %76, %3 : vector<32x8xf32>
    %78 = vector.extract_strided_slice %5 {offsets = [0, 1], sizes = [32, 1], strides = [1, 1]} : vector<32x8xf32> to vector<32x1xf32>
    %79 = vector.broadcast %78 : vector<32x1xf32> to vector<32x8xf32>
    %80 = arith.mulf %79, %4 : vector<32x8xf32>
    %81 = arith.addf %77, %80 : vector<32x8xf32>
    %82 = vector.extract_strided_slice %5 {offsets = [0, 2], sizes = [32, 1], strides = [1, 1]} : vector<32x8xf32> to vector<32x1xf32>
    %83 = vector.broadcast %82 : vector<32x1xf32> to vector<32x8xf32>
    %84 = arith.mulf %83, %5 : vector<32x8xf32>
    %85 = arith.addf %81, %84 : vector<32x8xf32>
    %86 = vector.extract_strided_slice %5 {offsets = [0, 3], sizes = [32, 1], strides = [1, 1]} : vector<32x8xf32> to vector<32x1xf32>
    %87 = vector.broadcast %86 : vector<32x1xf32> to vector<32x8xf32>
    %88 = arith.mulf %87, %6 : vector<32x8xf32>
    %89 = arith.addf %85, %88 : vector<32x8xf32>
    %90 = vector.extract_strided_slice %5 {offsets = [0, 4], sizes = [32, 1], strides = [1, 1]} : vector<32x8xf32> to vector<32x1xf32>
    %91 = vector.broadcast %90 : vector<32x1xf32> to vector<32x8xf32>
    %92 = arith.mulf %91, %7 : vector<32x8xf32>
    %93 = arith.addf %89, %92 : vector<32x8xf32>
    %94 = vector.extract_strided_slice %5 {offsets = [0, 5], sizes = [32, 1], strides = [1, 1]} : vector<32x8xf32> to vector<32x1xf32>
    %95 = vector.broadcast %94 : vector<32x1xf32> to vector<32x8xf32>
    %96 = arith.mulf %95, %8 : vector<32x8xf32>
    %97 = arith.addf %93, %96 : vector<32x8xf32>
    %98 = vector.extract_strided_slice %5 {offsets = [0, 6], sizes = [32, 1], strides = [1, 1]} : vector<32x8xf32> to vector<32x1xf32>
    %99 = vector.broadcast %98 : vector<32x1xf32> to vector<32x8xf32>
    %100 = arith.mulf %99, %9 : vector<32x8xf32>
    %101 = arith.addf %97, %100 : vector<32x8xf32>
    %102 = vector.extract_strided_slice %5 {offsets = [0, 7], sizes = [32, 1], strides = [1, 1]} : vector<32x8xf32> to vector<32x1xf32>
    %103 = vector.broadcast %102 : vector<32x1xf32> to vector<32x8xf32>
    %104 = arith.mulf %103, %10 : vector<32x8xf32>
    %105 = arith.addf %101, %104 : vector<32x8xf32>
    %c0_6 = arith.constant 0 : index
    %c16 = arith.constant 16 : index
    %106 = vector.load %arg2[%c0_6, %c16] : memref<32x64xf32, #tpu.memory_space<vmem>>, vector<32x8xf32>
    tpu.vector_store %arg2[%c0_6, %c16], %105 {strides = array<i32>} : memref<32x64xf32, #tpu.memory_space<vmem>>, vector<32x8xf32>,
    %107 = vector.extract_strided_slice %6 {offsets = [0, 0], sizes = [32, 1], strides = [1, 1]} : vector<32x8xf32> to vector<32x1xf32>
    %108 = vector.broadcast %107 : vector<32x1xf32> to vector<32x8xf32>
    %109 = arith.mulf %108, %3 : vector<32x8xf32>
    %110 = vector.extract_strided_slice %6 {offsets = [0, 1], sizes = [32, 1], strides = [1, 1]} : vector<32x8xf32> to vector<32x1xf32>
    %111 = vector.broadcast %110 : vector<32x1xf32> to vector<32x8xf32>
    %112 = arith.mulf %111, %4 : vector<32x8xf32>
    %113 = arith.addf %109, %112 : vector<32x8xf32>
    %114 = vector.extract_strided_slice %6 {offsets = [0, 2], sizes = [32, 1], strides = [1, 1]} : vector<32x8xf32> to vector<32x1xf32>
    %115 = vector.broadcast %114 : vector<32x1xf32> to vector<32x8xf32>
    %116 = arith.mulf %115, %5 : vector<32x8xf32>
    %117 = arith.addf %113, %116 : vector<32x8xf32>
    %118 = vector.extract_strided_slice %6 {offsets = [0, 3], sizes = [32, 1], strides = [1, 1]} : vector<32x8xf32> to vector<32x1xf32>
    %119 = vector.broadcast %118 : vector<32x1xf32> to vector<32x8xf32>
    %120 = arith.mulf %119, %6 : vector<32x8xf32>
    %121 = arith.addf %117, %120 : vector<32x8xf32>
    %122 = vector.extract_strided_slice %6 {offsets = [0, 4], sizes = [32, 1], strides = [1, 1]} : vector<32x8xf32> to vector<32x1xf32>
    %123 = vector.broadcast %122 : vector<32x1xf32> to vector<32x8xf32>
    %124 = arith.mulf %123, %7 : vector<32x8xf32>
    %125 = arith.addf %121, %124 : vector<32x8xf32>
    %126 = vector.extract_strided_slice %6 {offsets = [0, 5], sizes = [32, 1], strides = [1, 1]} : vector<32x8xf32> to vector<32x1xf32>
    %127 = vector.broadcast %126 : vector<32x1xf32> to vector<32x8xf32>
    %128 = arith.mulf %127, %8 : vector<32x8xf32>
    %129 = arith.addf %125, %128 : vector<32x8xf32>
    %130 = vector.extract_strided_slice %6 {offsets = [0, 6], sizes = [32, 1], strides = [1, 1]} : vector<32x8xf32> to vector<32x1xf32>
    %131 = vector.broadcast %130 : vector<32x1xf32> to vector<32x8xf32>
    %132 = arith.mulf %131, %9 : vector<32x8xf32>
    %133 = arith.addf %129, %132 : vector<32x8xf32>
    %134 = vector.extract_strided_slice %6 {offsets = [0, 7], sizes = [32, 1], strides = [1, 1]} : vector<32x8xf32> to vector<32x1xf32>
    %135 = vector.broadcast %134 : vector<32x1xf32> to vector<32x8xf32>
    %136 = arith.mulf %135, %10 : vector<32x8xf32>
    %137 = arith.addf %133, %136 : vector<32x8xf32>
    %c0_7 = arith.constant 0 : index
    %c24 = arith.constant 24 : index
    %138 = vector.load %arg2[%c0_7, %c24] : memref<32x64xf32, #tpu.memory_space<vmem>>, vector<32x8xf32>
    tpu.vector_store %arg2[%c0_7, %c24], %137 {strides = array<i32>} : memref<32x64xf32, #tpu.memory_space<vmem>>, vector<32x8xf32>,
    %139 = vector.extract_strided_slice %7 {offsets = [0, 0], sizes = [32, 1], strides = [1, 1]} : vector<32x8xf32> to vector<32x1xf32>
    %140 = vector.broadcast %139 : vector<32x1xf32> to vector<32x8xf32>
    %141 = arith.mulf %140, %3 : vector<32x8xf32>
    %142 = vector.extract_strided_slice %7 {offsets = [0, 1], sizes = [32, 1], strides = [1, 1]} : vector<32x8xf32> to vector<32x1xf32>
    %143 = vector.broadcast %142 : vector<32x1xf32> to vector<32x8xf32>
    %144 = arith.mulf %143, %4 : vector<32x8xf32>
    %145 = arith.addf %141, %144 : vector<32x8xf32>
    %146 = vector.extract_strided_slice %7 {offsets = [0, 2], sizes = [32, 1], strides = [1, 1]} : vector<32x8xf32> to vector<32x1xf32>
    %147 = vector.broadcast %146 : vector<32x1xf32> to vector<32x8xf32>
    %148 = arith.mulf %147, %5 : vector<32x8xf32>
    %149 = arith.addf %145, %148 : vector<32x8xf32>
    %150 = vector.extract_strided_slice %7 {offsets = [0, 3], sizes = [32, 1], strides = [1, 1]} : vector<32x8xf32> to vector<32x1xf32>
    %151 = vector.broadcast %150 : vector<32x1xf32> to vector<32x8xf32>
    %152 = arith.mulf %151, %6 : vector<32x8xf32>
    %153 = arith.addf %149, %152 : vector<32x8xf32>
    %154 = vector.extract_strided_slice %7 {offsets = [0, 4], sizes = [32, 1], strides = [1, 1]} : vector<32x8xf32> to vector<32x1xf32>
    %155 = vector.broadcast %154 : vector<32x1xf32> to vector<32x8xf32>
    %156 = arith.mulf %155, %7 : vector<32x8xf32>
    %157 = arith.addf %153, %156 : vector<32x8xf32>
    %158 = vector.extract_strided_slice %7 {offsets = [0, 5], sizes = [32, 1], strides = [1, 1]} : vector<32x8xf32> to vector<32x1xf32>
    %159 = vector.broadcast %158 : vector<32x1xf32> to vector<32x8xf32>
    %160 = arith.mulf %159, %8 : vector<32x8xf32>
    %161 = arith.addf %157, %160 : vector<32x8xf32>
    %162 = vector.extract_strided_slice %7 {offsets = [0, 6], sizes = [32, 1], strides = [1, 1]} : vector<32x8xf32> to vector<32x1xf32>
    %163 = vector.broadcast %162 : vector<32x1xf32> to vector<32x8xf32>
    %164 = arith.mulf %163, %9 : vector<32x8xf32>
    %165 = arith.addf %161, %164 : vector<32x8xf32>
    %166 = vector.extract_strided_slice %7 {offsets = [0, 7], sizes = [32, 1], strides = [1, 1]} : vector<32x8xf32> to vector<32x1xf32>
    %167 = vector.broadcast %166 : vector<32x1xf32> to vector<32x8xf32>
    %168 = arith.mulf %167, %10 : vector<32x8xf32>
    %169 = arith.addf %165, %168 : vector<32x8xf32>
    %c0_8 = arith.constant 0 : index
    %c32 = arith.constant 32 : index
    %170 = vector.load %arg2[%c0_8, %c32] : memref<32x64xf32, #tpu.memory_space<vmem>>, vector<32x8xf32>
    tpu.vector_store %arg2[%c0_8, %c32], %169 {strides = array<i32>} : memref<32x64xf32, #tpu.memory_space<vmem>>, vector<32x8xf32>,
    %171 = vector.extract_strided_slice %8 {offsets = [0, 0], sizes = [32, 1], strides = [1, 1]} : vector<32x8xf32> to vector<32x1xf32>
    %172 = vector.broadcast %171 : vector<32x1xf32> to vector<32x8xf32>
    %173 = arith.mulf %172, %3 : vector<32x8xf32>
    %174 = vector.extract_strided_slice %8 {offsets = [0, 1], sizes = [32, 1], strides = [1, 1]} : vector<32x8xf32> to vector<32x1xf32>
    %175 = vector.broadcast %174 : vector<32x1xf32> to vector<32x8xf32>
    %176 = arith.mulf %175, %4 : vector<32x8xf32>
    %177 = arith.addf %173, %176 : vector<32x8xf32>
    %178 = vector.extract_strided_slice %8 {offsets = [0, 2], sizes = [32, 1], strides = [1, 1]} : vector<32x8xf32> to vector<32x1xf32>
    %179 = vector.broadcast %178 : vector<32x1xf32> to vector<32x8xf32>
    %180 = arith.mulf %179, %5 : vector<32x8xf32>
    %181 = arith.addf %177, %180 : vector<32x8xf32>
    %182 = vector.extract_strided_slice %8 {offsets = [0, 3], sizes = [32, 1], strides = [1, 1]} : vector<32x8xf32> to vector<32x1xf32>
    %183 = vector.broadcast %182 : vector<32x1xf32> to vector<32x8xf32>
    %184 = arith.mulf %183, %6 : vector<32x8xf32>
    %185 = arith.addf %181, %184 : vector<32x8xf32>
    %186 = vector.extract_strided_slice %8 {offsets = [0, 4], sizes = [32, 1], strides = [1, 1]} : vector<32x8xf32> to vector<32x1xf32>
    %187 = vector.broadcast %186 : vector<32x1xf32> to vector<32x8xf32>
    %188 = arith.mulf %187, %7 : vector<32x8xf32>
    %189 = arith.addf %185, %188 : vector<32x8xf32>
    %190 = vector.extract_strided_slice %8 {offsets = [0, 5], sizes = [32, 1], strides = [1, 1]} : vector<32x8xf32> to vector<32x1xf32>
    %191 = vector.broadcast %190 : vector<32x1xf32> to vector<32x8xf32>
    %192 = arith.mulf %191, %8 : vector<32x8xf32>
    %193 = arith.addf %189, %192 : vector<32x8xf32>
    %194 = vector.extract_strided_slice %8 {offsets = [0, 6], sizes = [32, 1], strides = [1, 1]} : vector<32x8xf32> to vector<32x1xf32>
    %195 = vector.broadcast %194 : vector<32x1xf32> to vector<32x8xf32>
    %196 = arith.mulf %195, %9 : vector<32x8xf32>
    %197 = arith.addf %193, %196 : vector<32x8xf32>
    %198 = vector.extract_strided_slice %8 {offsets = [0, 7], sizes = [32, 1], strides = [1, 1]} : vector<32x8xf32> to vector<32x1xf32>
    %199 = vector.broadcast %198 : vector<32x1xf32> to vector<32x8xf32>
    %200 = arith.mulf %199, %10 : vector<32x8xf32>
    %201 = arith.addf %197, %200 : vector<32x8xf32>
    %c0_9 = arith.constant 0 : index
    %c40 = arith.constant 40 : index
    %202 = vector.load %arg2[%c0_9, %c40] : memref<32x64xf32, #tpu.memory_space<vmem>>, vector<32x8xf32>
    tpu.vector_store %arg2[%c0_9, %c40], %201 {strides = array<i32>} : memref<32x64xf32, #tpu.memory_space<vmem>>, vector<32x8xf32>,
    %203 = vector.extract_strided_slice %9 {offsets = [0, 0], sizes = [32, 1], strides = [1, 1]} : vector<32x8xf32> to vector<32x1xf32>
    %204 = vector.broadcast %203 : vector<32x1xf32> to vector<32x8xf32>
    %205 = arith.mulf %204, %3 : vector<32x8xf32>
    %206 = vector.extract_strided_slice %9 {offsets = [0, 1], sizes = [32, 1], strides = [1, 1]} : vector<32x8xf32> to vector<32x1xf32>
    %207 = vector.broadcast %206 : vector<32x1xf32> to vector<32x8xf32>
    %208 = arith.mulf %207, %4 : vector<32x8xf32>
    %209 = arith.addf %205, %208 : vector<32x8xf32>
    %210 = vector.extract_strided_slice %9 {offsets = [0, 2], sizes = [32, 1], strides = [1, 1]} : vector<32x8xf32> to vector<32x1xf32>
    %211 = vector.broadcast %210 : vector<32x1xf32> to vector<32x8xf32>
    %212 = arith.mulf %211, %5 : vector<32x8xf32>
    %213 = arith.addf %209, %212 : vector<32x8xf32>
    %214 = vector.extract_strided_slice %9 {offsets = [0, 3], sizes = [32, 1], strides = [1, 1]} : vector<32x8xf32> to vector<32x1xf32>
    %215 = vector.broadcast %214 : vector<32x1xf32> to vector<32x8xf32>
    %216 = arith.mulf %215, %6 : vector<32x8xf32>
    %217 = arith.addf %213, %216 : vector<32x8xf32>
    %218 = vector.extract_strided_slice %9 {offsets = [0, 4], sizes = [32, 1], strides = [1, 1]} : vector<32x8xf32> to vector<32x1xf32>
    %219 = vector.broadcast %218 : vector<32x1xf32> to vector<32x8xf32>
    %220 = arith.mulf %219, %7 : vector<32x8xf32>
    %221 = arith.addf %217, %220 : vector<32x8xf32>
    %222 = vector.extract_strided_slice %9 {offsets = [0, 5], sizes = [32, 1], strides = [1, 1]} : vector<32x8xf32> to vector<32x1xf32>
    %223 = vector.broadcast %222 : vector<32x1xf32> to vector<32x8xf32>
    %224 = arith.mulf %223, %8 : vector<32x8xf32>
    %225 = arith.addf %221, %224 : vector<32x8xf32>
    %226 = vector.extract_strided_slice %9 {offsets = [0, 6], sizes = [32, 1], strides = [1, 1]} : vector<32x8xf32> to vector<32x1xf32>
    %227 = vector.broadcast %226 : vector<32x1xf32> to vector<32x8xf32>
    %228 = arith.mulf %227, %9 : vector<32x8xf32>
    %229 = arith.addf %225, %228 : vector<32x8xf32>
    %230 = vector.extract_strided_slice %9 {offsets = [0, 7], sizes = [32, 1], strides = [1, 1]} : vector<32x8xf32> to vector<32x1xf32>
    %231 = vector.broadcast %230 : vector<32x1xf32> to vector<32x8xf32>
    %232 = arith.mulf %231, %10 : vector<32x8xf32>
    %233 = arith.addf %229, %232 : vector<32x8xf32>
    %c0_10 = arith.constant 0 : index
    %c48 = arith.constant 48 : index
    %234 = vector.load %arg2[%c0_10, %c48] : memref<32x64xf32, #tpu.memory_space<vmem>>, vector<32x8xf32>
    tpu.vector_store %arg2[%c0_10, %c48], %233 {strides = array<i32>} : memref<32x64xf32, #tpu.memory_space<vmem>>, vector<32x8xf32>,
    %235 = vector.extract_strided_slice %10 {offsets = [0, 0], sizes = [32, 1], strides = [1, 1]} : vector<32x8xf32> to vector<32x1xf32>
    %236 = vector.broadcast %235 : vector<32x1xf32> to vector<32x8xf32>
    %237 = arith.mulf %236, %3 : vector<32x8xf32>
    %238 = vector.extract_strided_slice %10 {offsets = [0, 1], sizes = [32, 1], strides = [1, 1]} : vector<32x8xf32> to vector<32x1xf32>
    %239 = vector.broadcast %238 : vector<32x1xf32> to vector<32x8xf32>
    %240 = arith.mulf %239, %4 : vector<32x8xf32>
    %241 = arith.addf %237, %240 : vector<32x8xf32>
    %242 = vector.extract_strided_slice %10 {offsets = [0, 2], sizes = [32, 1], strides = [1, 1]} : vector<32x8xf32> to vector<32x1xf32>
    %243 = vector.broadcast %242 : vector<32x1xf32> to vector<32x8xf32>
    %244 = arith.mulf %243, %5 : vector<32x8xf32>
    %245 = arith.addf %241, %244 : vector<32x8xf32>
    %246 = vector.extract_strided_slice %10 {offsets = [0, 3], sizes = [32, 1], strides = [1, 1]} : vector<32x8xf32> to vector<32x1xf32>
    %247 = vector.broadcast %246 : vector<32x1xf32> to vector<32x8xf32>
    %248 = arith.mulf %247, %6 : vector<32x8xf32>
    %249 = arith.addf %245, %248 : vector<32x8xf32>
    %250 = vector.extract_strided_slice %10 {offsets = [0, 4], sizes = [32, 1], strides = [1, 1]} : vector<32x8xf32> to vector<32x1xf32>
    %251 = vector.broadcast %250 : vector<32x1xf32> to vector<32x8xf32>
    %252 = arith.mulf %251, %7 : vector<32x8xf32>
    %253 = arith.addf %249, %252 : vector<32x8xf32>
    %254 = vector.extract_strided_slice %10 {offsets = [0, 5], sizes = [32, 1], strides = [1, 1]} : vector<32x8xf32> to vector<32x1xf32>
    %255 = vector.broadcast %254 : vector<32x1xf32> to vector<32x8xf32>
    %256 = arith.mulf %255, %8 : vector<32x8xf32>
    %257 = arith.addf %253, %256 : vector<32x8xf32>
    %258 = vector.extract_strided_slice %10 {offsets = [0, 6], sizes = [32, 1], strides = [1, 1]} : vector<32x8xf32> to vector<32x1xf32>
    %259 = vector.broadcast %258 : vector<32x1xf32> to vector<32x8xf32>
    %260 = arith.mulf %259, %9 : vector<32x8xf32>
    %261 = arith.addf %257, %260 : vector<32x8xf32>
    %262 = vector.extract_strided_slice %10 {offsets = [0, 7], sizes = [32, 1], strides = [1, 1]} : vector<32x8xf32> to vector<32x1xf32>
    %263 = vector.broadcast %262 : vector<32x1xf32> to vector<32x8xf32>
    %264 = arith.mulf %263, %10 : vector<32x8xf32>
    %265 = arith.addf %261, %264 : vector<32x8xf32>
    %c0_11 = arith.constant 0 : index
    %c56 = arith.constant 56 : index
    %266 = vector.load %arg2[%c0_11, %c56] : memref<32x64xf32, #tpu.memory_space<vmem>>, vector<32x8xf32>
    tpu.vector_store %arg2[%c0_11, %c56], %265 {strides = array<i32>} : memref<32x64xf32, #tpu.memory_space<vmem>>, vector<32x8xf32>,
    return
  }
}

</mosaic_0001>

<bundles_post_ra>
// kernel: tpu_custom_call.1
= control target key start
LH: loop header
LB: loop body
LE: loop exit
PB: predicated region body
PF: predicated region fallthrough
CT: control target
= control target key end

     0   :  { %7 = vsyncpa [#allocation3], 0  ;;  %s4579_s0 = inlined_call_operand.hbm [shape: f32[32,40], index: 0, kind: input, shape index: {}]   ;;  %s4580_s1 = inlined_call_operand.hbm [shape: f32[40,64], index: 1, kind: input, shape index: {}]   ;;  %s4581_s2 = inlined_call_operand.hbm [shape: f32[32,64], index: 2, kind: output, shape index: {}]  }
   0x1   :  { %8 = vsyncpa [#allocation6], 0 }
   0x2   :  { %9 = vsyncpa [#allocation4], 0  ;;  %s3068_s9 = smov [#allocation2]  }
   0x3   :  { %s15_s10 = sshll.u32 %s3068_s9, 4  ;;  %s16_s10 = int_to_ptr.vmem [resolvable:$true] %s15_s10 }
   0x4   :  { %s3010_s11 = scalar_lea.vmem %s16_s10, 512  ;;  %p3015_p1 = scmp.lt.s32.totalorder %s16_s10, %s16_s10 }
   0x5   :  { %p3011_p0 = scmp.ne.s32.totalorder %s16_s10, %s3010_s11  ;;  %p3016_p2 = scmp.lt.s32.totalorder %s3010_s11, %s3010_s11 }
   0x7   :  { %p3017_p3 = por %p3016_p2, %p3015_p1 }
   0x9   :  { %p3018_p4 = pnand %p3017_p3, %p3011_p0 }
   0xb   :  { %3021 = shalt.err (!%p3018_p4)
}
   0xc   :  { %s3069_s12 = smov 128   ;;  %s3070_s13 = smov 8  }
   0xd   :  { %21 = dma.hbm_to_vmem [thread:$0]  %s4579_s0, 512, %s16_s10, [#allocation3], %s3069_s12, %s3069_s12, %s3070_s13  }
   0xe   :  { %s3071_s16 = smov [#allocation5]  }
   0xf   :  { %s27_s17 = sshll.u32 %s3071_s16, 4  ;;  %s28_s17 = int_to_ptr.vmem [resolvable:$true] %s27_s17 }
  0x10   :  { %s3030_s18 = scalar_lea.vmem %s28_s17, 640  ;;  %p3035_p6 = scmp.lt.s32.totalorder %s28_s17, %s28_s17 }
  0x11   :  { %p3031_p5 = scmp.ne.s32.totalorder %s28_s17, %s3030_s18  ;;  %p3036_p7 = scmp.lt.s32.totalorder %s3030_s18, %s3030_s18 }
  0x13   :  { %p3037_p8 = por %p3036_p7, %p3035_p6 }
  0x15   :  { %p3038_p9 = pnand %p3037_p8, %p3031_p5 }
  0x17   :  { %3041 = shalt.err (!%p3038_p9)
}
  0x18   :  { %33 = dma.hbm_to_vmem [thread:$0]  %s4580_s1, 640, %s28_s17, [#allocation6], %s3069_s12, %s3069_s12, %s3070_s13  }
  0x19   :  { %3062 = dma.done.wait [#allocation3], 512  }
  0x1a   :  { %3063 = vsyncadd [#allocation3], 4294966784 }
  0x1b   :  { %3064 = dma.done.wait [#allocation6], 640  }
  0x1c   :  { %3065 = vsyncadd [#allocation6], 4294966656  ;;  %v3072_v0 = vmov 0   ;;  %v48_v1 = vld [vmem:[#allocation5 + $0x20] sm:$0xff]  ;;  %v47_v2 = vld [vmem:[#allocation5 + $0x18] sm:$0xff]  ;;  %vm49_vm0 = vcmask 326656  }
  0x1d   :  { %2843 = vset.pattern.permute.xlu1 %v3072_v0  ;;  %2842 = vset.pattern.permute.xlu0 %v3072_v0  ;;  %v46_v3 = vld [vmem:[#allocation5 + $0x10] sm:$0xff]  ;;  %v45_v4 = vld [vmem:[#allocation5 + $0x8] sm:$0xff]  ;;  %v44_v5 = vld [vmem:[#allocation5] sm:$0xff]  ;;  %v3073_v12 = vmov 1   ;;  %v3074_v13 = vmov 2   ;;  %v3075_v14 = vmov 3  }
  0x1e   :  { %2734 = vmatprep.subr.mxu0 %v48_v1  ;;  %2750 = vmatprep.subr.mxu1 %v48_v1  ;;  %v40_v6 = vld [vmem:[#allocation2] sm:$0xff]  ;;  %v42_v7 = vld [vmem:[#allocation2 + $0x10] sm:$0xff]  ;;  %v41_v8 = vld [vmem:[#allocation2 + $0x8] sm:$0xff]  ;;  %v3076_v15 = vmov 4   ;;  %v3077_v16 = vmov 5   ;;  %v3078_v17 = vmov 6  }
  0x1f   :  { %2735 = vmatpush3.msra.mxu0 %v48_v1  ;;  %2755 = vmatpush3.msra.mxu1 %v48_v1  ;;  %v43_v9 = vld [vmem:[#allocation2 + $0x18] sm:$0xff]  ;;  %v3079_v18 = vmov 7   ;;  %v3080_v19 = vmov 8   ;;  %v3081_v20 = vmov 9   ;;  %v3082_v21 = vmov 10   ;;  %s3092_s0 = smov 120  }
  0x20   :  { %2736 = vmatprep.subr.mxu0 %v47_v2  ;;  %2751 = vmatprep.subr.mxu1 %v47_v2  ;;  %v3083_v22 = vmov 11   ;;  %v3084_v23 = vmov 12   ;;  %v3085_v24 = vmov 13   ;;  %v3086_v25 = vmov 14   ;;  %s3094_s1 = smov 104   ;;  %s3095_s21 = smov 88  }
  0x21   :  { %2737 = vmatpush3.msra.mxu0 %v47_v2  ;;  %2756 = vmatpush3.msra.mxu1 %v47_v2  ;;  %v3087_v26 = vmov 15   ;;  %v3088_v27 = vmov 16   ;;  %v3089_v28 = vmov 17   ;;  %v3090_v29 = vmov 18   ;;  %s3096_s22 = smov 72   ;;  %s3097_s23 = smov 112  }
  0x22   :  { %2738 = vmatprep.subr.mxu0 %v46_v3  ;;  %2752 = vmatprep.subr.mxu1 %v46_v3  ;;  %v3091_v30 = vmov 19   ;;  %v3093_v48 = vmov 20   ;;  %s3098_s24 = smov 96   ;;  %s3099_s25 = smov 80   ;;  %vm451_vm1 = vcmask 64512   ;;  %vm772_vm2 = vcmask 130112  }
  0x23   :  { %2739 = vmatpush3.msra.mxu0 %v46_v3  ;;  %2757 = vmatpush3.msra.mxu1 %v46_v3  ;;  %s3107_s26 = smov 16   ;;  %vm1093_vm3 = vcmask 195712   ;;  %s3113_s27 = smov 24   ;;  %vm1414_vm4 = vcmask 261312   ;;  %vm1735_vm5 = vcmask 326912   ;;  %vm2056_vm6 = vcmask 392512  }
  0x24   :  { %2740 = vmatprep.subr.mxu0 %v45_v4  ;;  %2753 = vmatprep.subr.mxu1 %v45_v4  ;;  %s3122_s28 = smov 32   ;;  %s3131_s29 = smov 40   ;;  %vm2377_vm7 = vcmask 458112   ;;  %vm2698_vm8 = vcmask 523712  }
  0x25   :  { %2741 = vmatpush3.msra.mxu0 %v45_v4  ;;  %2758 = vmatpush3.msra.mxu1 %v45_v4  ;;  %s3140_s30 = smov 48   ;;  %s3148_s3 = smov 56  }
  0x26   :  { %2742 = vmatprep.subr.mxu0 %v44_v5  ;;  %2754 = vmatprep.subr.mxu1 %v44_v5  ;;  %s3149_s4 = smov [#allocation7]  }
  0x27   :  { %2743 = vmatpush3.msra.mxu0 %v44_v5  ;;  %2759 = vmatpush3.msra.mxu1 %v44_v5  ;;  %s2708_s5 = sshll.u32 %s3149_s4, 4  ;;  %s2709_s5 = int_to_ptr.vmem [resolvable:$true] %s2708_s5 }
  0x28   :  { %2744 = vmatprep.mubr.msk.f32.mxu0 %vm49_vm0, %v40_v6  ;;  %2747 = vmatprep.mubr.msk.f32.mxu1 %vm49_vm0, %v42_v7  ;;  %s3042_s6 = scalar_lea.vmem %s2709_s5, 512  ;;  %p3047_p11 = scmp.lt.s32.totalorder %s2709_s5, %s2709_s5 }
  0x29   :  { %2745 = vmatmul.mubr.msk.f32.vlgmr.msra.gmra.mxu0 %vm49_vm0, %v41_v8  ;;  %2748 = vmatmul.mubr.msk.f32.vlgmr.msra.gmra.mxu1 %vm49_vm0, %v43_v9  ;;  %p3043_p10 = scmp.ne.s32.totalorder %s2709_s5, %s3042_s6  ;;  %p3048_p12 = scmp.lt.s32.totalorder %s3042_s6, %s3042_s6 }
  0x2b   :  { %p3049_p13 = por %p3048_p12, %p3047_p11 }
  0x2d   :  { %p3050_p0 = pnand %p3049_p13, %p3043_p10 }
  0xe9   :  { %v3179_v10 = vpop.f32.mrf.mxu0  ;;  %v3181_v11 = vpop.f32.mrf.mxu1 }
  0xea   :  { %164 = vperm.xlu1 %2843, %v3181_v11   ;;  %154 = vperm.xlu0 %2842, %v3179_v10  }
  0xeb   :  { %v3261_v31 = vpop.f32.mrf.mxu1  ;;  %v3263_v32 = vpop.f32.mrf.mxu0 }
  0xee   :  { %2844 = vset.pattern.permute.xlu1 %v3073_v12  ;;  %2845 = vset.pattern.permute.xlu0 %v3073_v12 }
  0xef   :  { %176 = vperm.xlu1 %2844, %v3179_v10   ;;  %184 = vperm.xlu0 %2845, %v3181_v11  }
  0xf3   :  { %2847 = vset.pattern.permute.xlu1 %v3074_v13  ;;  %2846 = vset.pattern.permute.xlu0 %v3074_v13 }
  0xf4   :  { %224 = vperm.xlu1 %2847, %v3181_v11   ;;  %216 = vperm.xlu0 %2846, %v3179_v10  }
  0xf8   :  { %2848 = vset.pattern.permute.xlu1 %v3075_v14  ;;  %2849 = vset.pattern.permute.xlu0 %v3075_v14 }
  0xf9   :  { %256 = vperm.xlu1 %2848, %v3179_v10   ;;  %264 = vperm.xlu0 %2849, %v3181_v11  }
  0xfd   :  { %2851 = vset.pattern.permute.xlu1 %v3076_v15  ;;  %2850 = vset.pattern.permute.xlu0 %v3076_v15 }
  0xfe   :  { %304 = vperm.xlu1 %2851, %v3181_v11   ;;  %296 = vperm.xlu0 %2850, %v3179_v10  }
 0x102   :  { %2852 = vset.pattern.permute.xlu1 %v3077_v16  ;;  %2853 = vset.pattern.permute.xlu0 %v3077_v16 }
 0x103   :  { %336 = vperm.xlu1 %2852, %v3179_v10   ;;  %344 = vperm.xlu0 %2853, %v3181_v11  }
 0x107   :  { %2855 = vset.pattern.permute.xlu1 %v3078_v17  ;;  %2854 = vset.pattern.permute.xlu0 %v3078_v17 }
 0x108   :  { %384 = vperm.xlu1 %2855, %v3181_v11   ;;  %376 = vperm.xlu0 %2854, %v3179_v10  }
 0x10c   :  { %2856 = vset.pattern.permute.xlu1 %v3079_v18  ;;  %2857 = vset.pattern.permute.xlu0 %v3079_v18 }
 0x10d   :  { %416 = vperm.xlu1 %2856, %v3179_v10   ;;  %424 = vperm.xlu0 %2857, %v3181_v11  }
 0x111   :  { %2859 = vset.pattern.permute.xlu1 %v3080_v19  ;;  %2858 = vset.pattern.permute.xlu0 %v3080_v19 }
 0x112   :  { %469 = vperm.xlu1 %2859, %v3181_v11   ;;  %461 = vperm.xlu0 %2858, %v3179_v10  }
 0x116   :  { %2860 = vset.pattern.permute.xlu1 %v3081_v20  ;;  %2861 = vset.pattern.permute.xlu0 %v3081_v20 }
 0x117   :  { %481 = vperm.xlu1 %2860, %v3179_v10   ;;  %489 = vperm.xlu0 %2861, %v3181_v11  }
 0x11b   :  { %2863 = vset.pattern.permute.xlu1 %v3082_v21  ;;  %2862 = vset.pattern.permute.xlu0 %v3082_v21 }
 0x11c   :  { %529 = vperm.xlu1 %2863, %v3181_v11   ;;  %521 = vperm.xlu0 %2862, %v3179_v10  }
 0x120   :  { %2864 = vset.pattern.permute.xlu1 %v3083_v22  ;;  %2865 = vset.pattern.permute.xlu0 %v3083_v22 }
 0x121   :  { %561 = vperm.xlu1 %2864, %v3179_v10   ;;  %569 = vperm.xlu0 %2865, %v3181_v11  }
 0x125   :  { %2867 = vset.pattern.permute.xlu1 %v3084_v23  ;;  %2866 = vset.pattern.permute.xlu0 %v3084_v23 }
 0x126   :  { %609 = vperm.xlu1 %2867, %v3181_v11   ;;  %601 = vperm.xlu0 %2866, %v3179_v10  }
 0x12a   :  { %2868 = vset.pattern.permute.xlu1 %v3085_v24  ;;  %2869 = vset.pattern.permute.xlu0 %v3085_v24 }
 0x12b   :  { %641 = vperm.xlu1 %2868, %v3179_v10   ;;  %649 = vperm.xlu0 %2869, %v3181_v11  }
 0x12f   :  { %2871 = vset.pattern.permute.xlu1 %v3086_v25  ;;  %2870 = vset.pattern.permute.xlu0 %v3086_v25 }
 0x130   :  { %689 = vperm.xlu1 %2871, %v3181_v11   ;;  %681 = vperm.xlu0 %2870, %v3179_v10  }
 0x134   :  { %2872 = vset.pattern.permute.xlu1 %v3087_v26  ;;  %2873 = vset.pattern.permute.xlu0 %v3087_v26 }
 0x135   :  { %721 = vperm.xlu1 %2872, %v3179_v10   ;;  %729 = vperm.xlu0 %2873, %v3181_v11  }
 0x139   :  { %2875 = vset.pattern.permute.xlu1 %v3088_v27  ;;  %2874 = vset.pattern.permute.xlu0 %v3088_v27 }
 0x13a   :  { %790 = vperm.xlu1 %2875, %v3181_v11   ;;  %782 = vperm.xlu0 %2874, %v3179_v10  }
 0x13e   :  { %2876 = vset.pattern.permute.xlu1 %v3089_v28  ;;  %2877 = vset.pattern.permute.xlu0 %v3089_v28 }
 0x13f   :  { %802 = vperm.xlu1 %2876, %v3179_v10   ;;  %810 = vperm.xlu0 %2877, %v3181_v11  }
 0x143   :  { %2879 = vset.pattern.permute.xlu1 %v3090_v29  ;;  %2878 = vset.pattern.permute.xlu0 %v3090_v29 }
 0x144   :  { %850 = vperm.xlu1 %2879, %v3181_v11   ;;  %842 = vperm.xlu0 %2878, %v3179_v10  }
 0x148   :  { %2880 = vset.pattern.permute.xlu1 %v3091_v30  ;;  %2881 = vset.pattern.permute.xlu0 %v3091_v30 }
 0x149   :  { %882 = vperm.xlu1 %2880, %v3179_v10   ;;  %890 = vperm.xlu0 %2881, %v3181_v11  }
 0x14d   :  { %2883 = vset.pattern.permute.xlu1 %v3072_v0  ;;  %2882 = vset.pattern.permute.xlu0 %v3072_v0 }
 0x14e   :  { %159 = vperm.xlu1 %2883, %v3261_v31   ;;  %149 = vperm.xlu0 %2882, %v3263_v32  }
 0x152   :  { %2885 = vset.pattern.permute.xlu1 %v3073_v12  ;;  %2884 = vset.pattern.permute.xlu0 %v3073_v12 }
 0x153   :  { %180 = vperm.xlu1 %2885, %v3261_v31   ;;  %172 = vperm.xlu0 %2884, %v3263_v32  }
 0x157   :  { %2886 = vset.pattern.permute.xlu1 %v3074_v13  ;;  %2887 = vset.pattern.permute.xlu0 %v3075_v14 }
 0x158   :  { %212 = vperm.xlu1 %2886, %v3263_v32   ;;  %252 = vperm.xlu0 %2887, %v3263_v32  }
 0x15c   :  { %220 = vperm.xlu1 %2886, %v3261_v31   ;;  %2890 = vset.pattern.permute.xlu0 %v3077_v16 }
 0x15d   :  { %332 = vperm.xlu0 %2890, %v3263_v32  }
 0x160   :  { %2888 = vset.pattern.permute.xlu1 %v3075_v14 }
 0x161   :  { %260 = vperm.xlu1 %2888, %v3261_v31   ;;  %2893 = vset.pattern.permute.xlu0 %v3079_v18 }
 0x162   :  { %412 = vperm.xlu0 %2893, %v3263_v32  }
 0x165   :  { %v3284_v33 = vpop.permute.xlu1 %164  ;;  %v3286_v34 = vpop.permute.xlu0 %154  ;;  %2889 = vset.pattern.permute.xlu1 %v3076_v15 }
 0x166   :  { %292 = vperm.xlu1 %2889, %v3263_v32   ;;  %2896 = vset.pattern.permute.xlu0 %v3081_v20 }
 0x167   :  { %477 = vperm.xlu0 %2896, %v3263_v32  }
 0x16a   :  { %v177_v35 = vpop.permute.xlu1 %176  ;;  %v185_v36 = vpop.permute.xlu0 %184  ;;  %300 = vperm.xlu1 %2889, %v3261_v31  }
 0x16b   :  { %2899 = vset.pattern.permute.xlu0 %v3083_v22  ;;  %v188_v45 = vmul.f32 %v3179_v10, %v177_v35  ;;  %v190_v49 = vmul.f32 %v3181_v11, %v185_v36 }
 0x16c   :  { %557 = vperm.xlu0 %2899, %v3263_v32  }
 0x16e   :  { %2891 = vset.pattern.permute.xlu1 %v3077_v16 }
 0x16f   :  { %v3296_v37 = vpop.permute.xlu1 %224  ;;  %v3298_v38 = vpop.permute.xlu0 %216  ;;  %340 = vperm.xlu1 %2891, %v3261_v31  }
 0x170   :  { %2902 = vset.pattern.permute.xlu0 %v3085_v24 }
 0x171   :  { %637 = vperm.xlu0 %2902, %v3263_v32  }
 0x173   :  { %2892 = vset.pattern.permute.xlu1 %v3078_v17 }
 0x174   :  { %v257_v39 = vpop.permute.xlu1 %256  ;;  %v265_v40 = vpop.permute.xlu0 %264  ;;  %372 = vperm.xlu1 %2892, %v3263_v32  }
 0x175   :  { %2905 = vset.pattern.permute.xlu0 %v3087_v26  ;;  %v268_v52 = vmul.f32 %v3179_v10, %v257_v39  ;;  %v270_v55 = vmul.f32 %v3181_v11, %v265_v40 }
 0x176   :  { %717 = vperm.xlu0 %2905, %v3263_v32  }
 0x178   :  { %380 = vperm.xlu1 %2892, %v3261_v31  }
 0x179   :  { %v3308_v41 = vpop.permute.xlu1 %304  ;;  %v3310_v42 = vpop.permute.xlu0 %296 }
 0x17a   :  { %2908 = vset.pattern.permute.xlu0 %v3089_v28 }
 0x17b   :  { %798 = vperm.xlu0 %2908, %v3263_v32  }
 0x17c   :  { %2894 = vset.pattern.permute.xlu1 %v3079_v18 }
 0x17d   :  { %420 = vperm.xlu1 %2894, %v3261_v31  }
 0x17e   :  { %v337_v43 = vpop.permute.xlu1 %336  ;;  %v345_v44 = vpop.permute.xlu0 %344 }
 0x17f   :  { %2911 = vset.pattern.permute.xlu0 %v3091_v30  ;;  %v348_v56 = vmul.f32 %v3179_v10, %v337_v43  ;;  %v350_v59 = vmul.f32 %v3181_v11, %v345_v44 }
 0x180   :  { %878 = vperm.xlu0 %2911, %v3263_v32  }
 0x181   :  { %2895 = vset.pattern.permute.xlu1 %v3080_v19 }
 0x182   :  { %457 = vperm.xlu1 %2895, %v3263_v32  }
 0x183   :  { %v3321_v46 = vpop.permute.xlu1 %384  ;;  %v3323_v47 = vpop.permute.xlu0 %376 }
 0x184   :  { %197 = vrot.lane.b32.xlu0 %v188_v45, %s3092_s0 }
 0x185   :  { %2914 = vset.pattern.permute.xlu0 %v3093_v48 }
 0x186   :  { %465 = vperm.xlu1 %2895, %v3261_v31  }
 0x188   :  { %v417_v50 = vpop.permute.xlu1 %416  ;;  %v425_v51 = vpop.permute.xlu0 %424  ;;  %201 = vrot.lane.b32.xlu0 %v190_v49, %s3092_s0 }
 0x189   :  { %v428_v62 = vmul.f32 %v3179_v10, %v417_v50  ;;  %v430_v1 = vmul.f32 %v3181_v11, %v425_v51 }
 0x18a   :  { %2897 = vset.pattern.permute.xlu1 %v3081_v20 }
 0x18b   :  { %485 = vperm.xlu1 %2897, %v3261_v31  }
 0x18c   :  { %277 = vrot.lane.b32.xlu0 %v268_v52, %s3094_s1 }
 0x18d   :  { %v3334_v53 = vpop.permute.xlu1 %469  ;;  %v3336_v54 = vpop.permute.xlu0 %461 }
 0x18f   :  { %2898 = vset.pattern.permute.xlu1 %v3082_v21 }
 0x190   :  { %517 = vperm.xlu1 %2898, %v3263_v32   ;;  %281 = vrot.lane.b32.xlu0 %v270_v55, %s3094_s1 }
 0x192   :  { %v482_v57 = vpop.permute.xlu1 %481  ;;  %v490_v58 = vpop.permute.xlu0 %489 }
 0x193   :  { %v493_v4 = vmul.f32 %v3179_v10, %v482_v57  ;;  %v495_v5 = vmul.f32 %v3181_v11, %v490_v58 }
 0x194   :  { %525 = vperm.xlu1 %2898, %v3261_v31   ;;  %357 = vrot.lane.b32.xlu0 %v348_v56, %s3095_s21 }
 0x197   :  { %v3346_v60 = vpop.permute.xlu1 %529  ;;  %v3348_v61 = vpop.permute.xlu0 %521 }
 0x198   :  { %2900 = vset.pattern.permute.xlu1 %v3083_v22  ;;  %361 = vrot.lane.b32.xlu0 %v350_v59, %s3095_s21 }
 0x199   :  { %565 = vperm.xlu1 %2900, %v3261_v31  }
 0x19c   :  { %v562_v63 = vpop.permute.xlu1 %561  ;;  %v570_v0 = vpop.permute.xlu0 %569  ;;  %437 = vrot.lane.b32.xlu0 %v428_v62, %s3096_s22  ;;  %v310_v62 = vmul.f32 %v3181_v11, %v3308_v41 }
 0x19d   :  { %2901 = vset.pattern.permute.xlu1 %v3084_v23  ;;  %v573_v8 = vmul.f32 %v3179_v10, %v562_v63  ;;  %v575_v13 = vmul.f32 %v3181_v11, %v570_v0 }
 0x19e   :  { %597 = vperm.xlu1 %2901, %v3263_v32  }
 0x1a0   :  { %441 = vrot.lane.b32.xlu0 %v430_v1, %s3096_s22 }
 0x1a1   :  { %v3359_v2 = vpop.permute.xlu1 %609  ;;  %v3361_v3 = vpop.permute.xlu0 %601 }
 0x1a2   :  { %605 = vperm.xlu1 %2901, %v3261_v31  }
 0x1a4   :  { %502 = vrot.lane.b32.xlu0 %v493_v4, %s3092_s0  ;;  %v390_v4 = vmul.f32 %v3181_v11, %v3321_v46 }
 0x1a6   :  { %v642_v6 = vpop.permute.xlu1 %641  ;;  %v650_v7 = vpop.permute.xlu0 %649  ;;  %2903 = vset.pattern.permute.xlu1 %v3085_v24 }
 0x1a7   :  { %645 = vperm.xlu1 %2903, %v3261_v31   ;;  %v653_v16 = vmul.f32 %v3179_v10, %v642_v6  ;;  %v655_v19 = vmul.f32 %v3181_v11, %v650_v7  ;;  %v533_v6 = vmul.f32 %v3179_v10, %v3348_v61  ;;  %v613_v61 = vmul.f32 %v3179_v10, %v3361_v3 }
 0x1a8   :  { %506 = vrot.lane.b32.xlu0 %v495_v5, %s3092_s0 }
 0x1ab   :  { %v3371_v9 = vpop.permute.xlu1 %689  ;;  %v3373_v12 = vpop.permute.xlu0 %681  ;;  %2904 = vset.pattern.permute.xlu1 %v3086_v25 }
 0x1ac   :  { %677 = vperm.xlu1 %2904, %v3263_v32   ;;  %582 = vrot.lane.b32.xlu0 %v573_v8, %s3094_s1 }
 0x1b0   :  { %v722_v14 = vpop.permute.xlu1 %721  ;;  %v730_v15 = vpop.permute.xlu0 %729  ;;  %685 = vperm.xlu1 %2904, %v3261_v31   ;;  %586 = vrot.lane.b32.xlu0 %v575_v13, %s3094_s1  ;;  %v535_v13 = vmul.f32 %v3181_v11, %v3346_v60 }
 0x1b1   :  { %v733_v20 = vmul.f32 %v3179_v10, %v722_v14  ;;  %v735_v23 = vmul.f32 %v3181_v11, %v730_v15 }
 0x1b4   :  { %2906 = vset.pattern.permute.xlu1 %v3087_v26  ;;  %662 = vrot.lane.b32.xlu0 %v653_v16, %s3095_s21  ;;  %v615_v16 = vmul.f32 %v3181_v11, %v3359_v2 }
 0x1b5   :  { %v3384_v17 = vpop.permute.xlu1 %790  ;;  %v3386_v18 = vpop.permute.xlu0 %782  ;;  %725 = vperm.xlu1 %2906, %v3261_v31  }
 0x1b8   :  { %666 = vrot.lane.b32.xlu0 %v655_v19, %s3095_s21 }
 0x1b9   :  { %2907 = vset.pattern.permute.xlu1 %v3088_v27 }
 0x1ba   :  { %v803_v21 = vpop.permute.xlu1 %802  ;;  %v811_v22 = vpop.permute.xlu0 %810  ;;  %778 = vperm.xlu1 %2907, %v3263_v32  }
 0x1bb   :  { %v814_v26 = vmul.f32 %v3179_v10, %v803_v21  ;;  %v816_v36 = vmul.f32 %v3181_v11, %v811_v22  ;;  %v695_v22 = vmul.f32 %v3181_v11, %v3371_v9 }
 0x1bc   :  { %742 = vrot.lane.b32.xlu0 %v733_v20, %s3096_s22  ;;  %v693_v20 = vmul.f32 %v3179_v10, %v3373_v12 }
 0x1be   :  { %786 = vperm.xlu1 %2907, %v3261_v31  }
 0x1bf   :  { %v3397_v24 = vpop.permute.xlu1 %850  ;;  %v3399_v25 = vpop.permute.xlu0 %842 }
 0x1c0   :  { %746 = vrot.lane.b32.xlu0 %v735_v23, %s3096_s22  ;;  %v854_v23 = vmul.f32 %v3179_v10, %v3399_v25 }
 0x1c2   :  { %2909 = vset.pattern.permute.xlu1 %v3089_v28 }
 0x1c3   :  { %806 = vperm.xlu1 %2909, %v3261_v31  }
 0x1c4   :  { %v883_v27 = vpop.permute.xlu1 %882  ;;  %v891_v35 = vpop.permute.xlu0 %890  ;;  %823 = vrot.lane.b32.xlu0 %v814_v26, %s3092_s0 }
 0x1c5   :  { %v894_v28 = vmul.f32 %v3179_v10, %v883_v27  ;;  %v896_v43 = vmul.f32 %v3181_v11, %v891_v35  ;;  %v856_v27 = vmul.f32 %v3181_v11, %v3397_v24 }
 0x1c7   :  { %2910 = vset.pattern.permute.xlu1 %v3090_v29 }
 0x1c8   :  { %838 = vperm.xlu1 %2910, %v3263_v32   ;;  %827 = vrot.lane.b32.xlu0 %v816_v36, %s3092_s0 }
 0x1c9   :  { %v3410_v39 = vpop.permute.xlu1 %159  ;;  %v3412_v40 = vpop.permute.xlu0 %149 }
 0x1cc   :  { %846 = vperm.xlu1 %2910, %v3261_v31   ;;  %903 = vrot.lane.b32.xlu0 %v894_v28, %s3094_s1 }
 0x1ce   :  { %v3418_v44 = vpop.permute.xlu1 %180  ;;  %v3420_v45 = vpop.permute.xlu0 %172 }
 0x1cf   :  { %v187_v25 = vmul.f32 %v3420_v45, %v3263_v32  ;;  %v189_v24 = vmul.f32 %v3418_v44, %v3261_v31 }
 0x1d0   :  { %2912 = vset.pattern.permute.xlu1 %v3091_v30  ;;  %907 = vrot.lane.b32.xlu0 %v896_v43, %s3094_s1  ;;  %v228_v30 = vmul.f32 %v3179_v10, %v3298_v38  ;;  %v308_v38 = vmul.f32 %v3179_v10, %v3310_v42  ;;  %v388_v42 = vmul.f32 %v3179_v10, %v3323_v47 }
 0x1d1   :  { %886 = vperm.xlu1 %2912, %v3261_v31  }
 0x1d3   :  { %v213_v29 = vpop.permute.xlu1 %212  ;;  %v3425_v49 = vpop.permute.xlu0 %252 }
 0x1d4   :  { %v227_v50 = vmul.f32 %v213_v29, %v3263_v32 }
 0x1d5   :  { %2913 = vset.pattern.permute.xlu1 %v3093_v48  ;;  %v230_v48 = vmul.f32 %v3181_v11, %v3296_v37 }
 0x1d6   :  { %918 = vperm.xlu1 %2913, %v3263_v32   ;;  %235 = vrot.lane.b32.xlu0 %v227_v50, %s3097_s23  ;;  %v267_v50 = vmul.f32 %v3425_v49, %v3263_v32 }
 0x1d7   :  { %v221_v51 = vpop.permute.xlu1 %220 }
 0x1d8   :  { %v229_v52 = vmul.f32 %v221_v51, %v3261_v31  ;;  %v3434_v55 = vpop.permute.xlu0 %332 }
 0x1d9   :  { %v347_v49 = vmul.f32 %v3434_v55, %v3263_v32 }
 0x1da   :  { %237 = vrot.lane.b32.xlu1 %v228_v30, %s3097_s23  ;;  %239 = vrot.lane.b32.xlu0 %v229_v52, %s3097_s23 }
 0x1dc   :  { %v3440_v56 = vpop.permute.xlu1 %260 }
 0x1dd   :  { %v3443_v57 = vpop.permute.xlu0 %412  ;;  %v269_v52 = vmul.f32 %v3440_v56, %v3261_v31 }
 0x1de   :  { %241 = vrot.lane.b32.xlu1 %v230_v48, %s3097_s23 }
 0x1e1   :  { %v293_v58 = vpop.permute.xlu1 %292 }
 0x1e2   :  { %v307_v59 = vmul.f32 %v293_v58, %v3263_v32  ;;  %317 = vrot.lane.b32.xlu1 %v308_v38, %s3098_s24  ;;  %v3452_v37 = vpop.permute.xlu0 %477 }
 0x1e4   :  { %315 = vrot.lane.b32.xlu0 %v307_v59, %s3098_s24 }
 0x1e5   :  { %v301_v63 = vpop.permute.xlu1 %300 }
 0x1e6   :  { %v309_v0 = vmul.f32 %v301_v63, %v3261_v31  ;;  %321 = vrot.lane.b32.xlu1 %v310_v62, %s3098_s24  ;;  %v427_v63 = vmul.f32 %v3443_v57, %v3263_v32  ;;  %v492_v57 = vmul.f32 %v3452_v37, %v3263_v32 }
 0x1e7   :  { %v3462_v41 = vpop.permute.xlu0 %557 }
 0x1e8   :  { %319 = vrot.lane.b32.xlu0 %v309_v0, %s3098_s24 }
 0x1ea   :  { %397 = vrot.lane.b32.xlu1 %v388_v42, %s3099_s25  ;;  %v3460_v1 = vpop.permute.xlu1 %340 }
 0x1eb   :  { %v349_v56 = vmul.f32 %v3460_v1, %v3261_v31 }
 0x1ec   :  { %v3470_v7 = vpop.permute.xlu0 %637 }
 0x1ee   :  { %401 = vrot.lane.b32.xlu1 %v390_v4, %s3099_s25 }
 0x1ef   :  { %v373_v5 = vpop.permute.xlu1 %372 }
 0x1f0   :  { %v387_v47 = vmul.f32 %v373_v5, %v3263_v32 }
 0x1f1   :  { %v3479_v14 = vpop.permute.xlu0 %717 }
 0x1f2   :  { %542 = vrot.lane.b32.xlu1 %v533_v6, %s3097_s23  ;;  %395 = vrot.lane.b32.xlu0 %v387_v47, %s3099_s25 }
 0x1f3   :  { %v381_v8 = vpop.permute.xlu1 %380 }
 0x1f4   :  { %v389_v46 = vmul.f32 %v381_v8, %v3261_v31 }
 0x1f6   :  { %546 = vrot.lane.b32.xlu1 %v535_v13, %s3097_s23  ;;  %399 = vrot.lane.b32.xlu0 %v389_v46, %s3099_s25  ;;  %v3486_v19 = vpop.permute.xlu0 %798  ;;  %v572_v13 = vmul.f32 %v3462_v41, %v3263_v32 }
 0x1f8   :  { %v421_v15 = vpop.permute.xlu1 %420 }
 0x1f9   :  { %v429_v42 = vmul.f32 %v421_v15, %v3261_v31 }
 0x1fa   :  { %622 = vrot.lane.b32.xlu1 %v613_v61, %s3098_s24 }
 0x1fb   :  { %v3496_v3 = vpop.permute.xlu0 %878 }
 0x1fd   :  { %v3488_v60 = vpop.permute.xlu1 %457 }
 0x1fe   :  { %626 = vrot.lane.b32.xlu1 %v615_v16, %s3098_s24 }
 0x1ff   :  { %v3503_v26 = vpop.permute.xlu0 %197 }
 0x201   :  { %v3493_v21 = vpop.permute.xlu1 %465 }
 0x202   :  { %702 = vrot.lane.b32.xlu1 %v693_v20, %s3099_s25  ;;  %v652_v20 = vmul.f32 %v3470_v7, %v3263_v32 }
 0x203   :  { %v3511_v9 = vpop.permute.xlu0 %201 }
 0x206   :  { %706 = vrot.lane.b32.xlu1 %v695_v22, %s3099_s25  ;;  %v486_v2 = vpop.permute.xlu1 %485 }
 0x207   :  { %v3520_v29 = vpop.permute.xlu0 %277  ;;  %v494_v47 = vmul.f32 %v486_v2, %v3261_v31 }
 0x20a   :  { %863 = vrot.lane.b32.xlu1 %v854_v23, %s3097_s23 }
 0x20b   :  { %v518_v12 = vpop.permute.xlu1 %517  ;;  %v3527_v30 = vpop.permute.xlu0 %281 }
 0x20c   :  { %v532_v35 = vmul.f32 %v518_v12, %v3263_v32 }
 0x20e   :  { %867 = vrot.lane.b32.xlu1 %v856_v27, %s3097_s23  ;;  %540 = vrot.lane.b32.xlu0 %v532_v35, %s3097_s23  ;;  %v732_v27 = vmul.f32 %v3479_v14, %v3263_v32 }
 0x20f   :  { %v526_v36 = vpop.permute.xlu1 %525  ;;  %v3537_v38 = vpop.permute.xlu0 %357 }
 0x210   :  { %v534_v28 = vmul.f32 %v526_v36, %v3261_v31 }
 0x212   :  { %544 = vrot.lane.b32.xlu0 %v534_v28, %s3097_s23  ;;  %195 = vrot.lane.b32.xlu1 %v187_v25, %s3092_s0  ;;  %v813_v28 = vmul.f32 %v3486_v19, %v3263_v32 }
 0x213   :  { %v3543_v59 = vpop.permute.xlu0 %361 }
 0x214   :  { %v566_v43 = vpop.permute.xlu1 %565 }
 0x215   :  { %v574_v37 = vmul.f32 %v566_v43, %v3261_v31 }
 0x216   :  { %199 = vrot.lane.b32.xlu1 %v189_v24, %s3092_s0 }
 0x217   :  { %v3552_v1 = vpop.permute.xlu0 %437 }
 0x219   :  { %v598_v51 = vpop.permute.xlu1 %597 }
 0x21a   :  { %v612_v45 = vmul.f32 %v598_v51, %v3263_v32  ;;  %275 = vrot.lane.b32.xlu1 %v267_v50, %s3094_s1 }
 0x21b   :  { %v3559_v6 = vpop.permute.xlu0 %441 }
 0x21c   :  { %620 = vrot.lane.b32.xlu0 %v612_v45, %s3098_s24  ;;  %v168_v45 = vmul.f32 %v3179_v10, %v3286_v34 }
 0x21d   :  { %v606_v44 = vpop.permute.xlu1 %605 }
 0x21e   :  { %v614_v48 = vmul.f32 %v606_v44, %v3261_v31  ;;  %279 = vrot.lane.b32.xlu1 %v269_v52, %s3094_s1  ;;  %v208_v19 = vadd.f32 %v3503_v26, %v168_v45 }
 0x21f   :  { %v3567_v46 = vpop.permute.xlu0 %502 }
 0x220   :  { %624 = vrot.lane.b32.xlu0 %v614_v48, %s3098_s24  ;;  %v170_v48 = vmul.f32 %v3181_v11, %v3284_v33 }
 0x222   :  { %v646_v58 = vpop.permute.xlu1 %645  ;;  %355 = vrot.lane.b32.xlu1 %v347_v49, %s3095_s21  ;;  %v210_v34 = vadd.f32 %v3511_v9, %v170_v48  ;;  %v169_v48 = vmul.f32 %v3410_v39, %v3261_v31 }
 0x223   :  { %v3574_v16 = vpop.permute.xlu0 %506  ;;  %v654_v41 = vmul.f32 %v646_v58, %v3261_v31  ;;  %v3100_v58 = vmov 21  }
 0x226   :  { %359 = vrot.lane.b32.xlu1 %v349_v56, %s3095_s21  ;;  %v893_v56 = vmul.f32 %v3496_v3, %v3263_v32 }
 0x227   :  { %v678_v62 = vpop.permute.xlu1 %677  ;;  %v3581_v23 = vpop.permute.xlu0 %582 }
 0x228   :  { %v692_v55 = vmul.f32 %v678_v62, %v3263_v32 }
 0x22a   :  { %700 = vrot.lane.b32.xlu0 %v692_v55, %s3099_s25  ;;  %435 = vrot.lane.b32.xlu1 %v427_v63, %s3096_s22 }
 0x22b   :  { %v686_v0 = vpop.permute.xlu1 %685  ;;  %v3590_v7 = vpop.permute.xlu0 %586 }
 0x22c   :  { %v694_v4 = vmul.f32 %v686_v0, %v3261_v31 }
 0x22e   :  { %704 = vrot.lane.b32.xlu0 %v694_v4, %s3099_s25  ;;  %439 = vrot.lane.b32.xlu1 %v429_v42, %s3096_s22 }
 0x22f   :  { %v3597_v24 = vpop.permute.xlu0 %662 }
 0x230   :  { %v726_v5 = vpop.permute.xlu1 %725 }
 0x231   :  { %v734_v36 = vmul.f32 %v726_v5, %v3261_v31 }
 0x232   :  { %500 = vrot.lane.b32.xlu1 %v492_v57, %s3092_s0 }
 0x233   :  { %v3606_v52 = vpop.permute.xlu0 %666 }
 0x235   :  { %v3562_v8 = vpop.permute.xlu1 %778 }
 0x236   :  { %504 = vrot.lane.b32.xlu1 %v494_v47, %s3092_s0 }
 0x237   :  { %v3615_v62 = vpop.permute.xlu0 %742 }
 0x239   :  { %v3569_v61 = vpop.permute.xlu1 %786 }
 0x23a   :  { %580 = vrot.lane.b32.xlu1 %v572_v13, %s3094_s1 }
 0x23b   :  { %v3622_v57 = vpop.permute.xlu0 %746 }
 0x23e   :  { %v807_v15 = vpop.permute.xlu1 %806  ;;  %584 = vrot.lane.b32.xlu1 %v574_v37, %s3094_s1 }
 0x23f   :  { %v815_v50 = vmul.f32 %v807_v15, %v3261_v31  ;;  %v3628_v37 = vpop.permute.xlu0 %823 }
 0x242   :  { %660 = vrot.lane.b32.xlu1 %v652_v20, %s3095_s21 }
 0x243   :  { %v839_v22 = vpop.permute.xlu1 %838 }
 0x244   :  { %v853_v2 = vmul.f32 %v839_v22, %v3263_v32 }
 0x246   :  { %861 = vrot.lane.b32.xlu0 %v853_v2, %s3097_s23  ;;  %664 = vrot.lane.b32.xlu1 %v654_v41, %s3095_s21 }
 0x247   :  { %v847_v12 = vpop.permute.xlu1 %846 }
 0x248   :  { %v855_v35 = vmul.f32 %v847_v12, %v3261_v31 }
 0x24a   :  { %865 = vrot.lane.b32.xlu0 %v855_v35, %s3097_s23  ;;  %740 = vrot.lane.b32.xlu1 %v732_v27, %s3096_s22 }
 0x24c   :  { %v887_v25 = vpop.permute.xlu1 %886 }
 0x24d   :  { %v895_v33 = vmul.f32 %v887_v25, %v3261_v31 }
 0x24e   :  { %922 = vperm.xlu0 %2914, %v3179_v10   ;;  %744 = vrot.lane.b32.xlu1 %v734_v36, %s3096_s22 }
 0x251   :  { %v919_v14 = vpop.permute.xlu1 %918 }
 0x252   :  { %v933_v43 = vmul.f32 %v919_v14, %v3263_v32  ;;  %821 = vrot.lane.b32.xlu1 %v813_v28, %s3092_s0  ;;  %2915 = vset.pattern.permute.xlu0 %v3100_v58 }
 0x254   :  { %941 = vrot.lane.b32.xlu0 %v933_v43, %s3098_s24 }
 0x255   :  { %v238_v51 = vpop.permute.xlu1 %237 }
 0x256   :  { %825 = vrot.lane.b32.xlu1 %v815_v50, %s3092_s0  ;;  %v248_v49 = vadd.f32 %v238_v51, %v208_v19  ;;  %v167_v51 = vmul.f32 %v3412_v40, %v3263_v32 }
 0x258   :  { %v288_v26 = vadd.f32 %v3520_v29, %v248_v49 }
 0x259   :  { %v242_v44 = vpop.permute.xlu1 %241 }
 0x25a   :  { %926 = vperm.xlu1 %2913, %v3261_v31   ;;  %v250_v55 = vadd.f32 %v242_v44, %v210_v34 }
 0x25c   :  { %v290_v4 = vadd.f32 %v3527_v30, %v250_v55 }
 0x25d   :  { %v318_v63 = vpop.permute.xlu1 %317 }
 0x25e   :  { %901 = vrot.lane.b32.xlu1 %v893_v56, %s3094_s1  ;;  %v328_v0 = vadd.f32 %v318_v63, %v288_v26 }
 0x260   :  { %v368_v9 = vadd.f32 %v3537_v38, %v328_v0  ;;  %v3635_v38 = vpop.permute.xlu0 %827 }
 0x261   :  { %v322_v42 = vpop.permute.xlu1 %321 }
 0x262   :  { %905 = vrot.lane.b32.xlu1 %v895_v33, %s3094_s1  ;;  %v330_v3 = vadd.f32 %v322_v42, %v290_v4 }
 0x264   :  { %v370_v13 = vadd.f32 %v3543_v59, %v330_v3 }
 0x265   :  { %v398_v5 = vpop.permute.xlu1 %397 }
 0x266   :  { %v408_v47 = vadd.f32 %v398_v5, %v368_v9  ;;  %930 = vperm.xlu1 %2913, %v3181_v11  }
 0x268   :  { %v448_v29 = vadd.f32 %v3552_v1, %v408_v47  ;;  %v3639_v1 = vpop.permute.xlu0 %903 }
 0x269   :  { %v402_v15 = vpop.permute.xlu1 %401 }
 0x26a   :  { %v410_v30 = vadd.f32 %v402_v15, %v370_v13  ;;  %453 = vst.msk [vmem:[#allocation7 + $0x8] sm:$0xff] %vm451_vm1, %v448_v29  ;;  %2916 = vset.pattern.permute.xlu1 %v3100_v58 }
 0x26c   :  { %v450_v20 = vadd.f32 %v3559_v6, %v410_v30  ;;  %v3645_v12 = vpop.permute.xlu0 %907 }
 0x26d   :  { %v3632_v22 = vpop.permute.xlu1 %542 }
 0x26e   :  { %455 = vst.msk [vmem:[#allocation7 + $0x18] sm:$0xff] %vm451_vm1, %v450_v20 }
 0x270   :  { %v236_v35 = vpop.permute.xlu0 %235 }
 0x271   :  { %v3637_v41 = vpop.permute.xlu1 %546 }
 0x274   :  { %v240_v25 = vpop.permute.xlu0 %239 }
 0x275   :  { %v3641_v59 = vpop.permute.xlu1 %622 }
 0x278   :  { %v316_v14 = vpop.permute.xlu0 %315 }
 0x279   :  { %v3643_v2 = vpop.permute.xlu1 %626 }
 0x27c   :  { %v320_v45 = vpop.permute.xlu0 %319 }
 0x27d   :  { %v3647_v27 = vpop.permute.xlu1 %702 }
 0x280   :  { %v396_v49 = vpop.permute.xlu0 %395 }
 0x281   :  { %v3649_v6 = vpop.permute.xlu1 %706 }
 0x284   :  { %v400_v26 = vpop.permute.xlu0 %399 }
 0x285   :  { %v3651_v36 = vpop.permute.xlu1 %863 }
 0x288   :  { %v3659_v3 = vpop.permute.xlu0 %540 }
 0x289   :  { %v3653_v28 = vpop.permute.xlu1 %867 }
 0x28c   :  { %v3661_v39 = vpop.permute.xlu0 %544 }
 0x28d   :  { %v196_v43 = vpop.permute.xlu1 %195 }
 0x28e   :  { %v207_v19 = vadd.f32 %v196_v43, %v167_v51 }
 0x290   :  { %v247_v56 = vadd.f32 %v236_v35, %v207_v19  ;;  %v3664_v35 = vpop.permute.xlu0 %620 }
 0x291   :  { %v200_v50 = vpop.permute.xlu1 %199 }
 0x292   :  { %v209_v58 = vadd.f32 %v200_v50, %v169_v48 }
 0x294   :  { %v249_v55 = vadd.f32 %v240_v25, %v209_v58 }
 0x295   :  { %v276_v44 = vpop.permute.xlu1 %275 }
 0x296   :  { %v287_v63 = vadd.f32 %v276_v44, %v247_v56 }
 0x298   :  { %v327_v42 = vadd.f32 %v316_v14, %v287_v63  ;;  %v3669_v14 = vpop.permute.xlu0 %624 }
 0x299   :  { %v280_v34 = vpop.permute.xlu1 %279 }
 0x29a   :  { %v289_v0 = vadd.f32 %v280_v34, %v249_v55 }
 0x29c   :  { %v329_v9 = vadd.f32 %v320_v45, %v289_v0  ;;  %v3673_v50 = vpop.permute.xlu0 %700 }
 0x29d   :  { %v356_v33 = vpop.permute.xlu1 %355 }
 0x29e   :  { %v367_v4 = vadd.f32 %v356_v33, %v327_v42 }
 0x2a0   :  { %v407_v47 = vadd.f32 %v396_v49, %v367_v4  ;;  %v3679_v19 = vpop.permute.xlu0 %704 }
 0x2a1   :  { %v360_v40 = vpop.permute.xlu1 %359  ;;  %4582 = vst [vmem:[#allocation11_spill] sm:$0xff] %v3679_v19 }
 0x2a2   :  { %v369_v5 = vadd.f32 %v360_v40, %v329_v9 }
 0x2a4   :  { %v409_v15 = vadd.f32 %v400_v26, %v369_v5 }
 0x2a5   :  { %v436_v29 = vpop.permute.xlu1 %435 }
 0x2a6   :  { %v447_v13 = vadd.f32 %v436_v29, %v407_v47  ;;  %v3101_v47 = vmov 22  }
 0x2a8   :  { %452 = vst.msk [vmem:[#allocation7] sm:$0xff] %vm451_vm1, %v447_v13 }
 0x2a9   :  { %v440_v30 = vpop.permute.xlu1 %439 }
 0x2aa   :  { %v449_v20 = vadd.f32 %v440_v30, %v409_v15 }
 0x2ac   :  { %454 = vst.msk [vmem:[#allocation7 + $0x10] sm:$0xff] %vm451_vm1, %v449_v20 }
 0x2ad   :  { %v3667_v25 = vpop.permute.xlu1 %500 }
 0x2b1   :  { %v3671_v43 = vpop.permute.xlu1 %504 }
 0x2b5   :  { %v3675_v51 = vpop.permute.xlu1 %580 }
 0x2b8   :  { %v3683_v48 = vpop.permute.xlu0 %861 }
 0x2b9   :  { %v3677_v45 = vpop.permute.xlu1 %584 }
 0x2bc   :  { %v3687_v58 = vpop.permute.xlu0 %865 }
 0x2bd   :  { %v3681_v44 = vpop.permute.xlu1 %660  ;;  %4583 = vst [vmem:[#allocation12_spill] sm:$0xff] %v3687_v58 }
 0x2c1   :  { %v3685_v49 = vpop.permute.xlu1 %664 }
 0x2c5   :  { %v3689_v56 = vpop.permute.xlu1 %740 }
 0x2c9   :  { %v3691_v34 = vpop.permute.xlu1 %744  ;;  %v923_v63 = vpop.permute.xlu0 %922 }
 0x2ca   :  { %4584 = vst [vmem:[#allocation13_spill] sm:$0xff] %v3691_v34  ;;  %v934_v55 = vmul.f32 %v3179_v10, %v923_v63 }
 0x2cc   :  { %943 = vrot.lane.b32.xlu1 %v934_v55, %s3098_s24 }
 0x2cd   :  { %v3695_v26 = vpop.permute.xlu1 %821  ;;  %v3711_v29 = vpop.permute.xlu0 %941 }
 0x2ce   :  { %4586 = vst [vmem:[#allocation15_spill] sm:$0xff] %v3711_v29 }
 0x2d1   :  { %v3697_v33 = vpop.permute.xlu1 %825 }
 0x2d5   :  { %v927_v0 = vpop.permute.xlu1 %926 }
 0x2d6   :  { %v935_v42 = vmul.f32 %v927_v0, %v3261_v31 }
 0x2d8   :  { %945 = vrot.lane.b32.xlu0 %v935_v42, %s3098_s24 }
 0x2d9   :  { %v3701_v4 = vpop.permute.xlu1 %901 }
 0x2dc   :  { %958 = vperm.xlu0 %2915, %v3263_v32  }
 0x2dd   :  { %v3704_v40 = vpop.permute.xlu1 %905 }
 0x2de   :  { %4585 = vst [vmem:[#allocation14_spill] sm:$0xff] %v3704_v40 }
 0x2e0   :  { %970 = vperm.xlu0 %2915, %v3181_v11  }
 0x2e1   :  { %v931_v9 = vpop.permute.xlu1 %930 }
 0x2e2   :  { %v936_v5 = vmul.f32 %v3181_v11, %v931_v9 }
 0x2e4   :  { %947 = vrot.lane.b32.xlu1 %v936_v5, %s3098_s24  ;;  %2918 = vset.pattern.permute.xlu0 %v3101_v47 }
 0x2e8   :  { %962 = vperm.xlu1 %2916, %v3179_v10  }
 0x2ec   :  { %966 = vperm.xlu1 %2916, %v3261_v31  }
 0x2f0   :  { %2917 = vset.pattern.permute.xlu1 %v3101_v47 }
 0x33e   :  { %v3717_v20 = vpop.permute.xlu1 %943 }
 0x34a   :  { %v3713_v13 = vpop.permute.xlu0 %945 }
 0x34b   :  { %4587 = vst [vmem:[#allocation16_spill] sm:$0xff] %v3713_v13 }
 0x356   :  { %v3719_v63 = vpop.permute.xlu1 %947 }
 0x357   :  { %v959_v15 = vpop.permute.xlu0 %958 }
 0x358   :  { %v973_v30 = vmul.f32 %v959_v15, %v3263_v32  ;;  %v3102_v15 = vmov 23  }
 0x35a   :  { %981 = vrot.lane.b32.xlu1 %v973_v30, %s3095_s21 }
 0x35b   :  { %v971_v42 = vpop.permute.xlu0 %970 }
 0x35c   :  { %v976_v5 = vmul.f32 %v3181_v11, %v971_v42 }
 0x363   :  { %v963_v55 = vpop.permute.xlu1 %962 }
 0x364   :  { %v974_v0 = vmul.f32 %v3179_v10, %v963_v55 }
 0x366   :  { %983 = vrot.lane.b32.xlu0 %v974_v0, %s3095_s21 }
 0x367   :  { %v967_v9 = vpop.permute.xlu1 %966 }
 0x368   :  { %v975_v47 = vmul.f32 %v967_v9, %v3261_v31 }
 0x36a   :  { %985 = vrot.lane.b32.xlu1 %v975_v47, %s3095_s21  ;;  %987 = vrot.lane.b32.xlu0 %v976_v5, %s3095_s21 }
 0x36e   :  { %998 = vperm.xlu1 %2917, %v3263_v32   ;;  %1002 = vperm.xlu0 %2918, %v3179_v10  }
 0x372   :  { %1006 = vperm.xlu1 %2917, %v3261_v31   ;;  %2919 = vset.pattern.permute.xlu0 %v3102_v15 }
 0x376   :  { %1010 = vperm.xlu1 %2917, %v3181_v11  }
 0x37a   :  { %2920 = vset.pattern.permute.xlu1 %v3102_v15 }
 0x3cc   :  { %v3733_v55 = vpop.permute.xlu1 %981 }
 0x3cd   :  { %4588 = vst [vmem:[#allocation17_spill] sm:$0xff] %v3733_v55 }
 0x3d8   :  { %v3731_v30 = vpop.permute.xlu0 %983 }
 0x3dc   :  { %v3735_v0 = vpop.permute.xlu1 %985  ;;  %v3737_v42 = vpop.permute.xlu0 %987 }
 0x3dd   :  { %4589 = vst [vmem:[#allocation18_spill] sm:$0xff] %v3735_v0 }
 0x3e9   :  { %v999_v9 = vpop.permute.xlu1 %998  ;;  %v1003_v5 = vpop.permute.xlu0 %1002 }
 0x3ea   :  { %v1013_v47 = vmul.f32 %v999_v9, %v3263_v32  ;;  %v1014_v13 = vmul.f32 %v3179_v10, %v1003_v5  ;;  %v3103_v9 = vmov 24  }
 0x3ec   :  { %1021 = vrot.lane.b32.xlu0 %v1013_v47, %s3099_s25  ;;  %1023 = vrot.lane.b32.xlu1 %v1014_v13, %s3099_s25 }
 0x3ed   :  { %v1007_v40 = vpop.permute.xlu1 %1006 }
 0x3ee   :  { %v1015_v15 = vmul.f32 %v1007_v40, %v3261_v31 }
 0x3f0   :  { %1025 = vrot.lane.b32.xlu0 %v1015_v15, %s3099_s25 }
 0x3f1   :  { %v1011_v55 = vpop.permute.xlu1 %1010 }
 0x3f2   :  { %v1016_v0 = vmul.f32 %v3181_v11, %v1011_v55 }
 0x3f4   :  { %1038 = vperm.xlu0 %2919, %v3263_v32   ;;  %1027 = vrot.lane.b32.xlu1 %v1016_v0, %s3099_s25 }
 0x3f8   :  { %1050 = vperm.xlu0 %2919, %v3181_v11   ;;  %1042 = vperm.xlu1 %2920, %v3179_v10  }
 0x3fc   :  { %1046 = vperm.xlu1 %2920, %v3261_v31   ;;  %2922 = vset.pattern.permute.xlu0 %v3103_v9 }
 0x400   :  { %2921 = vset.pattern.permute.xlu1 %v3103_v9 }
 0x45e   :  { %v3751_v13 = vpop.permute.xlu0 %1021  ;;  %v3753_v40 = vpop.permute.xlu1 %1023 }
 0x45f   :  { %4590 = vst [vmem:[#allocation19_spill] sm:$0xff] %v3751_v13 }
 0x462   :  { %v3755_v5 = vpop.permute.xlu0 %1025 }
 0x463   :  { %4591 = vst [vmem:[#allocation20_spill] sm:$0xff] %v3755_v5 }
 0x466   :  { %v3757_v55 = vpop.permute.xlu1 %1027 }
 0x467   :  { %4592 = vst [vmem:[#allocation21_spill] sm:$0xff] %v3757_v55 }
 0x46f   :  { %v1039_v47 = vpop.permute.xlu0 %1038 }
 0x470   :  { %v1053_v0 = vmul.f32 %v1039_v47, %v3263_v32  ;;  %v3104_v47 = vmov 25  }
 0x472   :  { %1061 = vrot.lane.b32.xlu1 %v1053_v0, %s3096_s22 }
 0x473   :  { %v1043_v15 = vpop.permute.xlu1 %1042  ;;  %v1051_v29 = vpop.permute.xlu0 %1050 }
 0x474   :  { %v1054_v34 = vmul.f32 %v3179_v10, %v1043_v15  ;;  %v1056_v13 = vmul.f32 %v3181_v11, %v1051_v29 }
 0x476   :  { %1063 = vrot.lane.b32.xlu0 %v1054_v34, %s3096_s22 }
 0x477   :  { %v1047_v9 = vpop.permute.xlu1 %1046 }
 0x478   :  { %v1055_v58 = vmul.f32 %v1047_v9, %v3261_v31 }
 0x47a   :  { %1065 = vrot.lane.b32.xlu1 %v1055_v58, %s3096_s22  ;;  %1067 = vrot.lane.b32.xlu0 %v1056_v13, %s3096_s22  ;;  %v3105_v58 = vmov 26  }
 0x47e   :  { %1099 = vperm.xlu1 %2921, %v3263_v32   ;;  %1103 = vperm.xlu0 %2922, %v3179_v10  }
 0x482   :  { %1107 = vperm.xlu1 %2921, %v3261_v31   ;;  %2923 = vset.pattern.permute.xlu0 %v3104_v47 }
 0x483   :  { %1119 = vperm.xlu0 %2923, %v3263_v32  }
 0x486   :  { %1111 = vperm.xlu1 %2921, %v3181_v11  }
 0x487   :  { %1131 = vperm.xlu0 %2923, %v3181_v11  }
 0x48a   :  { %2924 = vset.pattern.permute.xlu1 %v3104_v47 }
 0x48b   :  { %1123 = vperm.xlu1 %2924, %v3179_v10   ;;  %2926 = vset.pattern.permute.xlu0 %v3105_v58 }
 0x48f   :  { %1127 = vperm.xlu1 %2924, %v3261_v31  }
 0x493   :  { %2925 = vset.pattern.permute.xlu1 %v3105_v58 }
 0x4e4   :  { %v3777_v29 = vpop.permute.xlu1 %1061 }
 0x4e5   :  { %4594 = vst [vmem:[#allocation23_spill] sm:$0xff] %v3777_v29 }
 0x4e8   :  { %v3775_v34 = vpop.permute.xlu0 %1063 }
 0x4e9   :  { %4593 = vst [vmem:[#allocation22_spill] sm:$0xff] %v3775_v34 }
 0x4ec   :  { %v3779_v13 = vpop.permute.xlu1 %1065  ;;  %v3781_v0 = vpop.permute.xlu0 %1067 }
 0x4ed   :  { %4595 = vst [vmem:[#allocation24_spill] sm:$0xff] %v3779_v13 }
 0x4f9   :  { %v3783_v15 = vpop.permute.xlu1 %1099  ;;  %v3785_v9 = vpop.permute.xlu0 %1103 }
 0x4fa   :  { %4596 = vst [vmem:[#allocation25_spill] sm:$0xff] %v3783_v15  ;;  %4597 = vst [vmem:[#allocation26_spill] sm:$0xff] %v3785_v9 }
 0x4fd   :  { %v3787_v47 = vpop.permute.xlu1 %1107 }
 0x4fe   :  { %4598 = vst [vmem:[#allocation27_spill] sm:$0xff] %v3787_v47  ;;  %v1120_v5 = vpop.permute.xlu0 %1119 }
 0x4ff   :  { %v1134_v55 = vmul.f32 %v1120_v5, %v3263_v32  ;;  %v3106_v5 = vmov 27  }
 0x501   :  { %v3790_v19 = vpop.permute.xlu1 %1111  ;;  %1142 = vrot.lane.b32.xlu1 %v1134_v55, %s3092_s0  ;;  %v473_v55 = vmul.f32 %v3179_v10, %v3336_v54 }
 0x502   :  { %4599 = vst [vmem:[#allocation28_spill] sm:$0xff] %v3790_v19  ;;  %v1132_v34 = vpop.permute.xlu0 %1131  ;;  %v472_v19 = vmul.f32 %v3488_v60, %v3263_v32  ;;  %v794_v60 = vmul.f32 %v3179_v10, %v3386_v18 }
 0x503   :  { %v1137_v15 = vmul.f32 %v3181_v11, %v1132_v34  ;;  %v513_v34 = vadd.f32 %v3567_v46, %v473_v55 }
 0x506   :  { %v1124_v58 = vpop.permute.xlu1 %1123 }
 0x507   :  { %v1135_v29 = vmul.f32 %v3179_v10, %v1124_v58 }
 0x509   :  { %1144 = vrot.lane.b32.xlu0 %v1135_v29, %s3092_s0 }
 0x50a   :  { %v1128_v13 = vpop.permute.xlu1 %1127 }
 0x50b   :  { %v1136_v9 = vmul.f32 %v1128_v13, %v3261_v31  ;;  %v475_v13 = vmul.f32 %v3181_v11, %v3334_v53  ;;  %v512_v53 = vadd.f32 %v3667_v25, %v472_v19 }
 0x50d   :  { %1146 = vrot.lane.b32.xlu1 %v1136_v9, %s3092_s0  ;;  %1148 = vrot.lane.b32.xlu0 %v1137_v15, %s3092_s0  ;;  %v553_v15 = vadd.f32 %v3632_v22, %v513_v34  ;;  %v515_v58 = vadd.f32 %v3574_v16, %v475_v13  ;;  %v474_v22 = vmul.f32 %v3493_v21, %v3261_v31 }
 0x50e   :  { %v552_v19 = vadd.f32 %v3659_v3, %v512_v53  ;;  %v834_v21 = vadd.f32 %v3628_v37, %v794_v60  ;;  %v4604_v60 = vld [vmem:[#allocation21_spill] sm:$0xff] }
 0x50f   :  { %v593_v54 = vadd.f32 %v3581_v23, %v553_v15  ;;  %v514_v25 = vadd.f32 %v3671_v43, %v474_v22 }
 0x511   :  { %1159 = vperm.xlu1 %2925, %v3263_v32   ;;  %1163 = vperm.xlu0 %2926, %v3179_v10   ;;  %v633_v55 = vadd.f32 %v3641_v59, %v593_v54  ;;  %v554_v37 = vadd.f32 %v3661_v39, %v514_v25  ;;  %v4608_v25 = vld [vmem:[#allocation16_spill] sm:$0xff] }
 0x513   :  { %v673_v59 = vadd.f32 %v3597_v24, %v633_v55  ;;  %v874_v24 = vadd.f32 %v3651_v36, %v834_v21  ;;  %v4609_v21 = vld [vmem:[#allocation19_spill] sm:$0xff] }
 0x515   :  { %1167 = vperm.xlu1 %2925, %v3261_v31   ;;  %2927 = vset.pattern.permute.xlu0 %v3106_v5  ;;  %v713_v18 = vadd.f32 %v3647_v27, %v673_v59  ;;  %v914_v53 = vadd.f32 %v3639_v1, %v874_v24 }
 0x517   :  { %v753_v27 = vadd.f32 %v3615_v62, %v713_v18  ;;  %v954_v22 = vadd.f32 %v3717_v20, %v914_v53  ;;  %v795_v62 = vmul.f32 %v3569_v61, %v3261_v31 }
 0x519   :  { %1171 = vperm.xlu1 %2925, %v3181_v11   ;;  %v835_v20 = vadd.f32 %v3697_v33, %v795_v62 }
 0x51d   :  { %2928 = vset.pattern.permute.xlu1 %v3106_v5  ;;  %v555_v5 = vadd.f32 %v3637_v41, %v515_v58 }
 0x51f   :  { %v595_v16 = vadd.f32 %v3590_v7, %v555_v5  ;;  %v592_v7 = vadd.f32 %v3675_v51, %v552_v19  ;;  %v793_v5 = vmul.f32 %v3562_v8, %v3263_v32 }
 0x521   :  { %v635_v15 = vadd.f32 %v3643_v2, %v595_v16  ;;  %v796_v2 = vmul.f32 %v3181_v11, %v3384_v17  ;;  %v594_v17 = vadd.f32 %v3677_v45, %v554_v37  ;;  %v632_v36 = vadd.f32 %v3664_v35, %v592_v7  ;;  %v4610_v7 = vld [vmem:[#allocation18_spill] sm:$0xff]  ;;  %v4613_v37 = vld [vmem:[#allocation24_spill] sm:$0xff] }
 0x522   :  { %v833_v39 = vadd.f32 %v3695_v26, %v793_v5  ;;  %v994_v45 = vadd.f32 %v3731_v30, %v954_v22  ;;  %v4601_v30 = vld [vmem:[#allocation11_spill] sm:$0xff] }
 0x523   :  { %v675_v3 = vadd.f32 %v3606_v52, %v635_v15  ;;  %v836_v54 = vadd.f32 %v3635_v38, %v796_v2  ;;  %v672_v38 = vadd.f32 %v3681_v44, %v632_v36  ;;  %v4607_v15 = vld [vmem:[#allocation17_spill] sm:$0xff]  ;;  %v4611_v2 = vld [vmem:[#allocation23_spill] sm:$0xff] }
 0x524   :  { %v873_v35 = vadd.f32 %v3683_v48, %v833_v39  ;;  %v4600_v48 = vld [vmem:[#allocation22_spill] sm:$0xff] }
 0x525   :  { %v715_v51 = vadd.f32 %v3649_v6, %v675_v3  ;;  %v876_v52 = vadd.f32 %v3653_v28, %v836_v54  ;;  %v634_v6 = vadd.f32 %v3669_v14, %v594_v17  ;;  %v712_v26 = vadd.f32 %v3673_v50, %v672_v38 }
 0x526   :  { %v913_v16 = vadd.f32 %v3701_v4, %v873_v35  ;;  %v1034_v14 = vadd.f32 %v3753_v40, %v994_v45  ;;  %v4605_v40 = vld [vmem:[#allocation13_spill] sm:$0xff] }
 0x527   :  { %v755_v28 = vadd.f32 %v3622_v57, %v715_v51  ;;  %v916_v1 = vadd.f32 %v3645_v12, %v876_v52  ;;  %v674_v44 = vadd.f32 %v3685_v49, %v634_v6  ;;  %v752_v57 = vadd.f32 %v3689_v56, %v712_v26 }
 0x528   :  { %v1074_v49 = vadd.f32 %v4600_v48, %v1034_v14 }
 0x529   :  { %v956_v61 = vadd.f32 %v3719_v63, %v916_v1  ;;  %v714_v50 = vadd.f32 %v4601_v30, %v674_v44 }
 0x52b   :  { %v996_v12 = vadd.f32 %v3737_v42, %v956_v61 }
 0x52d   :  { %v1036_v63 = vadd.f32 %v4604_v60, %v996_v12 }
 0x52f   :  { %v1076_v59 = vadd.f32 %v3781_v0, %v1036_v63  ;;  %v3108_v0 = vmov 28  }
 0x573   :  { %v3811_v9 = vpop.permute.xlu1 %1142 }
 0x57b   :  { %v3806_v29 = vpop.permute.xlu0 %1144 }
 0x57f   :  { %v3818_v47 = vpop.permute.xlu1 %1146  ;;  %v3820_v46 = vpop.permute.xlu0 %1148 }
 0x58c   :  { %v1160_v34 = vpop.permute.xlu1 %1159  ;;  %v1164_v13 = vpop.permute.xlu0 %1163 }
 0x58d   :  { %v1174_v23 = vmul.f32 %v1160_v34, %v3263_v32  ;;  %v1175_v41 = vmul.f32 %v3179_v10, %v1164_v13  ;;  %v4602_v34 = vld [vmem:[#allocation12_spill] sm:$0xff]  ;;  %v4603_v13 = vld [vmem:[#allocation15_spill] sm:$0xff] }
 0x58e   :  { %v875_v33 = vadd.f32 %v4602_v34, %v835_v20  ;;  %v953_v4 = vadd.f32 %v4603_v13, %v913_v16  ;;  %v3109_v20 = vmov 29  }
 0x58f   :  { %1182 = vrot.lane.b32.xlu0 %v1174_v23, %s3097_s23  ;;  %1184 = vrot.lane.b32.xlu1 %v1175_v41, %s3097_s23  ;;  %v754_v23 = vadd.f32 %v4605_v40, %v714_v50  ;;  %v4606_v41 = vld [vmem:[#allocation14_spill] sm:$0xff] }
 0x590   :  { %v1168_v58 = vpop.permute.xlu1 %1167  ;;  %v915_v56 = vadd.f32 %v4606_v41, %v875_v33  ;;  %v993_v42 = vadd.f32 %v4607_v15, %v953_v4  ;;  %v3110_v4 = vmov 30  }
 0x591   :  { %v1176_v43 = vmul.f32 %v1168_v58, %v3261_v31 }
 0x592   :  { %v955_v19 = vadd.f32 %v4608_v25, %v915_v56  ;;  %v1033_v18 = vadd.f32 %v4609_v21, %v993_v42 }
 0x593   :  { %1186 = vrot.lane.b32.xlu0 %v1176_v43, %s3097_s23  ;;  %v4612_v43 = vld [vmem:[#allocation20_spill] sm:$0xff] }
 0x594   :  { %v1172_v55 = vpop.permute.xlu1 %1171  ;;  %v995_v58 = vadd.f32 %v4610_v7, %v955_v19  ;;  %v1073_v24 = vadd.f32 %v4611_v2, %v1033_v18  ;;  %v3111_v18 = vmov 31  }
 0x595   :  { %v1177_v8 = vmul.f32 %v3181_v11, %v1172_v55 }
 0x596   :  { %v1035_v3 = vadd.f32 %v4612_v43, %v995_v58 }
 0x597   :  { %762 = vrot.lane.b32.xlu0 %v753_v27, %s3070_s13  ;;  %1188 = vrot.lane.b32.xlu1 %v1177_v8, %s3097_s23 }
 0x598   :  { %v1075_v5 = vadd.f32 %v4613_v37, %v1035_v3 }
 0x59b   :  { %766 = vrot.lane.b32.xlu0 %v755_v28, %s3070_s13  ;;  %1203 = vperm.xlu1 %2928, %v3179_v10  }
 0x59f   :  { %1083 = vrot.lane.b32.xlu0 %v1074_v49, %s3107_s26  ;;  %760 = vrot.lane.b32.xlu1 %v752_v57, %s3070_s13 }
 0x5a3   :  { %1087 = vrot.lane.b32.xlu0 %v1076_v59, %s3107_s26  ;;  %764 = vrot.lane.b32.xlu1 %v754_v23, %s3070_s13 }
 0x5a7   :  { %1199 = vperm.xlu0 %2927, %v3263_v32   ;;  %1081 = vrot.lane.b32.xlu1 %v1073_v24, %s3107_s26 }
 0x5ab   :  { %1211 = vperm.xlu0 %2927, %v3181_v11   ;;  %1085 = vrot.lane.b32.xlu1 %v1075_v5, %s3107_s26 }
 0x5af   :  { %1207 = vperm.xlu1 %2928, %v3261_v31   ;;  %2930 = vset.pattern.permute.xlu0 %v3108_v0 }
 0x5b3   :  { %2929 = vset.pattern.permute.xlu1 %v3108_v0 }
 0x601   :  { %v3899_v54 = vpop.permute.xlu0 %1182  ;;  %v3904_v36 = vpop.permute.xlu1 %1184 }
 0x605   :  { %v3901_v27 = vpop.permute.xlu0 %1186 }
 0x609   :  { %v763_v51 = vpop.permute.xlu0 %762  ;;  %v3907_v52 = vpop.permute.xlu1 %1188 }
 0x60a   :  { %774 = vst.msk [vmem:[#allocation7 + $0x8] sm:$0xff] %vm772_vm2, %v763_v51 }
 0x60d   :  { %v767_v17 = vpop.permute.xlu0 %766 }
 0x60e   :  { %776 = vst.msk [vmem:[#allocation7 + $0x18] sm:$0xff] %vm772_vm2, %v767_v17 }
 0x611   :  { %v1084_v55 = vpop.permute.xlu0 %1083 }
 0x612   :  { %1095 = vst.msk [vmem:[#allocation7 + $0x8] sm:$0xff] %vm1093_vm3, %v1084_v55 }
 0x615   :  { %v1088_v39 = vpop.permute.xlu0 %1087 }
 0x616   :  { %1097 = vst.msk [vmem:[#allocation7 + $0x18] sm:$0xff] %vm1093_vm3, %v1088_v39  ;;  %v1204_v53 = vpop.permute.xlu1 %1203 }
 0x617   :  { %v1215_v8 = vmul.f32 %v3179_v10, %v1204_v53 }
 0x619   :  { %1224 = vrot.lane.b32.xlu0 %v1215_v8, %s3094_s1 }
 0x61a   :  { %v761_v38 = vpop.permute.xlu1 %760 }
 0x61b   :  { %773 = vst.msk [vmem:[#allocation7] sm:$0xff] %vm772_vm2, %v761_v38 }
 0x61e   :  { %v765_v22 = vpop.permute.xlu1 %764 }
 0x61f   :  { %775 = vst.msk [vmem:[#allocation7 + $0x10] sm:$0xff] %vm772_vm2, %v765_v22 }
 0x622   :  { %v1082_v62 = vpop.permute.xlu1 %1081  ;;  %v1200_v6 = vpop.permute.xlu0 %1199 }
 0x623   :  { %1094 = vst.msk [vmem:[#allocation7] sm:$0xff] %vm1093_vm3, %v1082_v62  ;;  %v1214_v28 = vmul.f32 %v1200_v6, %v3263_v32  ;;  %v3112_v6 = vmov 32  }
 0x625   :  { %1222 = vrot.lane.b32.xlu1 %v1214_v28, %s3094_s1 }
 0x626   :  { %v1086_v35 = vpop.permute.xlu1 %1085  ;;  %v1212_v1 = vpop.permute.xlu0 %1211 }
 0x627   :  { %1096 = vst.msk [vmem:[#allocation7 + $0x10] sm:$0xff] %vm1093_vm3, %v1086_v35  ;;  %v1217_v45 = vmul.f32 %v3181_v11, %v1212_v1 }
 0x629   :  { %1228 = vrot.lane.b32.xlu0 %v1217_v45, %s3094_s1 }
 0x62a   :  { %v1208_v44 = vpop.permute.xlu1 %1207 }
 0x62b   :  { %v1216_v26 = vmul.f32 %v1208_v44, %v3261_v31 }
 0x62d   :  { %1226 = vrot.lane.b32.xlu1 %v1216_v26, %s3094_s1  ;;  %1243 = vperm.xlu0 %2930, %v3179_v10  }
 0x631   :  { %1239 = vperm.xlu1 %2929, %v3263_v32   ;;  %2931 = vset.pattern.permute.xlu0 %v3109_v20 }
 0x635   :  { %1247 = vperm.xlu1 %2929, %v3261_v31  }
 0x639   :  { %1251 = vperm.xlu1 %2929, %v3181_v11  }
 0x63d   :  { %2932 = vset.pattern.permute.xlu1 %v3109_v20  ;;  %v4614_v20 = vld [vmem:[#allocation25_spill] sm:$0xff] }
 0x68b   :  { %v3927_v16 = vpop.permute.xlu0 %1224 }
 0x697   :  { %v3929_v61 = vpop.permute.xlu1 %1222 }
 0x69b   :  { %v3931_v14 = vpop.permute.xlu0 %1228 }
 0x69f   :  { %v3933_v57 = vpop.permute.xlu1 %1226 }
 0x6a8   :  { %v1244_v12 = vpop.permute.xlu0 %1243 }
 0x6a9   :  { %v1255_v48 = vmul.f32 %v3179_v10, %v1244_v12  ;;  %v1114_v12 = vmul.f32 %v4614_v20, %v3263_v32 }
 0x6ab   :  { %1264 = vrot.lane.b32.xlu1 %v1255_v48, %s3098_s24  ;;  %v1154_v48 = vadd.f32 %v3811_v9, %v1114_v12 }
 0x6ac   :  { %v1240_v49 = vpop.permute.xlu1 %1239 }
 0x6ad   :  { %v1254_v30 = vmul.f32 %v1240_v49, %v3263_v32  ;;  %v4615_v49 = vld [vmem:[#allocation26_spill] sm:$0xff] }
 0x6af   :  { %1262 = vrot.lane.b32.xlu0 %v1254_v30, %s3098_s24  ;;  %v1115_v30 = vmul.f32 %v3179_v10, %v4615_v49 }
 0x6b0   :  { %v1248_v50 = vpop.permute.xlu1 %1247 }
 0x6b1   :  { %v1256_v34 = vmul.f32 %v1248_v50, %v3261_v31  ;;  %v1194_v50 = vadd.f32 %v3899_v54, %v1154_v48 }
 0x6b3   :  { %1266 = vrot.lane.b32.xlu0 %v1256_v34, %s3098_s24  ;;  %v1155_v34 = vadd.f32 %v3806_v29, %v1115_v30 }
 0x6b4   :  { %v1252_v33 = vpop.permute.xlu1 %1251 }
 0x6b5   :  { %v1257_v13 = vmul.f32 %v3181_v11, %v1252_v33  ;;  %v1234_v33 = vadd.f32 %v3929_v61, %v1194_v50 }
 0x6b7   :  { %1279 = vperm.xlu0 %2931, %v3263_v32   ;;  %1268 = vrot.lane.b32.xlu1 %v1257_v13, %s3098_s24  ;;  %v4616_v13 = vld [vmem:[#allocation27_spill] sm:$0xff] }
 0x6bb   :  { %1291 = vperm.xlu0 %2931, %v3181_v11   ;;  %1283 = vperm.xlu1 %2932, %v3179_v10  }
 0x6bf   :  { %1287 = vperm.xlu1 %2932, %v3261_v31   ;;  %2934 = vset.pattern.permute.xlu0 %v3110_v4 }
 0x6c3   :  { %2933 = vset.pattern.permute.xlu1 %v3110_v4  ;;  %v1116_v4 = vmul.f32 %v4616_v13, %v3261_v31 }
 0x6c5   :  { %v1156_v9 = vadd.f32 %v3818_v47, %v1116_v4 }
 0x6c7   :  { %v1196_v29 = vadd.f32 %v3901_v27, %v1156_v9 }
 0x71d   :  { %v3949_v63 = vpop.permute.xlu1 %1264 }
 0x721   :  { %v3947_v60 = vpop.permute.xlu0 %1262 }
 0x725   :  { %v3951_v40 = vpop.permute.xlu0 %1266 }
 0x729   :  { %v3953_v23 = vpop.permute.xlu1 %1268 }
 0x732   :  { %v1280_v41 = vpop.permute.xlu0 %1279 }
 0x733   :  { %v1294_v56 = vmul.f32 %v1280_v41, %v3263_v32  ;;  %v4617_v41 = vld [vmem:[#allocation28_spill] sm:$0xff] }
 0x735   :  { %1302 = vrot.lane.b32.xlu1 %v1294_v56, %s3095_s21  ;;  %v1117_v56 = vmul.f32 %v3181_v11, %v4617_v41 }
 0x736   :  { %v1284_v15 = vpop.permute.xlu1 %1283  ;;  %v1292_v59 = vpop.permute.xlu0 %1291 }
 0x737   :  { %v1295_v42 = vmul.f32 %v3179_v10, %v1284_v15  ;;  %v1297_v19 = vmul.f32 %v3181_v11, %v1292_v59  ;;  %v1195_v15 = vadd.f32 %v3904_v36, %v1155_v34  ;;  %v1157_v59 = vadd.f32 %v3820_v46, %v1117_v56 }
 0x738   :  { %v1236_v36 = vadd.f32 %v3933_v57, %v1196_v29  ;;  %v3117_v56 = vmov 36  }
 0x739   :  { %1304 = vrot.lane.b32.xlu0 %v1295_v42, %s3095_s21  ;;  %v1274_v42 = vadd.f32 %v3947_v60, %v1234_v33  ;;  %v1235_v54 = vadd.f32 %v3927_v16, %v1195_v15  ;;  %v1197_v61 = vadd.f32 %v3907_v52, %v1157_v59 }
 0x73a   :  { %v1288_v25 = vpop.permute.xlu1 %1287  ;;  %v1276_v47 = vadd.f32 %v3951_v40, %v1236_v36  ;;  %v3114_v40 = vmov 33   ;;  %v3118_v36 = vmov 37  }
 0x73b   :  { %v1296_v21 = vmul.f32 %v1288_v25, %v3261_v31 }
 0x73d   :  { %1306 = vrot.lane.b32.xlu1 %v1296_v21, %s3095_s21  ;;  %1308 = vrot.lane.b32.xlu0 %v1297_v19, %s3095_s21  ;;  %v1275_v19 = vadd.f32 %v3949_v63, %v1235_v54 }
 0x741   :  { %1319 = vperm.xlu1 %2933, %v3263_v32   ;;  %1323 = vperm.xlu0 %2934, %v3179_v10  }
 0x745   :  { %1327 = vperm.xlu1 %2933, %v3261_v31   ;;  %2935 = vset.pattern.permute.xlu0 %v3111_v18 }
 0x749   :  { %1331 = vperm.xlu1 %2933, %v3181_v11  }
 0x74d   :  { %2936 = vset.pattern.permute.xlu1 %v3111_v18 }
 0x7a7   :  { %v1303_v58 = vpop.permute.xlu1 %1302 }
 0x7a8   :  { %v1314_v25 = vadd.f32 %v1303_v58, %v1274_v42 }
 0x7ab   :  { %v1305_v7 = vpop.permute.xlu0 %1304 }
 0x7ac   :  { %v1315_v60 = vadd.f32 %v1305_v7, %v1275_v19 }
 0x7af   :  { %v3967_v2 = vpop.permute.xlu1 %1306  ;;  %v3969_v24 = vpop.permute.xlu0 %1308 }
 0x7b0   :  { %v1316_v52 = vadd.f32 %v3967_v2, %v1276_v47 }
 0x7bc   :  { %v1320_v43 = vpop.permute.xlu1 %1319  ;;  %v1324_v3 = vpop.permute.xlu0 %1323 }
 0x7bd   :  { %v1334_v37 = vmul.f32 %v1320_v43, %v3263_v32  ;;  %v1335_v5 = vmul.f32 %v3179_v10, %v1324_v3  ;;  %v1237_v43 = vadd.f32 %v3931_v14, %v1197_v61 }
 0x7bf   :  { %1342 = vrot.lane.b32.xlu0 %v1334_v37, %s3099_s25  ;;  %1344 = vrot.lane.b32.xlu1 %v1335_v5, %s3099_s25  ;;  %v1277_v46 = vadd.f32 %v3953_v23, %v1237_v43  ;;  %v3115_v23 = vmov 34  }
 0x7c0   :  { %v1328_v0 = vpop.permute.xlu1 %1327 }
 0x7c1   :  { %v1336_v51 = vmul.f32 %v1328_v0, %v3261_v31  ;;  %v1317_v63 = vadd.f32 %v3969_v24, %v1277_v46 }
 0x7c3   :  { %1346 = vrot.lane.b32.xlu0 %v1336_v51, %s3099_s25 }
 0x7c4   :  { %v1332_v17 = vpop.permute.xlu1 %1331 }
 0x7c5   :  { %v1337_v55 = vmul.f32 %v3181_v11, %v1332_v17 }
 0x7c7   :  { %1359 = vperm.xlu0 %2935, %v3263_v32   ;;  %1348 = vrot.lane.b32.xlu1 %v1337_v55, %s3099_s25 }
 0x7cb   :  { %1371 = vperm.xlu0 %2935, %v3181_v11   ;;  %1363 = vperm.xlu1 %2936, %v3179_v10  }
 0x7cf   :  { %1367 = vperm.xlu1 %2936, %v3261_v31   ;;  %2938 = vset.pattern.permute.xlu0 %v3112_v6 }
 0x7d3   :  { %2937 = vset.pattern.permute.xlu1 %v3112_v6 }
 0x831   :  { %v1343_v39 = vpop.permute.xlu0 %1342  ;;  %v1345_v53 = vpop.permute.xlu1 %1344 }
 0x832   :  { %v1354_v21 = vadd.f32 %v1343_v39, %v1314_v25  ;;  %v1355_v16 = vadd.f32 %v1345_v53, %v1315_v60 }
 0x835   :  { %v1347_v8 = vpop.permute.xlu0 %1346 }
 0x836   :  { %v1356_v37 = vadd.f32 %v1347_v8, %v1316_v52 }
 0x839   :  { %v1349_v38 = vpop.permute.xlu1 %1348 }
 0x83a   :  { %v1357_v5 = vadd.f32 %v1349_v38, %v1317_v63 }
 0x842   :  { %v1360_v22 = vpop.permute.xlu0 %1359 }
 0x843   :  { %v1374_v62 = vmul.f32 %v1360_v22, %v3263_v32 }
 0x845   :  { %1382 = vrot.lane.b32.xlu1 %v1374_v62, %s3096_s22 }
 0x846   :  { %v1364_v28 = vpop.permute.xlu1 %1363  ;;  %v1372_v1 = vpop.permute.xlu0 %1371 }
 0x847   :  { %v1375_v35 = vmul.f32 %v3179_v10, %v1364_v28  ;;  %v1377_v44 = vmul.f32 %v3181_v11, %v1372_v1 }
 0x849   :  { %1384 = vrot.lane.b32.xlu0 %v1375_v35, %s3096_s22 }
 0x84a   :  { %v1368_v45 = vpop.permute.xlu1 %1367 }
 0x84b   :  { %v1376_v26 = vmul.f32 %v1368_v45, %v3261_v31 }
 0x84d   :  { %1386 = vrot.lane.b32.xlu1 %v1376_v26, %s3096_s22  ;;  %1388 = vrot.lane.b32.xlu0 %v1377_v44, %s3096_s22  ;;  %v3116_v44 = vmov 35  }
 0x8b7   :  { %v1383_v18 = vpop.permute.xlu1 %1382 }
 0x8b8   :  { %v1394_v3 = vadd.f32 %v1383_v18, %v1354_v21 }
 0x8ba   :  { %1402 = vrot.lane.b32.xlu1 %v1394_v3, %s3113_s27 }
 0x8bb   :  { %v1385_v27 = vpop.permute.xlu0 %1384 }
 0x8bc   :  { %v1395_v58 = vadd.f32 %v1385_v27, %v1355_v16 }
 0x8be   :  { %1404 = vrot.lane.b32.xlu0 %v1395_v58, %s3113_s27 }
 0x8bf   :  { %v1387_v14 = vpop.permute.xlu1 %1386  ;;  %v1389_v57 = vpop.permute.xlu0 %1388 }
 0x8c0   :  { %v1396_v7 = vadd.f32 %v1387_v14, %v1356_v37  ;;  %v1397_v0 = vadd.f32 %v1389_v57, %v1357_v5  ;;  %v3119_v57 = vmov 38  }
 0x8c2   :  { %1406 = vrot.lane.b32.xlu1 %v1396_v7, %s3113_s27  ;;  %1408 = vrot.lane.b32.xlu0 %v1397_v0, %s3113_s27 }
 0x8c6   :  { %1420 = vperm.xlu1 %2937, %v3263_v32   ;;  %1424 = vperm.xlu0 %2938, %v3179_v10  }
 0x8ca   :  { %1428 = vperm.xlu1 %2937, %v3261_v31   ;;  %2939 = vset.pattern.permute.xlu0 %v3114_v40 }
 0x8cb   :  { %1440 = vperm.xlu0 %2939, %v3263_v32  }
 0x8ce   :  { %1432 = vperm.xlu1 %2937, %v3181_v11  }
 0x8cf   :  { %1452 = vperm.xlu0 %2939, %v3181_v11  }
 0x8d2   :  { %2940 = vset.pattern.permute.xlu1 %v3114_v40 }
 0x8d3   :  { %1444 = vperm.xlu1 %2940, %v3179_v10   ;;  %2942 = vset.pattern.permute.xlu0 %v3115_v23 }
 0x8d7   :  { %1448 = vperm.xlu1 %2940, %v3261_v31  }
 0x8db   :  { %2941 = vset.pattern.permute.xlu1 %v3115_v23 }
 0x92c   :  { %v1403_v2 = vpop.permute.xlu1 %1402 }
 0x92d   :  { %1415 = vst.msk [vmem:[#allocation7] sm:$0xff] %vm1414_vm4, %v1403_v2 }
 0x930   :  { %v1405_v24 = vpop.permute.xlu0 %1404 }
 0x931   :  { %1416 = vst.msk [vmem:[#allocation7 + $0x8] sm:$0xff] %vm1414_vm4, %v1405_v24 }
 0x934   :  { %v1407_v51 = vpop.permute.xlu1 %1406  ;;  %v1409_v17 = vpop.permute.xlu0 %1408 }
 0x935   :  { %1417 = vst.msk [vmem:[#allocation7 + $0x10] sm:$0xff] %vm1414_vm4, %v1407_v51  ;;  %1418 = vst.msk [vmem:[#allocation7 + $0x18] sm:$0xff] %vm1414_vm4, %v1409_v17 }
 0x941   :  { %v4025_v55 = vpop.permute.xlu1 %1420  ;;  %v4027_v39 = vpop.permute.xlu0 %1424 }
 0x945   :  { %v4029_v53 = vpop.permute.xlu1 %1428 }
 0x946   :  { %v1441_v8 = vpop.permute.xlu0 %1440 }
 0x947   :  { %v1455_v38 = vmul.f32 %v1441_v8, %v3263_v32 }
 0x949   :  { %v4032_v22 = vpop.permute.xlu1 %1432  ;;  %1463 = vrot.lane.b32.xlu1 %v1455_v38, %s3092_s0 }
 0x94a   :  { %v1453_v28 = vpop.permute.xlu0 %1452 }
 0x94b   :  { %v1458_v1 = vmul.f32 %v3181_v11, %v1453_v28  ;;  %v3120_v28 = vmov 39  }
 0x94e   :  { %v1445_v62 = vpop.permute.xlu1 %1444 }
 0x94f   :  { %v1456_v6 = vmul.f32 %v3179_v10, %v1445_v62 }
 0x951   :  { %1465 = vrot.lane.b32.xlu0 %v1456_v6, %s3092_s0 }
 0x952   :  { %v1449_v35 = vpop.permute.xlu1 %1448 }
 0x953   :  { %v1457_v45 = vmul.f32 %v1449_v35, %v3261_v31 }
 0x955   :  { %1467 = vrot.lane.b32.xlu1 %v1457_v45, %s3092_s0  ;;  %1469 = vrot.lane.b32.xlu0 %v1458_v1, %s3092_s0 }
 0x959   :  { %1480 = vperm.xlu1 %2941, %v3263_v32   ;;  %1484 = vperm.xlu0 %2942, %v3179_v10  }
 0x95d   :  { %1488 = vperm.xlu1 %2941, %v3261_v31   ;;  %2943 = vset.pattern.permute.xlu0 %v3116_v44 }
 0x961   :  { %1492 = vperm.xlu1 %2941, %v3181_v11  }
 0x965   :  { %2944 = vset.pattern.permute.xlu1 %v3116_v44 }
 0x9bb   :  { %v4047_v20 = vpop.permute.xlu1 %1463 }
 0x9c3   :  { %v4045_v26 = vpop.permute.xlu0 %1465 }
 0x9c7   :  { %v4049_v12 = vpop.permute.xlu1 %1467  ;;  %v4051_v48 = vpop.permute.xlu0 %1469 }
 0x9d4   :  { %v1481_v49 = vpop.permute.xlu1 %1480  ;;  %v1485_v30 = vpop.permute.xlu0 %1484 }
 0x9d5   :  { %v1495_v50 = vmul.f32 %v1481_v49, %v3263_v32  ;;  %v1496_v34 = vmul.f32 %v3179_v10, %v1485_v30 }
 0x9d7   :  { %1503 = vrot.lane.b32.xlu0 %v1495_v50, %s3097_s23  ;;  %1505 = vrot.lane.b32.xlu1 %v1496_v34, %s3097_s23 }
 0x9d8   :  { %v1489_v33 = vpop.permute.xlu1 %1488 }
 0x9d9   :  { %v1497_v13 = vmul.f32 %v1489_v33, %v3261_v31 }
 0x9db   :  { %1507 = vrot.lane.b32.xlu0 %v1497_v13, %s3097_s23 }
 0x9dc   :  { %v1493_v4 = vpop.permute.xlu1 %1492 }
 0x9dd   :  { %v1498_v41 = vmul.f32 %v3181_v11, %v1493_v4 }
 0x9df   :  { %1520 = vperm.xlu0 %2943, %v3263_v32   ;;  %1509 = vrot.lane.b32.xlu1 %v1498_v41, %s3097_s23 }
 0x9e3   :  { %1532 = vperm.xlu0 %2943, %v3181_v11   ;;  %1524 = vperm.xlu1 %2944, %v3179_v10  }
 0x9e7   :  { %1528 = vperm.xlu1 %2944, %v3261_v31   ;;  %2946 = vset.pattern.permute.xlu0 %v3117_v56 }
 0x9eb   :  { %2945 = vset.pattern.permute.xlu1 %v3117_v56 }
 0xa49   :  { %v4065_v15 = vpop.permute.xlu0 %1503  ;;  %v4067_v42 = vpop.permute.xlu1 %1505 }
 0xa4d   :  { %v4069_v9 = vpop.permute.xlu0 %1507 }
 0xa51   :  { %v4071_v59 = vpop.permute.xlu1 %1509 }
 0xa5a   :  { %v1521_v54 = vpop.permute.xlu0 %1520 }
 0xa5b   :  { %v1535_v25 = vmul.f32 %v1521_v54, %v3263_v32 }
 0xa5d   :  { %1543 = vrot.lane.b32.xlu1 %v1535_v25, %s3094_s1 }
 0xa5e   :  { %v1525_v29 = vpop.permute.xlu1 %1524  ;;  %v1533_v19 = vpop.permute.xlu0 %1532 }
 0xa5f   :  { %v1536_v61 = vmul.f32 %v3179_v10, %v1525_v29  ;;  %v1538_v18 = vmul.f32 %v3181_v11, %v1533_v19 }
 0xa61   :  { %1545 = vrot.lane.b32.xlu0 %v1536_v61, %s3094_s1 }
 0xa62   :  { %v1529_v21 = vpop.permute.xlu1 %1528 }
 0xa63   :  { %v1537_v43 = vmul.f32 %v1529_v21, %v3261_v31  ;;  %v3121_v21 = vmov 40  }
 0xa65   :  { %1547 = vrot.lane.b32.xlu1 %v1537_v43, %s3094_s1  ;;  %1549 = vrot.lane.b32.xlu0 %v1538_v18, %s3094_s1 }
 0xa69   :  { %1560 = vperm.xlu1 %2945, %v3263_v32   ;;  %1564 = vperm.xlu0 %2946, %v3179_v10  }
 0xa6d   :  { %1568 = vperm.xlu1 %2945, %v3261_v31   ;;  %2947 = vset.pattern.permute.xlu0 %v3118_v36 }
 0xa71   :  { %1572 = vperm.xlu1 %2945, %v3181_v11  }
 0xa75   :  { %2948 = vset.pattern.permute.xlu1 %v3118_v36 }
 0xacf   :  { %v4087_v3 = vpop.permute.xlu1 %1543 }
 0xad3   :  { %v4085_v60 = vpop.permute.xlu0 %1545 }
 0xad7   :  { %v4089_v47 = vpop.permute.xlu1 %1547  ;;  %v4091_v46 = vpop.permute.xlu0 %1549 }
 0xae4   :  { %v1561_v16 = vpop.permute.xlu1 %1560  ;;  %v1565_v27 = vpop.permute.xlu0 %1564 }
 0xae5   :  { %v1575_v52 = vmul.f32 %v1561_v16, %v3263_v32  ;;  %v1576_v63 = vmul.f32 %v3179_v10, %v1565_v27 }
 0xae7   :  { %1583 = vrot.lane.b32.xlu0 %v1575_v52, %s3098_s24  ;;  %1585 = vrot.lane.b32.xlu1 %v1576_v63, %s3098_s24  ;;  %v1435_v63 = vmul.f32 %v4025_v55, %v3263_v32 }
 0xae8   :  { %v1569_v58 = vpop.permute.xlu1 %1568 }
 0xae9   :  { %v1577_v37 = vmul.f32 %v1569_v58, %v3261_v31  ;;  %v1475_v58 = vadd.f32 %v4047_v20, %v1435_v63 }
 0xaeb   :  { %1587 = vrot.lane.b32.xlu0 %v1577_v37, %s3098_s24  ;;  %v1436_v37 = vmul.f32 %v3179_v10, %v4027_v39 }
 0xaec   :  { %v1573_v5 = vpop.permute.xlu1 %1572 }
 0xaed   :  { %v1578_v14 = vmul.f32 %v3181_v11, %v1573_v5  ;;  %v1515_v5 = vadd.f32 %v4065_v15, %v1475_v58 }
 0xaef   :  { %1600 = vperm.xlu0 %2947, %v3263_v32   ;;  %1589 = vrot.lane.b32.xlu1 %v1578_v14, %s3098_s24  ;;  %v1476_v14 = vadd.f32 %v4045_v26, %v1436_v37 }
 0xaf3   :  { %1612 = vperm.xlu0 %2947, %v3181_v11   ;;  %1604 = vperm.xlu1 %2948, %v3179_v10  }
 0xaf7   :  { %1608 = vperm.xlu1 %2948, %v3261_v31   ;;  %2950 = vset.pattern.permute.xlu0 %v3119_v57 }
 0xafb   :  { %2949 = vset.pattern.permute.xlu1 %v3119_v57  ;;  %v1555_v57 = vadd.f32 %v4087_v3, %v1515_v5 }
 0xb59   :  { %v4105_v7 = vpop.permute.xlu0 %1583  ;;  %v4107_v0 = vpop.permute.xlu1 %1585 }
 0xb5a   :  { %v1595_v55 = vadd.f32 %v4105_v7, %v1555_v57 }
 0xb5d   :  { %v4109_v40 = vpop.permute.xlu0 %1587 }
 0xb61   :  { %v4111_v23 = vpop.permute.xlu1 %1589 }
 0xb6a   :  { %v1601_v2 = vpop.permute.xlu0 %1600 }
 0xb6b   :  { %v1615_v24 = vmul.f32 %v1601_v2, %v3263_v32  ;;  %v1437_v2 = vmul.f32 %v4029_v53, %v3261_v31 }
 0xb6d   :  { %1623 = vrot.lane.b32.xlu1 %v1615_v24, %s3095_s21  ;;  %v1438_v24 = vmul.f32 %v3181_v11, %v4032_v22  ;;  %v1477_v20 = vadd.f32 %v4049_v12, %v1437_v2 }
 0xb6e   :  { %v1605_v51 = vpop.permute.xlu1 %1604  ;;  %v1613_v8 = vpop.permute.xlu0 %1612 }
 0xb6f   :  { %v1616_v17 = vmul.f32 %v3179_v10, %v1605_v51  ;;  %v1618_v62 = vmul.f32 %v3181_v11, %v1613_v8  ;;  %v1516_v51 = vadd.f32 %v4067_v42, %v1476_v14  ;;  %v1478_v39 = vadd.f32 %v4051_v48, %v1438_v24 }
 0xb70   :  { %v1517_v26 = vadd.f32 %v4069_v9, %v1477_v20  ;;  %v3126_v24 = vmov 44  }
 0xb71   :  { %1625 = vrot.lane.b32.xlu0 %v1616_v17, %s3095_s21  ;;  %v1556_v15 = vadd.f32 %v4085_v60, %v1516_v51  ;;  %v1518_v3 = vadd.f32 %v4071_v59, %v1478_v39 }
 0xb72   :  { %v1609_v38 = vpop.permute.xlu1 %1608  ;;  %v1557_v22 = vadd.f32 %v4089_v47, %v1517_v26 }
 0xb73   :  { %v1617_v6 = vmul.f32 %v1609_v38, %v3261_v31  ;;  %v1596_v53 = vadd.f32 %v4107_v0, %v1556_v15  ;;  %v1558_v42 = vadd.f32 %v4091_v46, %v1518_v3 }
 0xb74   :  { %v1597_v12 = vadd.f32 %v4109_v40, %v1557_v22  ;;  %v3123_v40 = vmov 41  }
 0xb75   :  { %1627 = vrot.lane.b32.xlu1 %v1617_v6, %s3095_s21  ;;  %1629 = vrot.lane.b32.xlu0 %v1618_v62, %s3095_s21  ;;  %v1598_v48 = vadd.f32 %v4111_v23, %v1558_v42  ;;  %v3124_v23 = vmov 42   ;;  %v3127_v42 = vmov 45  }
 0xb79   :  { %1640 = vperm.xlu1 %2949, %v3263_v32   ;;  %1644 = vperm.xlu0 %2950, %v3179_v10  }
 0xb7d   :  { %1648 = vperm.xlu1 %2949, %v3261_v31   ;;  %2951 = vset.pattern.permute.xlu0 %v3120_v28 }
 0xb81   :  { %1652 = vperm.xlu1 %2949, %v3181_v11  }
 0xb85   :  { %2952 = vset.pattern.permute.xlu1 %v3120_v28 }
 0xbdf   :  { %v1624_v1 = vpop.permute.xlu1 %1623 }
 0xbe0   :  { %v1635_v17 = vadd.f32 %v1624_v1, %v1595_v55 }
 0xbe3   :  { %v1626_v35 = vpop.permute.xlu0 %1625 }
 0xbe4   :  { %v1636_v7 = vadd.f32 %v1626_v35, %v1596_v53 }
 0xbe7   :  { %v4125_v45 = vpop.permute.xlu1 %1627  ;;  %v4127_v44 = vpop.permute.xlu0 %1629 }
 0xbe8   :  { %v1637_v59 = vadd.f32 %v4125_v45, %v1597_v12  ;;  %v1638_v0 = vadd.f32 %v4127_v44, %v1598_v48 }
 0xbf4   :  { %v1641_v49 = vpop.permute.xlu1 %1640  ;;  %v1645_v30 = vpop.permute.xlu0 %1644 }
 0xbf5   :  { %v1655_v50 = vmul.f32 %v1641_v49, %v3263_v32  ;;  %v1656_v34 = vmul.f32 %v3179_v10, %v1645_v30 }
 0xbf7   :  { %1663 = vrot.lane.b32.xlu0 %v1655_v50, %s3099_s25  ;;  %1665 = vrot.lane.b32.xlu1 %v1656_v34, %s3099_s25 }
 0xbf8   :  { %v1649_v33 = vpop.permute.xlu1 %1648 }
 0xbf9   :  { %v1657_v13 = vmul.f32 %v1649_v33, %v3261_v31 }
 0xbfb   :  { %1667 = vrot.lane.b32.xlu0 %v1657_v13, %s3099_s25 }
 0xbfc   :  { %v1653_v4 = vpop.permute.xlu1 %1652 }
 0xbfd   :  { %v1658_v41 = vmul.f32 %v3181_v11, %v1653_v4 }
 0xbff   :  { %1680 = vperm.xlu0 %2951, %v3263_v32   ;;  %1669 = vrot.lane.b32.xlu1 %v1658_v41, %s3099_s25 }
 0xc03   :  { %1692 = vperm.xlu0 %2951, %v3181_v11   ;;  %1684 = vperm.xlu1 %2952, %v3179_v10  }
 0xc07   :  { %1688 = vperm.xlu1 %2952, %v3261_v31   ;;  %2954 = vset.pattern.permute.xlu0 %v3121_v21 }
 0xc0b   :  { %2953 = vset.pattern.permute.xlu1 %v3121_v21 }
 0xc69   :  { %v1664_v56 = vpop.permute.xlu0 %1663  ;;  %v1666_v54 = vpop.permute.xlu1 %1665 }
 0xc6a   :  { %v1675_v8 = vadd.f32 %v1664_v56, %v1635_v17  ;;  %v1676_v60 = vadd.f32 %v1666_v54, %v1636_v7 }
 0xc6d   :  { %v1668_v25 = vpop.permute.xlu0 %1667 }
 0xc6e   :  { %v1677_v28 = vadd.f32 %v1668_v25, %v1637_v59 }
 0xc71   :  { %v1670_v29 = vpop.permute.xlu1 %1669 }
 0xc72   :  { %v1678_v1 = vadd.f32 %v1670_v29, %v1638_v0 }
 0xc7a   :  { %v1681_v61 = vpop.permute.xlu0 %1680 }
 0xc7b   :  { %v1695_v19 = vmul.f32 %v1681_v61, %v3263_v32 }
 0xc7d   :  { %1703 = vrot.lane.b32.xlu1 %v1695_v19, %s3096_s22 }
 0xc7e   :  { %v1685_v18 = vpop.permute.xlu1 %1684  ;;  %v1693_v36 = vpop.permute.xlu0 %1692 }
 0xc7f   :  { %v1696_v43 = vmul.f32 %v3179_v10, %v1685_v18  ;;  %v1698_v27 = vmul.f32 %v3181_v11, %v1693_v36  ;;  %v3125_v18 = vmov 43  }
 0xc81   :  { %1705 = vrot.lane.b32.xlu0 %v1696_v43, %s3096_s22 }
 0xc82   :  { %v1689_v16 = vpop.permute.xlu1 %1688 }
 0xc83   :  { %v1697_v52 = vmul.f32 %v1689_v16, %v3261_v31 }
 0xc85   :  { %1707 = vrot.lane.b32.xlu1 %v1697_v52, %s3096_s22  ;;  %1709 = vrot.lane.b32.xlu0 %v1698_v27, %s3096_s22 }
 0xcef   :  { %v1704_v38 = vpop.permute.xlu1 %1703 }
 0xcf0   :  { %v1715_v62 = vadd.f32 %v1704_v38, %v1675_v8 }
 0xcf2   :  { %1723 = vrot.lane.b32.xlu1 %v1715_v62, %s3122_s28 }
 0xcf3   :  { %v1706_v9 = vpop.permute.xlu0 %1705 }
 0xcf4   :  { %v1716_v6 = vadd.f32 %v1706_v9, %v1676_v60 }
 0xcf6   :  { %1725 = vrot.lane.b32.xlu0 %v1716_v6, %s3122_s28 }
 0xcf7   :  { %v1708_v47 = vpop.permute.xlu1 %1707  ;;  %v1710_v46 = vpop.permute.xlu0 %1709 }
 0xcf8   :  { %v1717_v35 = vadd.f32 %v1708_v47, %v1677_v28  ;;  %v1718_v49 = vadd.f32 %v1710_v46, %v1678_v1  ;;  %v3128_v46 = vmov 46  }
 0xcfa   :  { %1727 = vrot.lane.b32.xlu1 %v1717_v35, %s3122_s28  ;;  %1729 = vrot.lane.b32.xlu0 %v1718_v49, %s3122_s28 }
 0xcfe   :  { %1741 = vperm.xlu1 %2953, %v3263_v32   ;;  %1745 = vperm.xlu0 %2954, %v3179_v10  }
 0xd02   :  { %1749 = vperm.xlu1 %2953, %v3261_v31   ;;  %2955 = vset.pattern.permute.xlu0 %v3123_v40 }
 0xd03   :  { %1761 = vperm.xlu0 %2955, %v3263_v32  }
 0xd06   :  { %1753 = vperm.xlu1 %2953, %v3181_v11  }
 0xd07   :  { %1773 = vperm.xlu0 %2955, %v3181_v11  }
 0xd0a   :  { %2956 = vset.pattern.permute.xlu1 %v3123_v40 }
 0xd0b   :  { %1765 = vperm.xlu1 %2956, %v3179_v10   ;;  %2958 = vset.pattern.permute.xlu0 %v3124_v23 }
 0xd0f   :  { %1769 = vperm.xlu1 %2956, %v3261_v31  }
 0xd13   :  { %2957 = vset.pattern.permute.xlu1 %v3124_v23 }
 0xd64   :  { %v1724_v45 = vpop.permute.xlu1 %1723 }
 0xd65   :  { %1736 = vst.msk [vmem:[#allocation7] sm:$0xff] %vm1735_vm5, %v1724_v45 }
 0xd68   :  { %v1726_v44 = vpop.permute.xlu0 %1725 }
 0xd69   :  { %1737 = vst.msk [vmem:[#allocation7 + $0x8] sm:$0xff] %vm1735_vm5, %v1726_v44 }
 0xd6c   :  { %v1728_v30 = vpop.permute.xlu1 %1727  ;;  %v1730_v50 = vpop.permute.xlu0 %1729 }
 0xd6d   :  { %1738 = vst.msk [vmem:[#allocation7 + $0x10] sm:$0xff] %vm1735_vm5, %v1728_v30  ;;  %1739 = vst.msk [vmem:[#allocation7 + $0x18] sm:$0xff] %vm1735_vm5, %v1730_v50 }
 0xd79   :  { %v4183_v34 = vpop.permute.xlu1 %1741  ;;  %v4185_v33 = vpop.permute.xlu0 %1745 }
 0xd7d   :  { %v4187_v13 = vpop.permute.xlu1 %1749 }
 0xd7e   :  { %v1762_v4 = vpop.permute.xlu0 %1761 }
 0xd7f   :  { %v1776_v41 = vmul.f32 %v1762_v4, %v3263_v32 }
 0xd81   :  { %v4190_v56 = vpop.permute.xlu1 %1753  ;;  %1784 = vrot.lane.b32.xlu1 %v1776_v41, %s3092_s0 }
 0xd82   :  { %v1774_v29 = vpop.permute.xlu0 %1773 }
 0xd83   :  { %v1779_v19 = vmul.f32 %v3181_v11, %v1774_v29  ;;  %v3129_v29 = vmov 47  }
 0xd86   :  { %v1766_v54 = vpop.permute.xlu1 %1765 }
 0xd87   :  { %v1777_v25 = vmul.f32 %v3179_v10, %v1766_v54 }
 0xd89   :  { %1786 = vrot.lane.b32.xlu0 %v1777_v25, %s3092_s0 }
 0xd8a   :  { %v1770_v61 = vpop.permute.xlu1 %1769 }
 0xd8b   :  { %v1778_v21 = vmul.f32 %v1770_v61, %v3261_v31 }
 0xd8d   :  { %1788 = vrot.lane.b32.xlu1 %v1778_v21, %s3092_s0  ;;  %1790 = vrot.lane.b32.xlu0 %v1779_v19, %s3092_s0 }
 0xd91   :  { %1801 = vperm.xlu1 %2957, %v3263_v32   ;;  %1805 = vperm.xlu0 %2958, %v3179_v10  }
 0xd95   :  { %1809 = vperm.xlu1 %2957, %v3261_v31   ;;  %2959 = vset.pattern.permute.xlu0 %v3125_v18 }
 0xd99   :  { %1813 = vperm.xlu1 %2957, %v3181_v11  }
 0xd9d   :  { %2960 = vset.pattern.permute.xlu1 %v3125_v18 }
 0xdf3   :  { %v4205_v36 = vpop.permute.xlu1 %1784 }
 0xdfb   :  { %v4203_v43 = vpop.permute.xlu0 %1786 }
 0xdff   :  { %v4207_v16 = vpop.permute.xlu1 %1788  ;;  %v4209_v27 = vpop.permute.xlu0 %1790 }
 0xe0c   :  { %v1802_v52 = vpop.permute.xlu1 %1801  ;;  %v1806_v63 = vpop.permute.xlu0 %1805 }
 0xe0d   :  { %v1816_v58 = vmul.f32 %v1802_v52, %v3263_v32  ;;  %v1817_v37 = vmul.f32 %v3179_v10, %v1806_v63 }
 0xe0f   :  { %1824 = vrot.lane.b32.xlu0 %v1816_v58, %s3097_s23  ;;  %1826 = vrot.lane.b32.xlu1 %v1817_v37, %s3097_s23 }
 0xe10   :  { %v1810_v5 = vpop.permute.xlu1 %1809 }
 0xe11   :  { %v1818_v14 = vmul.f32 %v1810_v5, %v3261_v31 }
 0xe13   :  { %1828 = vrot.lane.b32.xlu0 %v1818_v14, %s3097_s23 }
 0xe14   :  { %v1814_v57 = vpop.permute.xlu1 %1813 }
 0xe15   :  { %v1819_v2 = vmul.f32 %v3181_v11, %v1814_v57 }
 0xe17   :  { %1841 = vperm.xlu0 %2959, %v3263_v32   ;;  %1830 = vrot.lane.b32.xlu1 %v1819_v2, %s3097_s23 }
 0xe1b   :  { %1853 = vperm.xlu0 %2959, %v3181_v11   ;;  %1845 = vperm.xlu1 %2960, %v3179_v10  }
 0xe1f   :  { %1849 = vperm.xlu1 %2960, %v3261_v31   ;;  %2962 = vset.pattern.permute.xlu0 %v3126_v24 }
 0xe23   :  { %2961 = vset.pattern.permute.xlu1 %v3126_v24 }
 0xe81   :  { %v4223_v51 = vpop.permute.xlu0 %1824  ;;  %v4225_v55 = vpop.permute.xlu1 %1826 }
 0xe85   :  { %v4227_v20 = vpop.permute.xlu0 %1828 }
 0xe89   :  { %v4229_v39 = vpop.permute.xlu1 %1830 }
 0xe92   :  { %v1842_v15 = vpop.permute.xlu0 %1841 }
 0xe93   :  { %v1856_v17 = vmul.f32 %v1842_v15, %v3263_v32 }
 0xe95   :  { %1864 = vrot.lane.b32.xlu1 %v1856_v17, %s3094_s1 }
 0xe96   :  { %v1846_v26 = vpop.permute.xlu1 %1845  ;;  %v1854_v53 = vpop.permute.xlu0 %1853 }
 0xe97   :  { %v1857_v3 = vmul.f32 %v3179_v10, %v1846_v26  ;;  %v1859_v38 = vmul.f32 %v3181_v11, %v1854_v53 }
 0xe99   :  { %1866 = vrot.lane.b32.xlu0 %v1857_v3, %s3094_s1 }
 0xe9a   :  { %v1850_v8 = vpop.permute.xlu1 %1849 }
 0xe9b   :  { %v1858_v22 = vmul.f32 %v1850_v8, %v3261_v31  ;;  %v3130_v8 = vmov 48  }
 0xe9d   :  { %1868 = vrot.lane.b32.xlu1 %v1858_v22, %s3094_s1  ;;  %1870 = vrot.lane.b32.xlu0 %v1859_v38, %s3094_s1 }
 0xea1   :  { %1881 = vperm.xlu1 %2961, %v3263_v32   ;;  %1885 = vperm.xlu0 %2962, %v3179_v10  }
 0xea5   :  { %1889 = vperm.xlu1 %2961, %v3261_v31   ;;  %2963 = vset.pattern.permute.xlu0 %v3127_v42 }
 0xea9   :  { %1893 = vperm.xlu1 %2961, %v3181_v11  }
 0xead   :  { %2964 = vset.pattern.permute.xlu1 %v3127_v42 }
 0xf07   :  { %v4245_v62 = vpop.permute.xlu1 %1864 }
 0xf0b   :  { %v4243_v7 = vpop.permute.xlu0 %1866 }
 0xf0f   :  { %v4247_v12 = vpop.permute.xlu1 %1868  ;;  %v4249_v48 = vpop.permute.xlu0 %1870 }
 0xf1c   :  { %v1882_v60 = vpop.permute.xlu1 %1881  ;;  %v1886_v9 = vpop.permute.xlu0 %1885 }
 0xf1d   :  { %v1896_v59 = vmul.f32 %v1882_v60, %v3263_v32  ;;  %v1897_v0 = vmul.f32 %v3179_v10, %v1886_v9 }
 0xf1f   :  { %1904 = vrot.lane.b32.xlu0 %v1896_v59, %s3098_s24  ;;  %1906 = vrot.lane.b32.xlu1 %v1897_v0, %s3098_s24  ;;  %v1756_v0 = vmul.f32 %v4183_v34, %v3263_v32 }
 0xf20   :  { %v1890_v6 = vpop.permute.xlu1 %1889 }
 0xf21   :  { %v1898_v28 = vmul.f32 %v1890_v6, %v3261_v31  ;;  %v1796_v6 = vadd.f32 %v4205_v36, %v1756_v0 }
 0xf23   :  { %1908 = vrot.lane.b32.xlu0 %v1898_v28, %s3098_s24  ;;  %v1757_v28 = vmul.f32 %v3179_v10, %v4185_v33 }
 0xf24   :  { %v1894_v1 = vpop.permute.xlu1 %1893 }
 0xf25   :  { %v1899_v47 = vmul.f32 %v3181_v11, %v1894_v1  ;;  %v1836_v1 = vadd.f32 %v4223_v51, %v1796_v6 }
 0xf27   :  { %1921 = vperm.xlu0 %2963, %v3263_v32   ;;  %1910 = vrot.lane.b32.xlu1 %v1899_v47, %s3098_s24  ;;  %v1797_v47 = vadd.f32 %v4203_v43, %v1757_v28 }
 0xf2b   :  { %1933 = vperm.xlu0 %2963, %v3181_v11   ;;  %1925 = vperm.xlu1 %2964, %v3179_v10  }
 0xf2f   :  { %1929 = vperm.xlu1 %2964, %v3261_v31   ;;  %2966 = vset.pattern.permute.xlu0 %v3128_v46 }
 0xf33   :  { %2965 = vset.pattern.permute.xlu1 %v3128_v46  ;;  %v1876_v46 = vadd.f32 %v4245_v62, %v1836_v1 }
 0xf91   :  { %v4263_v35 = vpop.permute.xlu0 %1904  ;;  %v4265_v49 = vpop.permute.xlu1 %1906 }
 0xf92   :  { %v1916_v34 = vadd.f32 %v4263_v35, %v1876_v46 }
 0xf95   :  { %v4267_v40 = vpop.permute.xlu0 %1908 }
 0xf99   :  { %v4269_v23 = vpop.permute.xlu1 %1910 }
 0xfa2   :  { %v1922_v45 = vpop.permute.xlu0 %1921 }
 0xfa3   :  { %v1936_v44 = vmul.f32 %v1922_v45, %v3263_v32  ;;  %v1758_v45 = vmul.f32 %v4187_v13, %v3261_v31 }
 0xfa5   :  { %1944 = vrot.lane.b32.xlu1 %v1936_v44, %s3095_s21  ;;  %v1759_v44 = vmul.f32 %v3181_v11, %v4190_v56  ;;  %v1798_v36 = vadd.f32 %v4207_v16, %v1758_v45 }
 0xfa6   :  { %v1926_v30 = vpop.permute.xlu1 %1925  ;;  %v1934_v4 = vpop.permute.xlu0 %1933 }
 0xfa7   :  { %v1937_v50 = vmul.f32 %v3179_v10, %v1926_v30  ;;  %v1939_v54 = vmul.f32 %v3181_v11, %v1934_v4  ;;  %v1837_v30 = vadd.f32 %v4225_v55, %v1797_v47  ;;  %v1799_v33 = vadd.f32 %v4209_v27, %v1759_v44 }
 0xfa8   :  { %v1838_v43 = vadd.f32 %v4227_v20, %v1798_v36  ;;  %v3135_v44 = vmov 52  }
 0xfa9   :  { %1946 = vrot.lane.b32.xlu0 %v1937_v50, %s3095_s21  ;;  %v1877_v51 = vadd.f32 %v4243_v7, %v1837_v30  ;;  %v1839_v62 = vadd.f32 %v4229_v39, %v1799_v33 }
 0xfaa   :  { %v1930_v41 = vpop.permute.xlu1 %1929  ;;  %v1878_v56 = vadd.f32 %v4247_v12, %v1838_v43 }
 0xfab   :  { %v1938_v25 = vmul.f32 %v1930_v41, %v3261_v31  ;;  %v1917_v13 = vadd.f32 %v4265_v49, %v1877_v51  ;;  %v1879_v55 = vadd.f32 %v4249_v48, %v1839_v62 }
 0xfac   :  { %v1918_v16 = vadd.f32 %v4267_v40, %v1878_v56  ;;  %v3132_v40 = vmov 49  }
 0xfad   :  { %1948 = vrot.lane.b32.xlu1 %v1938_v25, %s3095_s21  ;;  %1950 = vrot.lane.b32.xlu0 %v1939_v54, %s3095_s21  ;;  %v1919_v27 = vadd.f32 %v4269_v23, %v1879_v55  ;;  %v3133_v23 = vmov 50   ;;  %v3136_v55 = vmov 53  }
 0xfb1   :  { %1961 = vperm.xlu1 %2965, %v3263_v32   ;;  %1965 = vperm.xlu0 %2966, %v3179_v10  }
 0xfb5   :  { %1969 = vperm.xlu1 %2965, %v3261_v31   ;;  %2967 = vset.pattern.permute.xlu0 %v3129_v29 }
 0xfb9   :  { %1973 = vperm.xlu1 %2965, %v3181_v11  }
 0xfbd   :  { %2968 = vset.pattern.permute.xlu1 %v3129_v29 }
0x1017   :  { %v1945_v19 = vpop.permute.xlu1 %1944 }
0x1018   :  { %v1956_v50 = vadd.f32 %v1945_v19, %v1916_v34 }
0x101b   :  { %v1947_v61 = vpop.permute.xlu0 %1946 }
0x101c   :  { %v1957_v35 = vadd.f32 %v1947_v61, %v1917_v13 }
0x101f   :  { %v4283_v21 = vpop.permute.xlu1 %1948  ;;  %v4285_v18 = vpop.permute.xlu0 %1950 }
0x1020   :  { %v1958_v39 = vadd.f32 %v4283_v21, %v1918_v16  ;;  %v1959_v49 = vadd.f32 %v4285_v18, %v1919_v27 }
0x102c   :  { %v1962_v52 = vpop.permute.xlu1 %1961  ;;  %v1966_v63 = vpop.permute.xlu0 %1965 }
0x102d   :  { %v1976_v58 = vmul.f32 %v1962_v52, %v3263_v32  ;;  %v1977_v37 = vmul.f32 %v3179_v10, %v1966_v63 }
0x102f   :  { %1984 = vrot.lane.b32.xlu0 %v1976_v58, %s3099_s25  ;;  %1986 = vrot.lane.b32.xlu1 %v1977_v37, %s3099_s25 }
0x1030   :  { %v1970_v5 = vpop.permute.xlu1 %1969 }
0x1031   :  { %v1978_v14 = vmul.f32 %v1970_v5, %v3261_v31 }
0x1033   :  { %1988 = vrot.lane.b32.xlu0 %v1978_v14, %s3099_s25 }
0x1034   :  { %v1974_v57 = vpop.permute.xlu1 %1973 }
0x1035   :  { %v1979_v2 = vmul.f32 %v3181_v11, %v1974_v57 }
0x1037   :  { %2001 = vperm.xlu0 %2967, %v3263_v32   ;;  %1990 = vrot.lane.b32.xlu1 %v1979_v2, %s3099_s25 }
0x103b   :  { %2013 = vperm.xlu0 %2967, %v3181_v11   ;;  %2005 = vperm.xlu1 %2968, %v3179_v10  }
0x103f   :  { %2009 = vperm.xlu1 %2968, %v3261_v31   ;;  %2970 = vset.pattern.permute.xlu0 %v3130_v8 }
0x1043   :  { %2969 = vset.pattern.permute.xlu1 %v3130_v8 }
0x10a1   :  { %v1985_v24 = vpop.permute.xlu0 %1984  ;;  %v1987_v15 = vpop.permute.xlu1 %1986 }
0x10a2   :  { %v1996_v4 = vadd.f32 %v1985_v24, %v1956_v50  ;;  %v1997_v7 = vadd.f32 %v1987_v15, %v1957_v35 }
0x10a5   :  { %v1989_v17 = vpop.permute.xlu0 %1988 }
0x10a6   :  { %v1998_v29 = vadd.f32 %v1989_v17, %v1958_v39 }
0x10a9   :  { %v1991_v26 = vpop.permute.xlu1 %1990 }
0x10aa   :  { %v1999_v19 = vadd.f32 %v1991_v26, %v1959_v49 }
0x10b2   :  { %v2002_v3 = vpop.permute.xlu0 %2001 }
0x10b3   :  { %v2016_v53 = vmul.f32 %v2002_v3, %v3263_v32 }
0x10b5   :  { %2024 = vrot.lane.b32.xlu1 %v2016_v53, %s3096_s22 }
0x10b6   :  { %v2006_v38 = vpop.permute.xlu1 %2005  ;;  %v2014_v42 = vpop.permute.xlu0 %2013 }
0x10b7   :  { %v2017_v22 = vmul.f32 %v3179_v10, %v2006_v38  ;;  %v2019_v9 = vmul.f32 %v3181_v11, %v2014_v42  ;;  %v3134_v38 = vmov 51  }
0x10b9   :  { %2026 = vrot.lane.b32.xlu0 %v2017_v22, %s3096_s22 }
0x10ba   :  { %v2010_v60 = vpop.permute.xlu1 %2009 }
0x10bb   :  { %v2018_v59 = vmul.f32 %v2010_v60, %v3261_v31 }
0x10bd   :  { %2028 = vrot.lane.b32.xlu1 %v2018_v59, %s3096_s22  ;;  %2030 = vrot.lane.b32.xlu0 %v2019_v9, %s3096_s22 }
0x1127   :  { %v2025_v41 = vpop.permute.xlu1 %2024 }
0x1128   :  { %v2036_v54 = vadd.f32 %v2025_v41, %v1996_v4 }
0x112a   :  { %2044 = vrot.lane.b32.xlu1 %v2036_v54, %s3131_s29 }
0x112b   :  { %v2027_v20 = vpop.permute.xlu0 %2026 }
0x112c   :  { %v2037_v25 = vadd.f32 %v2027_v20, %v1997_v7 }
0x112e   :  { %2046 = vrot.lane.b32.xlu0 %v2037_v25, %s3131_s29 }
0x112f   :  { %v2029_v12 = vpop.permute.xlu1 %2028  ;;  %v2031_v48 = vpop.permute.xlu0 %2030 }
0x1130   :  { %v2038_v61 = vadd.f32 %v2029_v12, %v1998_v29  ;;  %v2039_v52 = vadd.f32 %v2031_v48, %v1999_v19  ;;  %v3137_v48 = vmov 54  }
0x1132   :  { %2048 = vrot.lane.b32.xlu1 %v2038_v61, %s3131_s29  ;;  %2050 = vrot.lane.b32.xlu0 %v2039_v52, %s3131_s29 }
0x1136   :  { %2062 = vperm.xlu1 %2969, %v3263_v32   ;;  %2066 = vperm.xlu0 %2970, %v3179_v10  }
0x113a   :  { %2070 = vperm.xlu1 %2969, %v3261_v31   ;;  %2971 = vset.pattern.permute.xlu0 %v3132_v40 }
0x113b   :  { %2082 = vperm.xlu0 %2971, %v3263_v32  }
0x113e   :  { %2074 = vperm.xlu1 %2969, %v3181_v11  }
0x113f   :  { %2094 = vperm.xlu0 %2971, %v3181_v11  }
0x1142   :  { %2972 = vset.pattern.permute.xlu1 %v3132_v40 }
0x1143   :  { %2086 = vperm.xlu1 %2972, %v3179_v10   ;;  %2974 = vset.pattern.permute.xlu0 %v3133_v23 }
0x1147   :  { %2090 = vperm.xlu1 %2972, %v3261_v31  }
0x114b   :  { %2973 = vset.pattern.permute.xlu1 %v3133_v23 }
0x119c   :  { %v2045_v21 = vpop.permute.xlu1 %2044 }
0x119d   :  { %2057 = vst.msk [vmem:[#allocation7] sm:$0xff] %vm2056_vm6, %v2045_v21 }
0x11a0   :  { %v2047_v18 = vpop.permute.xlu0 %2046 }
0x11a1   :  { %2058 = vst.msk [vmem:[#allocation7 + $0x8] sm:$0xff] %vm2056_vm6, %v2047_v18 }
0x11a4   :  { %v2049_v63 = vpop.permute.xlu1 %2048  ;;  %v2051_v58 = vpop.permute.xlu0 %2050 }
0x11a5   :  { %2059 = vst.msk [vmem:[#allocation7 + $0x10] sm:$0xff] %vm2056_vm6, %v2049_v63  ;;  %2060 = vst.msk [vmem:[#allocation7 + $0x18] sm:$0xff] %vm2056_vm6, %v2051_v58 }
0x11b1   :  { %v4341_v37 = vpop.permute.xlu1 %2062  ;;  %v4343_v5 = vpop.permute.xlu0 %2066 }
0x11b5   :  { %v4345_v14 = vpop.permute.xlu1 %2070 }
0x11b6   :  { %v2083_v57 = vpop.permute.xlu0 %2082  ;;  %v2079_v61 = vmul.f32 %v4345_v14, %v3261_v31 }
0x11b7   :  { %v2097_v2 = vmul.f32 %v2083_v57, %v3263_v32 }
0x11b9   :  { %v4348_v24 = vpop.permute.xlu1 %2074  ;;  %2105 = vrot.lane.b32.xlu1 %v2097_v2, %s3092_s0 }
0x11ba   :  { %v2095_v26 = vpop.permute.xlu0 %2094 }
0x11bb   :  { %v2100_v53 = vmul.f32 %v3181_v11, %v2095_v26 }
0x11be   :  { %v2087_v15 = vpop.permute.xlu1 %2086 }
0x11bf   :  { %v2098_v17 = vmul.f32 %v3179_v10, %v2087_v15 }
0x11c1   :  { %2107 = vrot.lane.b32.xlu0 %v2098_v17, %s3092_s0 }
0x11c2   :  { %v2091_v3 = vpop.permute.xlu1 %2090 }
0x11c3   :  { %v2099_v8 = vmul.f32 %v2091_v3, %v3261_v31 }
0x11c5   :  { %2109 = vrot.lane.b32.xlu1 %v2099_v8, %s3092_s0  ;;  %2111 = vrot.lane.b32.xlu0 %v2100_v53, %s3092_s0 }
0x11c9   :  { %2122 = vperm.xlu1 %2973, %v3263_v32   ;;  %2126 = vperm.xlu0 %2974, %v3179_v10  }
0x11cd   :  { %2130 = vperm.xlu1 %2973, %v3261_v31   ;;  %2975 = vset.pattern.permute.xlu0 %v3134_v38 }
0x11d1   :  { %2134 = vperm.xlu1 %2973, %v3181_v11  }
0x11d5   :  { %2976 = vset.pattern.permute.xlu1 %v3134_v38  ;;  %v3138_v38 = vmov 55  }
0x122b   :  { %v4363_v42 = vpop.permute.xlu1 %2105 }
0x1233   :  { %v4361_v22 = vpop.permute.xlu0 %2107 }
0x1237   :  { %v4365_v60 = vpop.permute.xlu1 %2109  ;;  %v4367_v9 = vpop.permute.xlu0 %2111 }
0x1238   :  { %v2119_v52 = vadd.f32 %v4365_v60, %v2079_v61  ;;  %v2077_v60 = vmul.f32 %v4341_v37, %v3263_v32 }
0x1244   :  { %v2123_v59 = vpop.permute.xlu1 %2122  ;;  %v2127_v0 = vpop.permute.xlu0 %2126 }
0x1245   :  { %v2137_v6 = vmul.f32 %v2123_v59, %v3263_v32  ;;  %v2138_v28 = vmul.f32 %v3179_v10, %v2127_v0  ;;  %v2117_v59 = vadd.f32 %v4363_v42, %v2077_v60  ;;  %v2078_v0 = vmul.f32 %v3179_v10, %v4343_v5 }
0x1247   :  { %2145 = vrot.lane.b32.xlu0 %v2137_v6, %s3097_s23  ;;  %2147 = vrot.lane.b32.xlu1 %v2138_v28, %s3097_s23  ;;  %v2118_v28 = vadd.f32 %v4361_v22, %v2078_v0 }
0x1248   :  { %v2131_v1 = vpop.permute.xlu1 %2130 }
0x1249   :  { %v2139_v47 = vmul.f32 %v2131_v1, %v3261_v31 }
0x124b   :  { %2149 = vrot.lane.b32.xlu0 %v2139_v47, %s3097_s23  ;;  %v2080_v47 = vmul.f32 %v3181_v11, %v4348_v24 }
0x124c   :  { %v2135_v46 = vpop.permute.xlu1 %2134 }
0x124d   :  { %v2140_v45 = vmul.f32 %v3181_v11, %v2135_v46 }
0x124f   :  { %2162 = vperm.xlu0 %2975, %v3263_v32   ;;  %2151 = vrot.lane.b32.xlu1 %v2140_v45, %s3097_s23 }
0x1253   :  { %2174 = vperm.xlu0 %2975, %v3181_v11   ;;  %2166 = vperm.xlu1 %2976, %v3179_v10  }
0x1257   :  { %2170 = vperm.xlu1 %2976, %v3261_v31   ;;  %2978 = vset.pattern.permute.xlu0 %v3135_v44 }
0x125b   :  { %2977 = vset.pattern.permute.xlu1 %v3135_v44 }
0x12b9   :  { %v4381_v30 = vpop.permute.xlu0 %2145  ;;  %v4383_v34 = vpop.permute.xlu1 %2147 }
0x12ba   :  { %v2157_v6 = vadd.f32 %v4381_v30, %v2117_v59  ;;  %v2158_v46 = vadd.f32 %v4383_v34, %v2118_v28 }
0x12bd   :  { %v2150_v36 = vpop.permute.xlu0 %2149 }
0x12be   :  { %v2159_v23 = vadd.f32 %v2150_v36, %v2119_v52  ;;  %v2120_v36 = vadd.f32 %v4367_v9, %v2080_v47 }
0x12c1   :  { %v4385_v33 = vpop.permute.xlu1 %2151 }
0x12c2   :  { %v2160_v42 = vadd.f32 %v4385_v33, %v2120_v36 }
0x12ca   :  { %v2163_v51 = vpop.permute.xlu0 %2162 }
0x12cb   :  { %v2177_v50 = vmul.f32 %v2163_v51, %v3263_v32 }
0x12cd   :  { %2185 = vrot.lane.b32.xlu1 %v2177_v50, %s3094_s1 }
0x12ce   :  { %v2167_v43 = vpop.permute.xlu1 %2166  ;;  %v2175_v13 = vpop.permute.xlu0 %2174 }
0x12cf   :  { %v2178_v62 = vmul.f32 %v3179_v10, %v2167_v43  ;;  %v2180_v41 = vmul.f32 %v3181_v11, %v2175_v13 }
0x12d1   :  { %2187 = vrot.lane.b32.xlu0 %v2178_v62, %s3094_s1 }
0x12d2   :  { %v2171_v4 = vpop.permute.xlu1 %2170 }
0x12d3   :  { %v2179_v56 = vmul.f32 %v2171_v4, %v3261_v31 }
0x12d5   :  { %2189 = vrot.lane.b32.xlu1 %v2179_v56, %s3094_s1  ;;  %2191 = vrot.lane.b32.xlu0 %v2180_v41, %s3094_s1 }
0x12d9   :  { %2202 = vperm.xlu1 %2977, %v3263_v32   ;;  %2206 = vperm.xlu0 %2978, %v3179_v10  }
0x12dd   :  { %2210 = vperm.xlu1 %2977, %v3261_v31   ;;  %2979 = vset.pattern.permute.xlu0 %v3136_v55 }
0x12e1   :  { %2214 = vperm.xlu1 %2977, %v3181_v11  }
0x12e5   :  { %2980 = vset.pattern.permute.xlu1 %v3136_v55 }
0x133f   :  { %v2186_v54 = vpop.permute.xlu1 %2185 }
0x1340   :  { %v2197_v1 = vadd.f32 %v2186_v54, %v2157_v6 }
0x1343   :  { %v2188_v35 = vpop.permute.xlu0 %2187 }
0x1344   :  { %v2198_v37 = vadd.f32 %v2188_v35, %v2158_v46 }
0x1347   :  { %v2190_v16 = vpop.permute.xlu1 %2189  ;;  %v4399_v27 = vpop.permute.xlu0 %2191 }
0x1348   :  { %v2199_v21 = vadd.f32 %v2190_v16, %v2159_v23  ;;  %v2200_v30 = vadd.f32 %v4399_v27, %v2160_v42 }
0x1354   :  { %v2203_v7 = vpop.permute.xlu1 %2202  ;;  %v2207_v20 = vpop.permute.xlu0 %2206 }
0x1355   :  { %v2217_v39 = vmul.f32 %v2203_v7, %v3263_v32  ;;  %v2218_v49 = vmul.f32 %v3179_v10, %v2207_v20 }
0x1357   :  { %2225 = vrot.lane.b32.xlu0 %v2217_v39, %s3098_s24  ;;  %2227 = vrot.lane.b32.xlu1 %v2218_v49, %s3098_s24 }
0x1358   :  { %v2211_v25 = vpop.permute.xlu1 %2210 }
0x1359   :  { %v2219_v29 = vmul.f32 %v2211_v25, %v3261_v31 }
0x135b   :  { %2229 = vrot.lane.b32.xlu0 %v2219_v29, %s3098_s24 }
0x135c   :  { %v2215_v19 = vpop.permute.xlu1 %2214 }
0x135d   :  { %v2220_v12 = vmul.f32 %v3181_v11, %v2215_v19  ;;  %v3139_v19 = vmov 57  }
0x135f   :  { %2242 = vperm.xlu0 %2979, %v3263_v32   ;;  %2231 = vrot.lane.b32.xlu1 %v2220_v12, %s3098_s24 }
0x1363   :  { %2254 = vperm.xlu0 %2979, %v3181_v11   ;;  %2246 = vperm.xlu1 %2980, %v3179_v10  }
0x1367   :  { %2250 = vperm.xlu1 %2980, %v3261_v31   ;;  %2982 = vset.pattern.permute.xlu0 %v3137_v48 }
0x136b   :  { %2981 = vset.pattern.permute.xlu1 %v3137_v48 }
0x13c9   :  { %v2226_v40 = vpop.permute.xlu0 %2225  ;;  %v2228_v58 = vpop.permute.xlu1 %2227 }
0x13ca   :  { %v2237_v45 = vadd.f32 %v2226_v40, %v2197_v1  ;;  %v2238_v50 = vadd.f32 %v2228_v58, %v2198_v37 }
0x13cd   :  { %v2230_v18 = vpop.permute.xlu0 %2229 }
0x13ce   :  { %v2239_v63 = vadd.f32 %v2230_v18, %v2199_v21 }
0x13d1   :  { %v2232_v57 = vpop.permute.xlu1 %2231 }
0x13d2   :  { %v2240_v22 = vadd.f32 %v2232_v57, %v2200_v30 }
0x13da   :  { %v2243_v2 = vpop.permute.xlu0 %2242 }
0x13db   :  { %v2257_v15 = vmul.f32 %v2243_v2, %v3263_v32 }
0x13dd   :  { %2265 = vrot.lane.b32.xlu1 %v2257_v15, %s3095_s21  ;;  %v3141_v15 = vmov 58  }
0x13de   :  { %v2247_v17 = vpop.permute.xlu1 %2246  ;;  %v2255_v3 = vpop.permute.xlu0 %2254 }
0x13df   :  { %v2258_v26 = vmul.f32 %v3179_v10, %v2247_v17  ;;  %v2260_v53 = vmul.f32 %v3181_v11, %v2255_v3  ;;  %v3142_v17 = vmov 59   ;;  %v3144_v3 = vmov 61  }
0x13e1   :  { %2267 = vrot.lane.b32.xlu0 %v2258_v26, %s3095_s21  ;;  %v3143_v26 = vmov 60  }
0x13e2   :  { %v2251_v14 = vpop.permute.xlu1 %2250 }
0x13e3   :  { %v2259_v8 = vmul.f32 %v2251_v14, %v3261_v31  ;;  %v3145_v14 = vmov 62  }
0x13e5   :  { %2269 = vrot.lane.b32.xlu1 %v2259_v8, %s3095_s21  ;;  %2271 = vrot.lane.b32.xlu0 %v2260_v53, %s3095_s21  ;;  %v3146_v53 = vmov 63   ;;  %v3147_v8 = vmov 56  }
0x13e9   :  { %2282 = vperm.xlu1 %2981, %v3263_v32   ;;  %2286 = vperm.xlu0 %2982, %v3179_v10  }
0x13ed   :  { %2290 = vperm.xlu1 %2981, %v3261_v31   ;;  %2983 = vset.pattern.permute.xlu0 %v3138_v38 }
0x13f1   :  { %2294 = vperm.xlu1 %2981, %v3181_v11  }
0x13f5   :  { %2984 = vset.pattern.permute.xlu1 %v3138_v38 }
0x144f   :  { %v2266_v44 = vpop.permute.xlu1 %2265 }
0x1450   :  { %v2277_v51 = vadd.f32 %v2266_v44, %v2237_v45 }
0x1453   :  { %v2268_v5 = vpop.permute.xlu0 %2267 }
0x1454   :  { %v2278_v43 = vadd.f32 %v2268_v5, %v2238_v50 }
0x1457   :  { %v2270_v62 = vpop.permute.xlu1 %2269  ;;  %v2272_v13 = vpop.permute.xlu0 %2271 }
0x1458   :  { %v2279_v4 = vadd.f32 %v2270_v62, %v2239_v63  ;;  %v2280_v24 = vadd.f32 %v2272_v13, %v2240_v22 }
0x1464   :  { %v2283_v41 = vpop.permute.xlu1 %2282  ;;  %v2287_v34 = vpop.permute.xlu0 %2286 }
0x1465   :  { %v2297_v56 = vmul.f32 %v2283_v41, %v3263_v32  ;;  %v2298_v9 = vmul.f32 %v3179_v10, %v2287_v34 }
0x1467   :  { %2305 = vrot.lane.b32.xlu0 %v2297_v56, %s3099_s25  ;;  %2307 = vrot.lane.b32.xlu1 %v2298_v9, %s3099_s25 }
0x1468   :  { %v2291_v33 = vpop.permute.xlu1 %2290 }
0x1469   :  { %v2299_v55 = vmul.f32 %v2291_v33, %v3261_v31 }
0x146b   :  { %2309 = vrot.lane.b32.xlu0 %v2299_v55, %s3099_s25 }
0x146c   :  { %v2295_v35 = vpop.permute.xlu1 %2294 }
0x146d   :  { %v2300_v54 = vmul.f32 %v3181_v11, %v2295_v35 }
0x146f   :  { %2322 = vperm.xlu0 %2983, %v3263_v32   ;;  %2311 = vrot.lane.b32.xlu1 %v2300_v54, %s3099_s25 }
0x1473   :  { %2334 = vperm.xlu0 %2983, %v3181_v11   ;;  %2326 = vperm.xlu1 %2984, %v3179_v10  }
0x1477   :  { %2330 = vperm.xlu1 %2984, %v3261_v31   ;;  %2986 = vset.pattern.permute.xlu0 %v3139_v19 }
0x147b   :  { %2985 = vset.pattern.permute.xlu1 %v3139_v19 }
0x14d9   :  { %v2308_v16 = vpop.permute.xlu1 %2307  ;;  %v2306_v27 = vpop.permute.xlu0 %2305 }
0x14da   :  { %v2318_v7 = vadd.f32 %v2308_v16, %v2278_v43  ;;  %v2317_v20 = vadd.f32 %v2306_v27, %v2277_v51 }
0x14dd   :  { %v2310_v39 = vpop.permute.xlu0 %2309 }
0x14de   :  { %v4453_v49 = vadd.f32 %v2310_v39, %v2279_v4 }
0x14e1   :  { %v2312_v25 = vpop.permute.xlu1 %2311 }
0x14e2   :  { %v4455_v29 = vadd.f32 %v2312_v25, %v2280_v24 }
0x14ea   :  { %v2323_v12 = vpop.permute.xlu0 %2322 }
0x14eb   :  { %v2337_v48 = vmul.f32 %v2323_v12, %v3263_v32 }
0x14ed   :  { %2345 = vrot.lane.b32.xlu1 %v2337_v48, %s3096_s22 }
0x14ee   :  { %v2327_v61 = vpop.permute.xlu1 %2326  ;;  %v2335_v40 = vpop.permute.xlu0 %2334 }
0x14ef   :  { %v2338_v52 = vmul.f32 %v3179_v10, %v2327_v61  ;;  %v2340_v21 = vmul.f32 %v3181_v11, %v2335_v40 }
0x14f1   :  { %2347 = vrot.lane.b32.xlu0 %v2338_v52, %s3096_s22 }
0x14f2   :  { %v2331_v23 = vpop.permute.xlu1 %2330 }
0x14f3   :  { %v2339_v18 = vmul.f32 %v2331_v23, %v3261_v31 }
0x14f5   :  { %2349 = vrot.lane.b32.xlu1 %v2339_v18, %s3096_s22  ;;  %2351 = vrot.lane.b32.xlu0 %v2340_v21, %s3096_s22 }
0x155f   :  { %v2346_v63 = vpop.permute.xlu1 %2345 }
0x1560   :  { %v2357_v58 = vadd.f32 %v2346_v63, %v2317_v20 }
0x1562   :  { %2365 = vrot.lane.b32.xlu1 %v2357_v58, %s3140_s30 }
0x1563   :  { %v2348_v57 = vpop.permute.xlu0 %2347 }
0x1564   :  { %v2358_v2 = vadd.f32 %v2348_v57, %v2318_v7 }
0x1566   :  { %2403 = vperm.xlu1 %2985, %v3263_v32   ;;  %2367 = vrot.lane.b32.xlu0 %v2358_v2, %s3140_s30 }
0x1567   :  { %v4499_v38 = vpop.permute.xlu1 %2349  ;;  %v4501_v60 = vpop.permute.xlu0 %2351 }
0x156a   :  { %2411 = vperm.xlu1 %2985, %v3261_v31   ;;  %2407 = vperm.xlu0 %2986, %v3179_v10  }
0x156e   :  { %2415 = vperm.xlu1 %2985, %v3181_v11   ;;  %2987 = vset.pattern.permute.xlu0 %v3141_v15 }
0x156f   :  { %2443 = vperm.xlu0 %2987, %v3263_v32  }
0x1572   :  { %2988 = vset.pattern.permute.xlu1 %v3141_v15 }
0x1573   :  { %2447 = vperm.xlu1 %2988, %v3179_v10   ;;  %2455 = vperm.xlu0 %2987, %v3181_v11  }
0x1577   :  { %2451 = vperm.xlu1 %2988, %v3261_v31   ;;  %2990 = vset.pattern.permute.xlu0 %v3142_v17 }
0x1578   :  { %2487 = vperm.xlu0 %2990, %v3179_v10  }
0x157b   :  { %2989 = vset.pattern.permute.xlu1 %v3142_v17 }
0x157c   :  { %2483 = vperm.xlu1 %2989, %v3263_v32   ;;  %2991 = vset.pattern.permute.xlu0 %v3143_v26 }
0x157d   :  { %2523 = vperm.xlu0 %2991, %v3263_v32  }
0x1580   :  { %2491 = vperm.xlu1 %2989, %v3261_v31  }
0x1581   :  { %2535 = vperm.xlu0 %2991, %v3181_v11  }
0x1584   :  { %2495 = vperm.xlu1 %2989, %v3181_v11  }
0x1585   :  { %2994 = vset.pattern.permute.xlu0 %v3144_v3 }
0x1586   :  { %2567 = vperm.xlu0 %2994, %v3179_v10  }
0x1588   :  { %2992 = vset.pattern.permute.xlu1 %v3143_v26 }
0x1589   :  { %2527 = vperm.xlu1 %2992, %v3179_v10  }
0x158a   :  { %2995 = vset.pattern.permute.xlu0 %v3145_v14 }
0x158b   :  { %2603 = vperm.xlu0 %2995, %v3263_v32  }
0x158d   :  { %2531 = vperm.xlu1 %2992, %v3261_v31  }
0x158f   :  { %2615 = vperm.xlu0 %2995, %v3181_v11  }
0x1591   :  { %2993 = vset.pattern.permute.xlu1 %v3144_v3 }
0x1592   :  { %2563 = vperm.xlu1 %2993, %v3263_v32  }
0x1593   :  { %2998 = vset.pattern.permute.xlu0 %v3146_v53 }
0x1594   :  { %2647 = vperm.xlu0 %2998, %v3179_v10  }
0x1596   :  { %2571 = vperm.xlu1 %2993, %v3261_v31  }
0x1598   :  { %2999 = vset.pattern.permute.xlu0 %v3147_v8 }
0x1599   :  { %2383 = vperm.xlu0 %2999, %v3263_v32  }
0x159a   :  { %2575 = vperm.xlu1 %2993, %v3181_v11  }
0x159d   :  { %2395 = vperm.xlu0 %2999, %v3181_v11  }
0x159e   :  { %2996 = vset.pattern.permute.xlu1 %v3145_v14 }
0x159f   :  { %2607 = vperm.xlu1 %2996, %v3179_v10  }
0x15a1   :  { %3001 = vset.pattern.permute.xlu0 %v3146_v53 }
0x15a3   :  { %2611 = vperm.xlu1 %2996, %v3261_v31  }
0x15a7   :  { %2997 = vset.pattern.permute.xlu1 %v3146_v53 }
0x15a8   :  { %2643 = vperm.xlu1 %2997, %v3263_v32  }
0x15ac   :  { %2651 = vperm.xlu1 %2997, %v3261_v31  }
0x15b0   :  { %2655 = vperm.xlu1 %2997, %v3181_v11  }
0x15b4   :  { %3000 = vset.pattern.permute.xlu1 %v3147_v8 }
0x15b5   :  { %2387 = vperm.xlu1 %3000, %v3179_v10  }
0x15b9   :  { %2391 = vperm.xlu1 %3000, %v3261_v31  }
0x15d4   :  { %v2366_v59 = vpop.permute.xlu1 %2365 }
0x15d5   :  { %2378 = vst.msk [vmem:[#allocation7] sm:$0xff] %vm2377_vm7, %v2366_v59 }
0x15d8   :  { %v2368_v0 = vpop.permute.xlu0 %2367 }
0x15d9   :  { %2379 = vst.msk [vmem:[#allocation7 + $0x8] sm:$0xff] %vm2377_vm7, %v2368_v0  ;;  %v2359_v0 = vadd.f32 %v4499_v38, %v4453_v49 }
0x15e1   :  { %v2404_v6 = vpop.permute.xlu1 %2403 }
0x15e2   :  { %v2418_v28 = vmul.f32 %v2404_v6, %v3263_v32 }
0x15e4   :  { %2426 = vrot.lane.b32.xlu1 %v2418_v28, %s3092_s0  ;;  %v2360_v28 = vadd.f32 %v4501_v60, %v4455_v29 }
0x15e5   :  { %v2412_v1 = vpop.permute.xlu1 %2411  ;;  %v2408_v47 = vpop.permute.xlu0 %2407 }
0x15e6   :  { %v2420_v46 = vmul.f32 %v2412_v1, %v3261_v31  ;;  %v2419_v45 = vmul.f32 %v3179_v10, %v2408_v47 }
0x15e8   :  { %2430 = vrot.lane.b32.xlu1 %v2420_v46, %s3092_s0  ;;  %2428 = vrot.lane.b32.xlu0 %v2419_v45, %s3092_s0 }
0x15e9   :  { %v2416_v44 = vpop.permute.xlu1 %2415 }
0x15ea   :  { %v2421_v36 = vmul.f32 %v3181_v11, %v2416_v44  ;;  %v2444_v37 = vpop.permute.xlu0 %2443 }
0x15eb   :  { %v2458_v51 = vmul.f32 %v2444_v37, %v3263_v32 }
0x15ec   :  { %2432 = vrot.lane.b32.xlu0 %v2421_v36, %s3092_s0 }
0x15ed   :  { %2466 = vrot.lane.b32.xlu1 %v2458_v51, %s3097_s23 }
0x15ee   :  { %v2448_v42 = vpop.permute.xlu1 %2447  ;;  %v2456_v50 = vpop.permute.xlu0 %2455 }
0x15ef   :  { %v2459_v5 = vmul.f32 %v3179_v10, %v2448_v42  ;;  %v2461_v43 = vmul.f32 %v3181_v11, %v2456_v50 }
0x15f1   :  { %2468 = vrot.lane.b32.xlu0 %v2459_v5, %s3097_s23 }
0x15f2   :  { %v2452_v30 = vpop.permute.xlu1 %2451 }
0x15f3   :  { %v2460_v22 = vmul.f32 %v2452_v30, %v3261_v31  ;;  %v2488_v62 = vpop.permute.xlu0 %2487 }
0x15f4   :  { %v2499_v13 = vmul.f32 %v3179_v10, %v2488_v62 }
0x15f5   :  { %2470 = vrot.lane.b32.xlu1 %v2460_v22, %s3097_s23  ;;  %2472 = vrot.lane.b32.xlu0 %v2461_v43, %s3097_s23 }
0x15f7   :  { %v2484_v4 = vpop.permute.xlu1 %2483 }
0x15f8   :  { %v2498_v24 = vmul.f32 %v2484_v4, %v3263_v32  ;;  %v2524_v56 = vpop.permute.xlu0 %2523 }
0x15f9   :  { %2508 = vrot.lane.b32.xlu0 %v2499_v13, %s3094_s1  ;;  %v2538_v33 = vmul.f32 %v2524_v56, %v3263_v32 }
0x15fa   :  { %2506 = vrot.lane.b32.xlu1 %v2498_v24, %s3094_s1 }
0x15fb   :  { %v2492_v41 = vpop.permute.xlu1 %2491 }
0x15fc   :  { %v2500_v34 = vmul.f32 %v2492_v41, %v3261_v31  ;;  %v2536_v35 = vpop.permute.xlu0 %2535 }
0x15fd   :  { %v2541_v7 = vmul.f32 %v3181_v11, %v2536_v35 }
0x15fe   :  { %2510 = vrot.lane.b32.xlu1 %v2500_v34, %s3094_s1 }
0x15ff   :  { %v2496_v9 = vpop.permute.xlu1 %2495 }
0x1600   :  { %v2501_v55 = vmul.f32 %v3181_v11, %v2496_v9 }
0x1601   :  { %v2568_v39 = vpop.permute.xlu0 %2567 }
0x1602   :  { %2512 = vrot.lane.b32.xlu0 %v2501_v55, %s3094_s1  ;;  %2546 = vrot.lane.b32.xlu1 %v2538_v33, %s3098_s24  ;;  %v2579_v25 = vmul.f32 %v3179_v10, %v2568_v39 }
0x1604   :  { %v2528_v54 = vpop.permute.xlu1 %2527 }
0x1605   :  { %v2539_v16 = vmul.f32 %v3179_v10, %v2528_v54 }
0x1606   :  { %v2604_v52 = vpop.permute.xlu0 %2603 }
0x1607   :  { %2548 = vrot.lane.b32.xlu0 %v2539_v16, %s3098_s24  ;;  %v2618_v23 = vmul.f32 %v2604_v52, %v3263_v32 }
0x1608   :  { %v2532_v27 = vpop.permute.xlu1 %2531 }
0x1609   :  { %v2540_v20 = vmul.f32 %v2532_v27, %v3261_v31 }
0x160a   :  { %v2616_v18 = vpop.permute.xlu0 %2615 }
0x160b   :  { %2550 = vrot.lane.b32.xlu1 %v2540_v20, %s3098_s24  ;;  %2552 = vrot.lane.b32.xlu0 %v2541_v7, %s3098_s24  ;;  %v2621_v2 = vmul.f32 %v3181_v11, %v2616_v18 }
0x160d   :  { %v2564_v19 = vpop.permute.xlu1 %2563 }
0x160e   :  { %v2578_v12 = vmul.f32 %v2564_v19, %v3263_v32 }
0x160f   :  { %2588 = vrot.lane.b32.xlu0 %v2579_v25, %s3095_s21  ;;  %v2648_v17 = vpop.permute.xlu0 %2647 }
0x1610   :  { %2586 = vrot.lane.b32.xlu1 %v2578_v12, %s3095_s21  ;;  %v2659_v26 = vmul.f32 %v3179_v10, %v2648_v17 }
0x1611   :  { %v2572_v48 = vpop.permute.xlu1 %2571 }
0x1612   :  { %v2580_v61 = vmul.f32 %v2572_v48, %v3261_v31 }
0x1614   :  { %2590 = vrot.lane.b32.xlu1 %v2580_v61, %s3095_s21  ;;  %v2384_v47 = vpop.permute.xlu0 %2383 }
0x1615   :  { %v2576_v40 = vpop.permute.xlu1 %2575  ;;  %v2398_v9 = vmul.f32 %v2384_v47, %v3263_v32 }
0x1616   :  { %v2581_v21 = vmul.f32 %v3181_v11, %v2576_v40 }
0x1618   :  { %2592 = vrot.lane.b32.xlu0 %v2581_v21, %s3095_s21  ;;  %2626 = vrot.lane.b32.xlu1 %v2618_v23, %s3099_s25  ;;  %v2396_v45 = vpop.permute.xlu0 %2395 }
0x1619   :  { %v2401_v12 = vmul.f32 %v3181_v11, %v2396_v45 }
0x161a   :  { %v2608_v63 = vpop.permute.xlu1 %2607 }
0x161b   :  { %v2619_v58 = vmul.f32 %v3179_v10, %v2608_v63 }
0x161d   :  { %2628 = vrot.lane.b32.xlu0 %v2619_v58, %s3099_s25 }
0x161e   :  { %v2612_v57 = vpop.permute.xlu1 %2611 }
0x161f   :  { %v2620_v15 = vmul.f32 %v2612_v57, %v3261_v31 }
0x1621   :  { %2630 = vrot.lane.b32.xlu1 %v2620_v15, %s3099_s25  ;;  %2632 = vrot.lane.b32.xlu0 %v2621_v2, %s3099_s25 }
0x1623   :  { %v2644_v3 = vpop.permute.xlu1 %2643 }
0x1624   :  { %v2658_v14 = vmul.f32 %v2644_v3, %v3263_v32 }
0x1625   :  { %2668 = vrot.lane.b32.xlu0 %v2659_v26, %s3096_s22 }
0x1626   :  { %2666 = vrot.lane.b32.xlu1 %v2658_v14, %s3096_s22 }
0x1627   :  { %v2652_v53 = vpop.permute.xlu1 %2651 }
0x1628   :  { %v2660_v8 = vmul.f32 %v2652_v53, %v3261_v31 }
0x162a   :  { %2670 = vrot.lane.b32.xlu1 %v2660_v8, %s3096_s22 }
0x162b   :  { %v2656_v59 = vpop.permute.xlu1 %2655 }
0x162c   :  { %v2661_v6 = vmul.f32 %v3181_v11, %v2656_v59 }
0x162e   :  { %2369 = vrot.lane.b32.xlu1 %v2359_v0, %s3140_s30  ;;  %2672 = vrot.lane.b32.xlu0 %v2661_v6, %s3096_s22 }
0x1630   :  { %v2388_v1 = vpop.permute.xlu1 %2387 }
0x1631   :  { %v2399_v34 = vmul.f32 %v3179_v10, %v2388_v1 }
0x1632   :  { %2371 = vrot.lane.b32.xlu0 %v2360_v28, %s3140_s30 }
0x1634   :  { %v2392_v46 = vpop.permute.xlu1 %2391 }
0x1635   :  { %v2400_v54 = vmul.f32 %v2392_v46, %v3261_v31 }
0x1656   :  { %v2427_v44 = vpop.permute.xlu1 %2426 }
0x1657   :  { %v2438_v55 = vadd.f32 %v2427_v44, %v2398_v9 }
0x165a   :  { %v2429_v36 = vpop.permute.xlu0 %2428  ;;  %v2431_v37 = vpop.permute.xlu1 %2430 }
0x165b   :  { %v2439_v33 = vadd.f32 %v2429_v36, %v2399_v34  ;;  %v2440_v39 = vadd.f32 %v2431_v37, %v2400_v54 }
0x165e   :  { %v2433_v51 = vpop.permute.xlu0 %2432 }
0x165f   :  { %v2467_v49 = vpop.permute.xlu1 %2466  ;;  %v2441_v32 = vadd.f32 %v2433_v51, %v2401_v12 }
0x1660   :  { %v2478_v16 = vadd.f32 %v2467_v49, %v2438_v55 }
0x1663   :  { %v2469_v38 = vpop.permute.xlu0 %2468 }
0x1664   :  { %v2479_v35 = vadd.f32 %v2469_v38, %v2439_v33 }
0x1667   :  { %v2471_v42 = vpop.permute.xlu1 %2470  ;;  %v2473_v50 = vpop.permute.xlu0 %2472 }
0x1668   :  { %v2480_v48 = vadd.f32 %v2471_v42, %v2440_v39  ;;  %v2481_v63 = vadd.f32 %v2473_v50, %v2441_v32 }
0x166b   :  { %v2509_v30 = vpop.permute.xlu0 %2508 }
0x166c   :  { %v2507_v5 = vpop.permute.xlu1 %2506  ;;  %v2519_v20 = vadd.f32 %v2509_v30, %v2479_v35 }
0x166d   :  { %v2518_v25 = vadd.f32 %v2507_v5, %v2478_v16 }
0x1670   :  { %v2511_v43 = vpop.permute.xlu1 %2510 }
0x1671   :  { %v2520_v23 = vadd.f32 %v2511_v43, %v2480_v48 }
0x1674   :  { %v2513_v22 = vpop.permute.xlu0 %2512  ;;  %v2547_v62 = vpop.permute.xlu1 %2546 }
0x1675   :  { %v2558_v61 = vadd.f32 %v2547_v62, %v2518_v25  ;;  %v2521_v17 = vadd.f32 %v2513_v22, %v2481_v63 }
0x1679   :  { %v2549_v29 = vpop.permute.xlu0 %2548 }
0x167a   :  { %v2559_v19 = vadd.f32 %v2549_v29, %v2519_v20 }
0x167d   :  { %v2551_v60 = vpop.permute.xlu1 %2550  ;;  %v2553_v13 = vpop.permute.xlu0 %2552 }
0x167e   :  { %v2560_v31 = vadd.f32 %v2551_v60, %v2520_v23  ;;  %v2561_v11 = vadd.f32 %v2553_v13, %v2521_v17 }
0x1681   :  { %v2589_v24 = vpop.permute.xlu0 %2588 }
0x1682   :  { %v2587_v4 = vpop.permute.xlu1 %2586  ;;  %v2599_v40 = vadd.f32 %v2589_v24, %v2559_v19 }
0x1683   :  { %v2598_v21 = vadd.f32 %v2587_v4, %v2558_v61 }
0x1686   :  { %v2591_v41 = vpop.permute.xlu1 %2590 }
0x1687   :  { %v2600_v26 = vadd.f32 %v2591_v41, %v2560_v31 }
0x168a   :  { %v2593_v56 = vpop.permute.xlu0 %2592  ;;  %v2627_v27 = vpop.permute.xlu1 %2626 }
0x168b   :  { %v2638_v58 = vadd.f32 %v2627_v27, %v2598_v21  ;;  %v2601_v8 = vadd.f32 %v2593_v56, %v2561_v11 }
0x168f   :  { %v2629_v7 = vpop.permute.xlu0 %2628 }
0x1690   :  { %v2639_v18 = vadd.f32 %v2629_v7, %v2599_v40 }
0x1693   :  { %v2631_v10 = vpop.permute.xlu1 %2630  ;;  %v2633_v52 = vpop.permute.xlu0 %2632 }
0x1694   :  { %v2640_v14 = vadd.f32 %v2631_v10, %v2600_v26  ;;  %v2641_v0 = vadd.f32 %v2633_v52, %v2601_v8 }
0x1697   :  { %v2669_v57 = vpop.permute.xlu0 %2668 }
0x1698   :  { %v2679_v2 = vadd.f32 %v2669_v57, %v2639_v18  ;;  %v2667_v15 = vpop.permute.xlu1 %2666 }
0x1699   :  { %v2678_v3 = vadd.f32 %v2667_v15, %v2638_v58 }
0x169a   :  { %2688 = vrot.lane.b32.xlu0 %v2679_v2, %s3148_s3 }
0x169b   :  { %2686 = vrot.lane.b32.xlu1 %v2678_v3, %s3148_s3 }
0x169c   :  { %v2671_v53 = vpop.permute.xlu1 %2670 }
0x169d   :  { %v2680_v59 = vadd.f32 %v2671_v53, %v2640_v14 }
0x169f   :  { %2690 = vrot.lane.b32.xlu1 %v2680_v59, %s3148_s3 }
0x16a0   :  { %v2370_v6 = vpop.permute.xlu1 %2369  ;;  %v2673_v28 = vpop.permute.xlu0 %2672 }
0x16a1   :  { %2380 = vst.msk [vmem:[#allocation7 + $0x10] sm:$0xff] %vm2377_vm7, %v2370_v6  ;;  %v2681_v1 = vadd.f32 %v2673_v28, %v2641_v0 }
0x16a3   :  { %2692 = vrot.lane.b32.xlu0 %v2681_v1, %s3148_s3 }
0x16a4   :  { %v2372_v47 = vpop.permute.xlu0 %2371 }
0x16a5   :  { %2381 = vst.msk [vmem:[#allocation7 + $0x18] sm:$0xff] %vm2377_vm7, %v2372_v47 }
0x170c   :  { %v2689_v46 = vpop.permute.xlu0 %2688 }
0x170d   :  { %2700 = vst.msk [vmem:[#allocation7 + $0x8] sm:$0xff] %vm2698_vm8, %v2689_v46  ;;  %v2687_v45 = vpop.permute.xlu1 %2686 }
0x170e   :  { %2699 = vst.msk [vmem:[#allocation7] sm:$0xff] %vm2698_vm8, %v2687_v45 }
0x1711   :  { %v2691_v44 = vpop.permute.xlu1 %2690 }
0x1712   :  { %2701 = vst.msk [vmem:[#allocation7 + $0x10] sm:$0xff] %vm2698_vm8, %v2691_v44 }
0x1715   :  { %v2693_v36 = vpop.permute.xlu0 %2692 }
0x1716   :  { %2702 = vst.msk [vmem:[#allocation7 + $0x18] sm:$0xff] %vm2698_vm8, %v2693_v36 }
0x1717   :  { %3053 = shalt.err (!%p3050_p0)
}
0x1718   :  { %2714 = dma.vmem_to_hbm [thread:$0]  %s2709_s5, 512, %s4581_s2, [#allocation4], %s3069_s12, %s3069_s12, %s3070_s13  }
0x1719   :  { %3066 = dma.done.wait [#allocation4], 512  }
0x171a   :  { %3067 = vsyncadd [#allocation4], 4294966784 }
0x171b   :  { %2718 = vsyncpa [#allocation3], 1 }
0x171c   :  { %2719 = vsyncpa [#allocation6], 1 }
0x171d   :  { %2720 = vsyncpa [#allocation4], 1 }

</bundles_post_ra>
